<compile_context>
chip_gen: v6e
topology: v6e:2x2x1
jax: 0.10.0
libtpu: 0.0.40
codegen_flags: <defaults>
</compile_context>

<pallas_src>
import functools

import jax
import jax.numpy as jnp
from jax.experimental import pallas as pl
from jax.experimental.pallas import tpu as pltpu


MLP_INPUT_DIM = 19
MLP_OUTPUT_DIM = 8
OUTPUT_HIDDEN_DIM = 400

# Lane-aligned (multiple-of-128) padded dims used inside the kernel.
HIDDEN_PAD = ((OUTPUT_HIDDEN_DIM + 127) // 128) * 128        # 512
OUT_PAD = max(128, ((MLP_OUTPUT_DIM + 127) // 128) * 128)    # 128

_TILE_GRAIN = 256  # matches the 256-wide v6e/v7x MXU; also fine (2x128) on v5e


def _round_up(n, m):
    return ((n + m - 1) // m) * m


def _choose_batch_tile(batch, desired):
    """Pick the batch tile: big for low grid overhead, but >= 2 grid steps when
    possible so both v7x TensorCores get work; always a multiple of 256."""
    desired = max(_TILE_GRAIN, _round_up(desired, _TILE_GRAIN))
    b_grain = _round_up(batch, _TILE_GRAIN)
    if b_grain >= 2 * _TILE_GRAIN:
        half = _round_up((b_grain + 1) // 2, _TILE_GRAIN)
        return min(desired, half)
    return _TILE_GRAIN


def _rep(i):  # replicated (weights/biases): same block for every grid step
    return (0, 0)


def _mlp_kernel(x_ref,
                w1_ref, b1_ref,
                w2_ref, b2_ref,
                w3_ref, b3_ref,
                w4_ref, b4_ref,
                o_ref):
    # fc_1 + relu (bf16 MXU operands, f32 accumulate, f32 VPU elementwise).
    # x arrives pre-cast to bf16 from the wrapper (halves its DMA bytes).
    h = jnp.dot(x_ref[...], w1_ref[...], preferred_element_type=jnp.float32)
    h = jnp.maximum(h + b1_ref[...], 0.0)
    # fc_2 + relu
    h = jnp.dot(h.astype(jnp.bfloat16), w2_ref[...],
                preferred_element_type=jnp.float32)
    h = jnp.maximum(h + b2_ref[...], 0.0)
    # fc_3 + relu
    h = jnp.dot(h.astype(jnp.bfloat16), w3_ref[...],
                preferred_element_type=jnp.float32)
    h = jnp.maximum(h + b3_ref[...], 0.0)
    # fc_4 (no activation); 128-lane output tile -> unmasked lane-dense stores.
    h = jnp.dot(h.astype(jnp.bfloat16), w4_ref[...],
                preferred_element_type=jnp.float32)
    o_ref[...] = (h + b4_ref[...]).astype(o_ref.dtype)


def _pad_params(params):
    """Zero-pad weights/biases to lane-aligned dims; cast weights to bf16.

    Zero padding is exact: padded hidden lanes are 0 after bias+ReLU and the
    corresponding padded weight rows are 0, so they contribute nothing.
    """
    (w1, b1), (w2, b2), (w3, b3), (w4, b4) = params
    hp = HIDDEN_PAD - OUTPUT_HIDDEN_DIM
    op = OUT_PAD - MLP_OUTPUT_DIM

    w1p = jnp.pad(w1, ((0, 0), (0, hp))).astype(jnp.bfloat16)
    b1p = jnp.pad(b1, ((0, 0), (0, hp))).astype(jnp.float32)
    w2p = jnp.pad(w2, ((0, hp), (0, hp))).astype(jnp.bfloat16)
    b2p = jnp.pad(b2, ((0, 0), (0, hp))).astype(jnp.float32)
    w3p = jnp.pad(w3, ((0, hp), (0, hp))).astype(jnp.bfloat16)
    b3p = jnp.pad(b3, ((0, 0), (0, hp))).astype(jnp.float32)
    w4p = jnp.pad(w4, ((0, hp), (0, op))).astype(jnp.bfloat16)
    b4p = jnp.pad(b4, ((0, 0), (0, op))).astype(jnp.float32)
    return (w1p, b1p, w2p, b2p, w3p, b3p, w4p, b4p)


@functools.partial(jax.jit, static_argnames=("batch_tile",))
def mlp_forward(x, params, *, batch_tile=1024):
    """x: [B, MLP_INPUT_DIM] float32 -> [B, MLP_OUTPUT_DIM] float32."""
    B, d_in = x.shape
    assert d_in == MLP_INPUT_DIM

    tile = _choose_batch_tile(B, batch_tile)
    B_pad = _round_up(B, tile)

    # Pre-cast to bf16 (feedback item) and pad the ragged batch (sliced back
    # below; padded rows are exact no-ops for the rows we keep).
    x = x.astype(jnp.bfloat16)
    if B_pad != B:
        x = jnp.pad(x, ((0, B_pad - B), (0, 0)))

    w1, b1, w2, b2, w3, b3, w4, b4 = _pad_params(params)

    grid = (B_pad // tile,)

    flops = 2 * B_pad * (MLP_INPUT_DIM * HIDDEN_PAD
                         + 2 * HIDDEN_PAD * HIDDEN_PAD
                         + HIDDEN_PAD * OUT_PAD)
    bytes_accessed = (
        B_pad * MLP_INPUT_DIM * 2                    # x (bf16)
        + B_pad * OUT_PAD * 2                        # out (bf16, padded lanes)
        + 2 * (MLP_INPUT_DIM * HIDDEN_PAD            # weights (bf16)
               + 2 * HIDDEN_PAD * HIDDEN_PAD
               + HIDDEN_PAD * OUT_PAD)
        + 4 * (3 * HIDDEN_PAD + OUT_PAD)             # biases (f32)
    )

    out_padded = pl.pallas_call(
        _mlp_kernel,
        out_shape=jax.ShapeDtypeStruct((B_pad, OUT_PAD), jnp.bfloat16),
        grid_spec=pltpu.PrefetchScalarGridSpec(
            num_scalar_prefetch=0,
            grid=grid,
            in_specs=[
                pl.BlockSpec((tile, d_in), lambda i: (i, 0)),      # x tile
                pl.BlockSpec((d_in, HIDDEN_PAD), _rep),            # w1
                pl.BlockSpec((1, HIDDEN_PAD), _rep),               # b1
                pl.BlockSpec((HIDDEN_PAD, HIDDEN_PAD), _rep),      # w2
                pl.BlockSpec((1, HIDDEN_PAD), _rep),               # b2
                pl.BlockSpec((HIDDEN_PAD, HIDDEN_PAD), _rep),      # w3
                pl.BlockSpec((1, HIDDEN_PAD), _rep),               # b3
                pl.BlockSpec((HIDDEN_PAD, OUT_PAD), _rep),         # w4
                pl.BlockSpec((1, OUT_PAD), _rep),                  # b4
            ],
            out_specs=pl.BlockSpec((tile, OUT_PAD), lambda i: (i, 0)),
        ),
        compiler_params=pltpu.CompilerParams(
            dimension_semantics=("parallel",),          # shards steps across v7x TCs
            vmem_limit_bytes=48 * 1024 * 1024,          # raise v5e's 16 MiB default
        ),
        cost_estimate=pl.CostEstimate(
            flops=flops, transcendentals=0, bytes_accessed=bytes_accessed),
    )(x, w1, b1, w2, b2, w3, b3, w4, b4)

    # Slice real rows/columns back out; cast the bf16 store back to f32.
    return out_padded[:B, :MLP_OUTPUT_DIM].astype(jnp.float32)


def init_params(key):
    """Deterministic init mirroring nn.Linear's default U(-1/sqrt(fan_in), 1/sqrt(fan_in)).

    Weights are stored as [in, out] (transposed relative to PyTorch)."""
    dims = [
        (MLP_INPUT_DIM, OUTPUT_HIDDEN_DIM),
        (OUTPUT_HIDDEN_DIM, OUTPUT_HIDDEN_DIM),
        (OUTPUT_HIDDEN_DIM, OUTPUT_HIDDEN_DIM),
        (OUTPUT_HIDDEN_DIM, MLP_OUTPUT_DIM),
    ]
    params = []
    for (fan_in, fan_out) in dims:
        key, kw, kb = jax.random.split(key, 3)
        bound = 1.0 / jnp.sqrt(jnp.float32(fan_in))
        w = jax.random.uniform(kw, (fan_in, fan_out), jnp.float32, -bound, bound)
        b = jax.random.uniform(kb, (1, fan_out), jnp.float32, -bound, bound)
        params.append((w, b))
    return params


def reference_mlp_f32(x, params):
    (w1, b1), (w2, b2), (w3, b3), (w4, b4) = params
    h = jnp.maximum(x @ w1 + b1, 0.0)
    h = jnp.maximum(h @ w2 + b2, 0.0)
    h = jnp.maximum(h @ w3 + b3, 0.0)
    return h @ w4 + b4


def reference_mlp_bf16(x, params):
    """Matched-precision reference: bf16 matmul operands, f32 accumulate,
    final bf16 store (mirrors the kernel's output dtype)."""
    def dot_bf16(a, w):
        return jnp.dot(a.astype(jnp.bfloat16), w.astype(jnp.bfloat16),
                       preferred_element_type=jnp.float32)
    (w1, b1), (w2, b2), (w3, b3), (w4, b4) = params
    h = jnp.maximum(dot_bf16(x, w1) + b1, 0.0)
    h = jnp.maximum(dot_bf16(h, w2) + b2, 0.0)
    h = jnp.maximum(dot_bf16(h, w3) + b3, 0.0)
    out = dot_bf16(h, w4) + b4
    return out.astype(jnp.bfloat16).astype(jnp.float32)


if __name__ == "__main__":
    key = jax.random.PRNGKey(0)
    key, kx = jax.random.split(key)

    # Ragged batch (not a multiple of the tile) exercises the pad/slice path;
    # it pads to 512 rows -> tile 256, 2 grid steps, so both v7x TCs get work.
    batch = 300
    x = jax.random.normal(kx, (batch, MLP_INPUT_DIM), jnp.float32)
    params = init_params(key)

    out = mlp_forward(x, params)
    out = jax.block_until_ready(out)

    assert out.shape == (batch, MLP_OUTPUT_DIM), out.shape

    # Matched-precision check (same bf16-operand / f32-accumulate / bf16-store math).
    ref_bf16 = reference_mlp_bf16(x, params)
    assert jnp.allclose(out, ref_bf16, atol=1e-2, rtol=1e-2), \
        "mismatch vs matched-precision (bf16 matmul) reference"

    # Loose sanity check vs full-f32 reference (bf16 operand/output rounding only;
    # tolerance is intentionally loose and documents expected bf16 rounding, not a bug).
    ref_f32 = reference_mlp_f32(x, params)
    assert jnp.allclose(out, ref_f32, atol=1e-1, rtol=1e-1), \
        "mismatch vs f32 reference beyond bf16 rounding tolerance"

    print("KERNEL_OK")
</pallas_src>

<mosaic_0001>
module attributes {stable_mosaic.version = 11 : i64} {
  func.func @_mlp_kernel(%arg0: i32, %arg1: memref<256x19xbf16, #tpu.memory_space<vmem>>, %arg2: memref<19x512xbf16, #tpu.memory_space<vmem>>, %arg3: memref<1x512xf32, #tpu.memory_space<vmem>>, %arg4: memref<512x512xbf16, #tpu.memory_space<vmem>>, %arg5: memref<1x512xf32, #tpu.memory_space<vmem>>, %arg6: memref<512x512xbf16, #tpu.memory_space<vmem>>, %arg7: memref<1x512xf32, #tpu.memory_space<vmem>>, %arg8: memref<512x128xbf16, #tpu.memory_space<vmem>>, %arg9: memref<1x128xf32, #tpu.memory_space<vmem>>, %arg10: memref<256x128xbf16, #tpu.memory_space<vmem>>) attributes {dimension_semantics = [#tpu.dimension_semantics<parallel>], iteration_bounds = array<i64: 2>, scalar_prefetch = 0 : i64, scratch_operands = 0 : i64, tpu.core_type = #tpu.core_type<tc>, window_params = [{transform_indices = @transform_0, window_bounds = array<i64: 256, 19>}, {pipeline_mode = #tpu.pipeline_mode<synchronous>, transform_indices = @transform_1, window_bounds = array<i64: 19, 512>}, {pipeline_mode = #tpu.pipeline_mode<synchronous>, transform_indices = @transform_2, window_bounds = array<i64: 1, 512>}, {pipeline_mode = #tpu.pipeline_mode<synchronous>, transform_indices = @transform_3, window_bounds = array<i64: 512, 512>}, {pipeline_mode = #tpu.pipeline_mode<synchronous>, transform_indices = @transform_4, window_bounds = array<i64: 1, 512>}, {pipeline_mode = #tpu.pipeline_mode<synchronous>, transform_indices = @transform_5, window_bounds = array<i64: 512, 512>}, {pipeline_mode = #tpu.pipeline_mode<synchronous>, transform_indices = @transform_6, window_bounds = array<i64: 1, 512>}, {pipeline_mode = #tpu.pipeline_mode<synchronous>, transform_indices = @transform_7, window_bounds = array<i64: 512, 128>}, {pipeline_mode = #tpu.pipeline_mode<synchronous>, transform_indices = @transform_8, window_bounds = array<i64: 1, 128>}, {transform_indices = @transform_9, window_bounds = array<i64: 256, 128>}]} {
    %c0 = arith.constant 0 : index
    %c0_0 = arith.constant 0 : index
    %0 = vector.load %arg1[%c0, %c0_0] : memref<256x19xbf16, #tpu.memory_space<vmem>>, vector<256x19xbf16>
    %c0_1 = arith.constant 0 : index
    %c0_2 = arith.constant 0 : index
    %1 = vector.load %arg2[%c0_1, %c0_2] : memref<19x512xbf16, #tpu.memory_space<vmem>>, vector<19x512xbf16>
    %cst = arith.constant dense<0.000000e+00> : vector<256x512xf32>
    %2 = tpu.matmul %0, %1, %cst {dimension_numbers = #tpu.dot_dimension_numbers<[1], [0], [0], [1], [0, 0, 1, 1], [], []>} : vector<256x19xbf16>, vector<19x512xbf16>, vector<256x512xf32> -> vector<256x512xf32>
    %c0_3 = arith.constant 0 : index
    %c0_4 = arith.constant 0 : index
    %3 = vector.load %arg3[%c0_3, %c0_4] : memref<1x512xf32, #tpu.memory_space<vmem>>, vector<1x512xf32>
    %4 = vector.broadcast %3 : vector<1x512xf32> to vector<256x512xf32>
    %5 = arith.addf %2, %4 : vector<256x512xf32>
    %cst_5 = arith.constant 0.000000e+00 : f32
    %6 = vector.broadcast %cst_5 : f32 to vector<256x512xf32>
    %7 = arith.maximumf %5, %6 : vector<256x512xf32>
    %8 = arith.truncf %7 : vector<256x512xf32> to vector<256x512xbf16>
    %c0_6 = arith.constant 0 : index
    %c0_7 = arith.constant 0 : index
    %9 = vector.load %arg4[%c0_6, %c0_7] : memref<512x512xbf16, #tpu.memory_space<vmem>>, vector<512x512xbf16>
    %cst_8 = arith.constant dense<0.000000e+00> : vector<256x512xf32>
    %10 = tpu.matmul %8, %9, %cst_8 {dimension_numbers = #tpu.dot_dimension_numbers<[1], [0], [0], [1], [0, 0, 1, 1], [], []>} : vector<256x512xbf16>, vector<512x512xbf16>, vector<256x512xf32> -> vector<256x512xf32>
    %c0_9 = arith.constant 0 : index
    %c0_10 = arith.constant 0 : index
    %11 = vector.load %arg5[%c0_9, %c0_10] : memref<1x512xf32, #tpu.memory_space<vmem>>, vector<1x512xf32>
    %12 = vector.broadcast %11 : vector<1x512xf32> to vector<256x512xf32>
    %13 = arith.addf %10, %12 : vector<256x512xf32>
    %cst_11 = arith.constant 0.000000e+00 : f32
    %14 = vector.broadcast %cst_11 : f32 to vector<256x512xf32>
    %15 = arith.maximumf %13, %14 : vector<256x512xf32>
    %16 = arith.truncf %15 : vector<256x512xf32> to vector<256x512xbf16>
    %c0_12 = arith.constant 0 : index
    %c0_13 = arith.constant 0 : index
    %17 = vector.load %arg6[%c0_12, %c0_13] : memref<512x512xbf16, #tpu.memory_space<vmem>>, vector<512x512xbf16>
    %cst_14 = arith.constant dense<0.000000e+00> : vector<256x512xf32>
    %18 = tpu.matmul %16, %17, %cst_14 {dimension_numbers = #tpu.dot_dimension_numbers<[1], [0], [0], [1], [0, 0, 1, 1], [], []>} : vector<256x512xbf16>, vector<512x512xbf16>, vector<256x512xf32> -> vector<256x512xf32>
    %c0_15 = arith.constant 0 : index
    %c0_16 = arith.constant 0 : index
    %19 = vector.load %arg7[%c0_15, %c0_16] : memref<1x512xf32, #tpu.memory_space<vmem>>, vector<1x512xf32>
    %20 = vector.broadcast %19 : vector<1x512xf32> to vector<256x512xf32>
    %21 = arith.addf %18, %20 : vector<256x512xf32>
    %cst_17 = arith.constant 0.000000e+00 : f32
    %22 = vector.broadcast %cst_17 : f32 to vector<256x512xf32>
    %23 = arith.maximumf %21, %22 : vector<256x512xf32>
    %24 = arith.truncf %23 : vector<256x512xf32> to vector<256x512xbf16>
    %c0_18 = arith.constant 0 : index
    %c0_19 = arith.constant 0 : index
    %25 = vector.load %arg8[%c0_18, %c0_19] : memref<512x128xbf16, #tpu.memory_space<vmem>>, vector<512x128xbf16>
    %cst_20 = arith.constant dense<0.000000e+00> : vector<256x128xf32>
    %26 = tpu.matmul %24, %25, %cst_20 {dimension_numbers = #tpu.dot_dimension_numbers<[1], [0], [0], [1], [0, 0, 1, 1], [], []>} : vector<256x512xbf16>, vector<512x128xbf16>, vector<256x128xf32> -> vector<256x128xf32>
    %c0_21 = arith.constant 0 : index
    %c0_22 = arith.constant 0 : index
    %27 = vector.load %arg9[%c0_21, %c0_22] : memref<1x128xf32, #tpu.memory_space<vmem>>, vector<1x128xf32>
    %28 = vector.broadcast %27 : vector<1x128xf32> to vector<256x128xf32>
    %29 = arith.addf %26, %28 : vector<256x128xf32>
    %30 = arith.truncf %29 : vector<256x128xf32> to vector<256x128xbf16>
    %c0_23 = arith.constant 0 : index
    %c0_24 = arith.constant 0 : index
    %31 = vector.load %arg10[%c0_23, %c0_24] : memref<256x128xbf16, #tpu.memory_space<vmem>>, vector<256x128xbf16>
    tpu.vector_store %arg10[%c0_23, %c0_24], %30 {strides = array<i32>} : memref<256x128xbf16, #tpu.memory_space<vmem>>, vector<256x128xbf16>,
    return
  }
  func.func @transform_0(%arg0: i32) -> (i32, i32) {
    %c0_i32 = arith.constant 0 : i32
    %c0_i32_0 = arith.constant 0 : i32
    return %arg0, %c0_i32 : i32, i32
  }
  func.func @transform_1(%arg0: i32) -> (i32, i32) {
    %c0_i32 = arith.constant 0 : i32
    %c0_i32_0 = arith.constant 0 : i32
    %c0_i32_1 = arith.constant 0 : i32
    return %c0_i32, %c0_i32_0 : i32, i32
  }
  func.func @transform_2(%arg0: i32) -> (i32, i32) {
    %c0_i32 = arith.constant 0 : i32
    %c0_i32_0 = arith.constant 0 : i32
    %c0_i32_1 = arith.constant 0 : i32
    return %c0_i32, %c0_i32_0 : i32, i32
  }
  func.func @transform_3(%arg0: i32) -> (i32, i32) {
    %c0_i32 = arith.constant 0 : i32
    %c0_i32_0 = arith.constant 0 : i32
    %c0_i32_1 = arith.constant 0 : i32
    return %c0_i32, %c0_i32_0 : i32, i32
  }
  func.func @transform_4(%arg0: i32) -> (i32, i32) {
    %c0_i32 = arith.constant 0 : i32
    %c0_i32_0 = arith.constant 0 : i32
    %c0_i32_1 = arith.constant 0 : i32
    return %c0_i32, %c0_i32_0 : i32, i32
  }
  func.func @transform_5(%arg0: i32) -> (i32, i32) {
    %c0_i32 = arith.constant 0 : i32
    %c0_i32_0 = arith.constant 0 : i32
    %c0_i32_1 = arith.constant 0 : i32
    return %c0_i32, %c0_i32_0 : i32, i32
  }
  func.func @transform_6(%arg0: i32) -> (i32, i32) {
    %c0_i32 = arith.constant 0 : i32
    %c0_i32_0 = arith.constant 0 : i32
    %c0_i32_1 = arith.constant 0 : i32
    return %c0_i32, %c0_i32_0 : i32, i32
  }
  func.func @transform_7(%arg0: i32) -> (i32, i32) {
    %c0_i32 = arith.constant 0 : i32
    %c0_i32_0 = arith.constant 0 : i32
    %c0_i32_1 = arith.constant 0 : i32
    return %c0_i32, %c0_i32_0 : i32, i32
  }
  func.func @transform_8(%arg0: i32) -> (i32, i32) {
    %c0_i32 = arith.constant 0 : i32
    %c0_i32_0 = arith.constant 0 : i32
    %c0_i32_1 = arith.constant 0 : i32
    return %c0_i32, %c0_i32_0 : i32, i32
  }
  func.func @transform_9(%arg0: i32) -> (i32, i32) {
    %c0_i32 = arith.constant 0 : i32
    %c0_i32_0 = arith.constant 0 : i32
    return %arg0, %c0_i32 : i32, i32
  }
}

</mosaic_0001>

<bundles_post_ra>
// kernel: mlp_forward.1
= control target key start
LH: loop header
LB: loop body
LE: loop exit
PB: predicated region body
PF: predicated region fallthrough
CT: control target
= control target key end

     0   :  { %s6710_s30 = smov 0   ;;  %s9632_s0 = inlined_call_operand.vmem [shape: bf16[512,19], index: 0, kind: input, shape index: {}]   ;;  %s9633_s1 = inlined_call_operand.vmem [shape: bf16[19,512], index: 1, kind: input, shape index: {}]   ;;  %s9634_s2 = inlined_call_operand.vmem [shape: f32[1,512], index: 2, kind: input, shape index: {}]   ;;  %s9635_s3 = inlined_call_operand.vmem [shape: bf16[512,512], index: 3, kind: input, shape index: {}]   ;;  %s9636_s4 = inlined_call_operand.vmem [shape: f32[1,512], index: 4, kind: input, shape index: {}]   ;;  %s9637_s5 = inlined_call_operand.vmem [shape: bf16[512,512], index: 5, kind: input, shape index: {}]   ;;  %s9638_s6 = inlined_call_operand.vmem [shape: f32[1,512], index: 6, kind: input, shape index: {}]   ;;  %s9639_s7 = inlined_call_operand.vmem [shape: bf16[512,128], index: 7, kind: input, shape index: {}]   ;;  %s9640_s8 = inlined_call_operand.vmem [shape: f32[1,128], index: 8, kind: input, shape index: {}]   ;;  %s9641_s9 = inlined_call_operand.vmem [shape: bf16[512,128], index: 9, kind: output, shape index: {}]  }
   0x1 LB: > { %s5459_s10 = sadd.s32 4294967295, %s6656_s30   ;;  %p5463_p0 = scmp.ge.s32.totalorder %s6656_s30, 1  ;;  %s6656_s30 = sphi %s6710_s30, %s19_s30  }
   0x2   : > { %p288_p1 = scmp.lt.s32.totalorder %s6656_s30, 3 }
   0x4   : > { %p289_p2 = pnand %p5463_p0, %p288_p1 }
   0x6   : > { %292 = sbr.rel (%p289_p2) target bundleno = 1226 (0x4ca), region = 56 }
   0xb   : > { %v373_v0 = vld [vmem:[%s9633_s1 + $0x20] sm:$0x33]  ;;  %vm556_vm0 = vcmask 1040384   ;;  %vm557_vm1 = vcmask 1041408   ;;  %v6658_v2 = vmov 65535   ;;  %v6659_v12 = vmov 0  }
   0xc   : > { %v5489_v1 = vcombine.high %v373_v0, %v373_v0  ;;  %v558_v3 = vsel %vm556_vm0, 4294967295, %v6658_v2  ;;  %v374_v4 = vld [vmem:[%s9633_s1 + $0x28] sm:$0x33]  ;;  %v5488_v5 = vcombine.low %v373_v0, %v373_v0  ;;  %v6212_v11 = vld [vmem:[%s9633_s1 + $0x4] ss:$16 sps:$4 sm:$0xff]   ;;  %604 = vmatprep.mubr.bf16.mxu0 %v6659_v12  ;;  %797 = vmatprep.mubr.bf16.mxu1 %v6659_v12  ;;  %s5464_s17 = sshll.u32 %s5459_s10, 5 }
   0xd   : > { %v559_v6 = vsel %vm557_vm1, %v558_v3, 0  ;;  %v5491_v7 = vcombine.high %v374_v4, %v374_v4  ;;  %v5490_v8 = vcombine.low %v374_v4, %v374_v4  ;;  %v6214_v15 = vld [vmem:[%s9633_s1 + $0xc] ss:$16 sps:$4 sm:$0xff]   ;;  %p325_p3 = scmp.lt.s32.totalorder %s5464_s17, 63  ;;  %v6216_v16 = vld [vmem:[%s9633_s1] ss:$16 sps:$4 sm:$0xff]  }
   0xe   : > { %v564_v9 = vand.u32 %v5489_v1, %v559_v6  ;;  %v561_v10 = vand.u32 %v5488_v5, %v559_v6  ;;  %v6217_v17 = vld [vmem:[%s9633_s1 + $0x8] ss:$16 sps:$4 sm:$0xff]   ;;  %v6230_v18 = vld [vmem:[%s9635_s3 + $0xe4] ss:$16 sps:$4 sm:$0xff]   ;;  %v6228_v20 = vld [vmem:[%s9635_s3 + $0xe0] ss:$16 sps:$4 sm:$0xff]  }
   0xf   : > { %v570_v13 = vand.u32 %v5491_v7, %v559_v6  ;;  %v567_v14 = vand.u32 %v5490_v8, %v559_v6  ;;  %s9836_s17 = smov (!%p325_p3, %s5464_s17), 63  ;;  %v6233_v19 = vld [vmem:[%s9635_s3 + $0x2e4] ss:$16 sps:$4 sm:$0xff]   ;;  %vm507_vm2 = vcmask 154624   ;;  %v6231_v22 = vld [vmem:[%s9635_s3 + $0x2e0] ss:$16 sps:$4 sm:$0xff]  }
  0x10   : > { %584 = vmatprep.subr.bf16.mxu0 %v564_v9  ;;  %s5465_s26 = sshll.u32 %s9836_s17, 2  ;;  %v6237_v23 = vld [vmem:[%s9635_s3 + $0xc4] ss:$16 sps:$4 sm:$0xff]   ;;  %v6235_v25 = vld [vmem:[%s9635_s3 + $0xc0] ss:$16 sps:$4 sm:$0xff]  }
  0x11   : > { %777 = vmatprep.subr.bf16.mxu1 %v570_v13  ;;  %585 = vmatpush1.bf16.msra.mxu0 %v561_v10  ;;  %s6752_s11 = scalar_lea.vmem %s9632_s0, %s5465_s26  ;;  %v6240_v24 = vld [vmem:[%s9635_s3 + $0x2c4] ss:$16 sps:$4 sm:$0xff]   ;;  %v6238_v26 = vld [vmem:[%s9635_s3 + $0x2c0] ss:$16 sps:$4 sm:$0xff]   ;;  %s9507_s25 = scalar_lea.vmem %s9641_s9, %s5465_s26 }
  0x12   : > { %778 = vmatpush1.bf16.msra.mxu1 %v567_v14  ;;  %586 = vmatprep.subr.bf16.mxu0 %v6212_v11  ;;  %v6218_v21 = vld [vmem:[%s6752_s11] sm:$0xff]   ;;  %v6219_v27 = vld [vmem:[%s6752_s11 + $0x8] sm:$0xff]   ;;  %v6220_v32 = vld [vmem:[%s6752_s11 + $0x10] sm:$0xff]  }
  0x13   : > { %779 = vmatprep.subr.bf16.mxu1 %v6214_v15  ;;  %v6242_v28 = vld [vmem:[%s9635_s3 + $0xa0] ss:$16 sps:$4 sm:$0xff]   ;;  %v6244_v29 = vld [vmem:[%s9635_s3 + $0xa4] ss:$16 sps:$4 sm:$0xff]   ;;  %v6221_v41 = vld [vmem:[%s6752_s11 + $0x18] sm:$0xff]  }
  0x14   : > { %v6245_v30 = vld [vmem:[%s9635_s3 + $0x2a0] ss:$16 sps:$4 sm:$0xff]   ;;  %v6247_v31 = vld [vmem:[%s9635_s3 + $0x2a4] ss:$16 sps:$4 sm:$0xff]   ;;  %v6223_v57 = vld [vmem:[%s6752_s11 + $0x28] sm:$0xff]  }
  0x15   : > { %587 = vmatpush1.bf16.msra.mxu0 %v6216_v16  ;;  %v6251_v33 = vld [vmem:[%s9635_s3 + $0x84] ss:$16 sps:$4 sm:$0xff]   ;;  %v6249_v34 = vld [vmem:[%s9635_s3 + $0x80] ss:$16 sps:$4 sm:$0xff]   ;;  %v6225_v15 = vld [vmem:[%s6752_s11 + $0x38] sm:$0xff]  }
  0x16   : > { %780 = vmatpush1.bf16.msra.mxu1 %v6217_v17  ;;  %1940 = vmatprep.subr.bf16.mxu0 %v6230_v18  ;;  %v6254_v35 = vld [vmem:[%s9635_s3 + $0x284] ss:$16 sps:$4 sm:$0xff]   ;;  %v6252_v36 = vld [vmem:[%s9635_s3 + $0x280] ss:$16 sps:$4 sm:$0xff]  }
  0x17   : > { %2133 = vmatprep.subr.bf16.mxu1 %v6233_v19  ;;  %v6258_v37 = vld [vmem:[%s9635_s3 + $0x64] ss:$16 sps:$4 sm:$0xff]   ;;  %v6256_v38 = vld [vmem:[%s9635_s3 + $0x60] ss:$16 sps:$4 sm:$0xff]  }
  0x18   : > { %5492 = vmatmul.mubr.msk.bf16.vlgmr.msra.gmra.mxu0 %vm507_vm2, %v6218_v21  ;;  %v6261_v39 = vld [vmem:[%s9635_s3 + $0x264] ss:$16 sps:$4 sm:$0xff]   ;;  %v6259_v40 = vld [vmem:[%s9635_s3 + $0x260] ss:$16 sps:$4 sm:$0xff]  }
  0x19   : > { %5508 = vmatmul.mubr.msk.bf16.vlgmr.msra.gmra.mxu1 %vm507_vm2, %v6218_v21  ;;  %614 = vmatprep.mubr.bf16.mxu0 %v6659_v12  ;;  %v6265_v42 = vld [vmem:[%s9635_s3 + $0x44] ss:$16 sps:$4 sm:$0xff]   ;;  %v6263_v44 = vld [vmem:[%s9635_s3 + $0x40] ss:$16 sps:$4 sm:$0xff]  }
  0x1a   : > { %807 = vmatprep.mubr.bf16.mxu1 %v6659_v12  ;;  %1941 = vmatpush1.bf16.msra.mxu0 %v6228_v20  ;;  %v6268_v43 = vld [vmem:[%s9635_s3 + $0x244] ss:$16 sps:$4 sm:$0xff]   ;;  %v6266_v45 = vld [vmem:[%s9635_s3 + $0x240] ss:$16 sps:$4 sm:$0xff]  }
  0x1b   : > { %2134 = vmatpush1.bf16.msra.mxu1 %v6231_v22  ;;  %1942 = vmatprep.subr.bf16.mxu0 %v6237_v23  ;;  %v6272_v46 = vld [vmem:[%s9635_s3 + $0x24] ss:$16 sps:$4 sm:$0xff]   ;;  %v6270_v49 = vld [vmem:[%s9635_s3 + $0x20] ss:$16 sps:$4 sm:$0xff]  }
  0x1c   : > { %2135 = vmatprep.subr.bf16.mxu1 %v6240_v24  ;;  %v6275_v47 = vld [vmem:[%s9635_s3 + $0x224] ss:$16 sps:$4 sm:$0xff]   ;;  %v6273_v50 = vld [vmem:[%s9635_s3 + $0x220] ss:$16 sps:$4 sm:$0xff]   ;;  %v6227_v24 = vld [vmem:[%s6752_s11 + $0x48] sm:$0xff]  }
  0x1d   : > { %v6222_v48 = vld [vmem:[%s6752_s11 + $0x20] sm:$0xff]   ;;  %v6224_v2 = vld [vmem:[%s6752_s11 + $0x30] sm:$0xff]  }
  0x1e   : > { %1943 = vmatpush1.bf16.msra.mxu0 %v6235_v25  ;;  %v6278_v51 = vld [vmem:[%s9635_s3 + $0x4] ss:$16 sps:$4 sm:$0xff]   ;;  %v6276_v53 = vld [vmem:[%s9635_s3] ss:$16 sps:$4 sm:$0xff]  }
  0x1f   : > { %2136 = vmatpush1.bf16.msra.mxu1 %v6238_v26  ;;  %1944 = vmatprep.subr.bf16.mxu0 %v6244_v29  ;;  %v6281_v52 = vld [vmem:[%s9635_s3 + $0x204] ss:$16 sps:$4 sm:$0xff]   ;;  %v6279_v54 = vld [vmem:[%s9635_s3 + $0x200] ss:$16 sps:$4 sm:$0xff]  }
  0x20   : > { %5493 = vmatmul.mubr.msk.bf16.gmra.mxu0 %vm507_vm2, %v6219_v27  ;;  %2137 = vmatprep.subr.bf16.mxu1 %v6247_v31  ;;  %v6284_v55 = vld [vmem:[%s9635_s3 + $0x1e4] ss:$16 sps:$4 sm:$0xff]   ;;  %v6282_v58 = vld [vmem:[%s9635_s3 + $0x1e0] ss:$16 sps:$4 sm:$0xff]   ;;  %v6332_v31 = vld [vmem:[%s9635_s3 + $0xec] ss:$16 sps:$4 sm:$0xff]  }
  0x21   : > { %5509 = vmatmul.mubr.msk.bf16.gmra.mxu1 %vm507_vm2, %v6219_v27  ;;  %624 = vmatprep.mubr.bf16.mxu0 %v6659_v12  ;;  %v6287_v56 = vld [vmem:[%s9635_s3 + $0x3e4] ss:$16 sps:$4 sm:$0xff]   ;;  %v6285_v59 = vld [vmem:[%s9635_s3 + $0x3e0] ss:$16 sps:$4 sm:$0xff]  }
  0x22   : > { %817 = vmatprep.mubr.bf16.mxu1 %v6659_v12  ;;  %1945 = vmatpush1.bf16.msra.mxu0 %v6242_v28  ;;  %v6290_v60 = vld [vmem:[%s9635_s3 + $0x1c4] ss:$16 sps:$4 sm:$0xff]   ;;  %v6288_v62 = vld [vmem:[%s9635_s3 + $0x1c0] ss:$16 sps:$4 sm:$0xff]  }
  0x23   : > { %2138 = vmatpush1.bf16.msra.mxu1 %v6245_v30  ;;  %1946 = vmatprep.subr.bf16.mxu0 %v6251_v33  ;;  %v6293_v61 = vld [vmem:[%s9635_s3 + $0x3c4] ss:$16 sps:$4 sm:$0xff]   ;;  %v6291_v63 = vld [vmem:[%s9635_s3 + $0x3c0] ss:$16 sps:$4 sm:$0xff]   ;;  %v6241_v30 = vld [vmem:[%s6752_s11 + $0x58] sm:$0xff]  }
  0x24   : > { %2139 = vmatprep.subr.bf16.mxu1 %v6254_v35  ;;  %v6296_v0 = vld [vmem:[%s9635_s3 + $0x1a4] ss:$16 sps:$4 sm:$0xff]   ;;  %v6294_v3 = vld [vmem:[%s9635_s3 + $0x1a0] ss:$16 sps:$4 sm:$0xff]  }
  0x25   : > { %v6299_v1 = vld [vmem:[%s9635_s3 + $0x3a4] ss:$16 sps:$4 sm:$0xff]   ;;  %v6297_v4 = vld [vmem:[%s9635_s3 + $0x3a0] ss:$16 sps:$4 sm:$0xff]  }
  0x26   : > { %1947 = vmatpush1.bf16.msra.mxu0 %v6249_v34  ;;  %v6302_v5 = vld [vmem:[%s9635_s3 + $0x184] ss:$16 sps:$4 sm:$0xff]   ;;  %v6300_v7 = vld [vmem:[%s9635_s3 + $0x180] ss:$16 sps:$4 sm:$0xff]   ;;  %v6255_v34 = vld [vmem:[%s6752_s11 + $0x68] sm:$0xff]  }
  0x27   : > { %2140 = vmatpush1.bf16.msra.mxu1 %v6252_v36  ;;  %1948 = vmatprep.subr.bf16.mxu0 %v6258_v37  ;;  %v6305_v6 = vld [vmem:[%s9635_s3 + $0x384] ss:$16 sps:$4 sm:$0xff]   ;;  %v6303_v8 = vld [vmem:[%s9635_s3 + $0x380] ss:$16 sps:$4 sm:$0xff]   ;;  %v6269_v36 = vld [vmem:[%s6752_s11 + $0x78] sm:$0xff]   ;;  %v377_v37 = vlaneseq }
  0x28   : > { %5494 = vmatmul.mubr.msk.bf16.gmra.mxu0 %vm507_vm2, %v6220_v32  ;;  %2141 = vmatprep.subr.bf16.mxu1 %v6261_v39  ;;  %v6308_v9 = vld [vmem:[%s9635_s3 + $0x164] ss:$16 sps:$4 sm:$0xff]   ;;  %v6306_v11 = vld [vmem:[%s9635_s3 + $0x160] ss:$16 sps:$4 sm:$0xff]  }
  0x29   : > { %5510 = vmatmul.mubr.msk.bf16.gmra.mxu1 %vm507_vm2, %v6220_v32  ;;  %634 = vmatprep.mubr.bf16.mxu0 %v6659_v12  ;;  %v6311_v10 = vld [vmem:[%s9635_s3 + $0x364] ss:$16 sps:$4 sm:$0xff]   ;;  %v6309_v13 = vld [vmem:[%s9635_s3 + $0x360] ss:$16 sps:$4 sm:$0xff]   ;;  %v6335_v32 = vld [vmem:[%s9635_s3 + $0x2ec] ss:$16 sps:$4 sm:$0xff]  }
  0x2a   : > { %827 = vmatprep.mubr.bf16.mxu1 %v6659_v12  ;;  %1949 = vmatpush1.bf16.msra.mxu0 %v6256_v38  ;;  %v6314_v14 = vld [vmem:[%s9635_s3 + $0x144] ss:$16 sps:$4 sm:$0xff]   ;;  %v6312_v17 = vld [vmem:[%s9635_s3 + $0x140] ss:$16 sps:$4 sm:$0xff]   ;;  %v378_v38 = vshrl.u32 %v377_v37, 7 }
  0x2b   : > { %2142 = vmatpush1.bf16.msra.mxu1 %v6259_v40  ;;  %1950 = vmatprep.subr.bf16.mxu0 %v6265_v42  ;;  %v6317_v16 = vld [vmem:[%s9635_s3 + $0x344] ss:$16 sps:$4 sm:$0xff]   ;;  %v6315_v18 = vld [vmem:[%s9635_s3 + $0x340] ss:$16 sps:$4 sm:$0xff]  }
  0x2c   : > { %2143 = vmatprep.subr.bf16.mxu1 %v6268_v43  ;;  %v6320_v19 = vld [vmem:[%s9635_s3 + $0x124] ss:$16 sps:$4 sm:$0xff]   ;;  %v6318_v21 = vld [vmem:[%s9635_s3 + $0x120] ss:$16 sps:$4 sm:$0xff]   ;;  %v7024_v39 = vsub.s32 1, %v378_v38  ;;  %v7026_v40 = vsub.s32 0, %v378_v38 }
  0x2d   : > { %v6323_v20 = vld [vmem:[%s9635_s3 + $0x324] ss:$16 sps:$4 sm:$0xff]   ;;  %v6321_v22 = vld [vmem:[%s9635_s3 + $0x320] ss:$16 sps:$4 sm:$0xff]   ;;  %v7033_v43 = vsub.s32 2, %v378_v38 }
  0x2e   : > { %1951 = vmatpush1.bf16.msra.mxu0 %v6263_v44  ;;  %v6226_v23 = vld [vmem:[%s6752_s11 + $0x40] sm:$0xff]   ;;  %v6234_v27 = vld [vmem:[%s6752_s11 + $0x50] sm:$0xff]   ;;  %9695 = vst [vmem:[#allocation2_spill] sm:$0xff] %v7024_v39  ;;  %9696 = vst [vmem:[#allocation3_spill] sm:$0xff] %v7026_v40 }
  0x2f   : > { %2144 = vmatpush1.bf16.msra.mxu1 %v6266_v45  ;;  %1952 = vmatprep.subr.bf16.mxu0 %v6272_v46  ;;  %v6326_v25 = vld [vmem:[%s9635_s3 + $0x104] ss:$16 sps:$4 sm:$0xff]   ;;  %v6324_v28 = vld [vmem:[%s9635_s3 + $0x100] ss:$16 sps:$4 sm:$0xff]   ;;  %9698 = vst [vmem:[#allocation5_spill] sm:$0xff] %v7033_v43 }
  0x30   : > { %5495 = vmatmul.mubr.msk.bf16.gmra.mxu0 %vm507_vm2, %v6221_v41  ;;  %2145 = vmatprep.subr.bf16.mxu1 %v6275_v47  ;;  %v6329_v26 = vld [vmem:[%s9635_s3 + $0x304] ss:$16 sps:$4 sm:$0xff]   ;;  %v6327_v29 = vld [vmem:[%s9635_s3 + $0x300] ss:$16 sps:$4 sm:$0xff]  }
  0x31   : > { %5511 = vmatmul.mubr.msk.bf16.gmra.mxu1 %vm507_vm2, %v6221_v41  ;;  %644 = vmatprep.mubr.bf16.mxu0 %v6659_v12  ;;  %v6248_v33 = vld [vmem:[%s6752_s11 + $0x60] sm:$0xff]   ;;  %v6262_v35 = vld [vmem:[%s6752_s11 + $0x70] sm:$0xff]   ;;  %v7028_v41 = vsub.s32 3, %v378_v38 }
  0x32   : > { %837 = vmatprep.mubr.bf16.mxu1 %v6659_v12  ;;  %1953 = vmatpush1.bf16.msra.mxu0 %v6270_v49  ;;  %v375_v42 = vld [vmem:[%s9634_s2] sm:$0xf] }
  0x33   : > { %2146 = vmatpush1.bf16.msra.mxu1 %v6273_v50  ;;  %1954 = vmatprep.subr.bf16.mxu0 %v6278_v51  ;;  %9697 = vst [vmem:[#allocation4_spill] sm:$0xff] %v7028_v41  ;;  %v7036_v45 = vrot.slane %v375_v42, %v7024_v39  ;;  %v7039_v46 = vrot.slane %v375_v42, %v7026_v40 }
  0x34   : > { %2147 = vmatprep.subr.bf16.mxu1 %v6281_v52  ;;  %v7045_v49 = vrot.slane %v375_v42, %v7033_v43 }
  0x36   : > { %1955 = vmatpush1.bf16.msra.mxu0 %v6276_v53 }
  0x37   : > { %2148 = vmatpush1.bf16.msra.mxu1 %v6279_v54  ;;  %1956 = vmatprep.subr.bf16.mxu0 %v6284_v55 }
  0x38   : > { %5496 = vmatmul.mubr.msk.bf16.gmra.mxu0 %vm507_vm2, %v6222_v48  ;;  %2149 = vmatprep.subr.bf16.mxu1 %v6287_v56 }
  0x39   : > { %5512 = vmatmul.mubr.msk.bf16.gmra.mxu1 %vm507_vm2, %v6222_v48  ;;  %654 = vmatprep.mubr.bf16.mxu0 %v6659_v12  ;;  %v7042_v48 = vrot.slane %v375_v42, %v7028_v41 }
  0x3a   : > { %847 = vmatprep.mubr.bf16.mxu1 %v6659_v12  ;;  %1957 = vmatpush2.bf16.msra.mxu0 %v6282_v58 }
  0x3b   : > { %2150 = vmatpush2.bf16.msra.mxu1 %v6285_v59  ;;  %1958 = vmatprep.subr.bf16.mxu0 %v6290_v60 }
  0x3c   : > { %2151 = vmatprep.subr.bf16.mxu1 %v6293_v61 }
  0x3e   : > { %1959 = vmatpush2.bf16.msra.mxu0 %v6288_v62 }
  0x3f   : > { %2152 = vmatpush2.bf16.msra.mxu1 %v6291_v63  ;;  %1960 = vmatprep.subr.bf16.mxu0 %v6296_v0 }
  0x40   : > { %5497 = vmatmul.mubr.msk.bf16.gmra.mxu0 %vm507_vm2, %v6223_v57  ;;  %2153 = vmatprep.subr.bf16.mxu1 %v6299_v1 }
  0x41   : > { %5513 = vmatmul.mubr.msk.bf16.gmra.mxu1 %vm507_vm2, %v6223_v57  ;;  %664 = vmatprep.mubr.bf16.mxu0 %v6659_v12 }
  0x42   : > { %857 = vmatprep.mubr.bf16.mxu1 %v6659_v12  ;;  %1961 = vmatpush2.bf16.msra.mxu0 %v6294_v3 }
  0x43   : > { %2154 = vmatpush2.bf16.msra.mxu1 %v6297_v4  ;;  %1962 = vmatprep.subr.bf16.mxu0 %v6302_v5 }
  0x44   : > { %2155 = vmatprep.subr.bf16.mxu1 %v6305_v6 }
  0x46   : > { %1963 = vmatpush2.bf16.msra.mxu0 %v6300_v7 }
  0x47   : > { %2156 = vmatpush2.bf16.msra.mxu1 %v6303_v8  ;;  %1964 = vmatprep.subr.bf16.mxu0 %v6308_v9 }
  0x48   : > { %5498 = vmatmul.mubr.msk.bf16.gmra.mxu0 %vm507_vm2, %v6224_v2  ;;  %2157 = vmatprep.subr.bf16.mxu1 %v6311_v10 }
  0x49   : > { %5514 = vmatmul.mubr.msk.bf16.gmra.mxu1 %vm507_vm2, %v6224_v2  ;;  %674 = vmatprep.mubr.bf16.mxu0 %v6659_v12 }
  0x4a   : > { %867 = vmatprep.mubr.bf16.mxu1 %v6659_v12  ;;  %1965 = vmatpush2.bf16.msra.mxu0 %v6306_v11 }
  0x4b   : > { %2158 = vmatpush2.bf16.msra.mxu1 %v6309_v13  ;;  %1966 = vmatprep.subr.bf16.mxu0 %v6314_v14  ;;  %v6330_v13 = vld [vmem:[%s9635_s3 + $0xe8] ss:$16 sps:$4 sm:$0xff]  }
  0x4c   : > { %2159 = vmatprep.subr.bf16.mxu1 %v6317_v16 }
  0x4e   : > { %1967 = vmatpush2.bf16.msra.mxu0 %v6312_v17  ;;  %v6333_v17 = vld [vmem:[%s9635_s3 + $0x2e8] ss:$16 sps:$4 sm:$0xff]  }
  0x4f   : > { %2160 = vmatpush2.bf16.msra.mxu1 %v6315_v18  ;;  %1968 = vmatprep.subr.bf16.mxu0 %v6320_v19  ;;  %v6338_v18 = vld [vmem:[%s9635_s3 + $0xcc] ss:$16 sps:$4 sm:$0xff]  }
  0x50   : > { %5499 = vmatmul.mubr.msk.bf16.gmra.mxu0 %vm507_vm2, %v6225_v15  ;;  %2161 = vmatprep.subr.bf16.mxu1 %v6323_v20 }
  0x51   : > { %5515 = vmatmul.mubr.msk.bf16.gmra.mxu1 %vm507_vm2, %v6225_v15  ;;  %684 = vmatprep.mubr.bf16.mxu0 %v6659_v12 }
  0x52   : > { %877 = vmatprep.mubr.bf16.mxu1 %v6659_v12  ;;  %1969 = vmatpush2.bf16.msra.mxu0 %v6318_v21 }
  0x53   : > { %2162 = vmatpush2.bf16.msra.mxu1 %v6321_v22  ;;  %1970 = vmatprep.subr.bf16.mxu0 %v6326_v25 }
  0x54   : > { %2163 = vmatprep.subr.bf16.mxu1 %v6329_v26 }
  0x56   : > { %1971 = vmatpush2.bf16.msra.mxu0 %v6324_v28 }
  0x57   : > { %2164 = vmatpush2.bf16.msra.mxu1 %v6327_v29  ;;  %2326 = vmatprep.subr.bf16.mxu0 %v6332_v31  ;;  %v6336_v31 = vld [vmem:[%s9635_s3 + $0xc8] ss:$16 sps:$4 sm:$0xff]  }
  0x58   : > { %5500 = vmatmul.mubr.msk.bf16.gmra.mxu0 %vm507_vm2, %v6226_v23  ;;  %2519 = vmatprep.subr.bf16.mxu1 %v6335_v32 }
  0x59   : > { %5516 = vmatmul.mubr.msk.bf16.gmra.mxu1 %vm507_vm2, %v6226_v23  ;;  %694 = vmatprep.mubr.bf16.mxu0 %v6659_v12  ;;  %v6341_v23 = vld [vmem:[%s9635_s3 + $0x2cc] ss:$16 sps:$4 sm:$0xff]  }
  0x5a   : > { %887 = vmatprep.mubr.bf16.mxu1 %v6659_v12 }
  0x60   : > { %5501 = vmatmul.mubr.msk.bf16.gmra.mxu0 %vm507_vm2, %v6227_v24 }
  0x61   : > { %5517 = vmatmul.mubr.msk.bf16.gmra.mxu1 %vm507_vm2, %v6227_v24  ;;  %704 = vmatprep.mubr.bf16.mxu0 %v6659_v12 }
  0x62   : > { %897 = vmatprep.mubr.bf16.mxu1 %v6659_v12 }
  0x68   : > { %5502 = vmatmul.mubr.msk.bf16.gmra.mxu0 %vm507_vm2, %v6234_v27 }
  0x69   : > { %5518 = vmatmul.mubr.msk.bf16.gmra.mxu1 %vm507_vm2, %v6234_v27  ;;  %714 = vmatprep.mubr.bf16.mxu0 %v6659_v12 }
  0x6a   : > { %907 = vmatprep.mubr.bf16.mxu1 %v6659_v12 }
  0x70   : > { %5503 = vmatmul.mubr.msk.bf16.gmra.mxu0 %vm507_vm2, %v6241_v30 }
  0x71   : > { %5519 = vmatmul.mubr.msk.bf16.gmra.mxu1 %vm507_vm2, %v6241_v30  ;;  %724 = vmatprep.mubr.bf16.mxu0 %v6659_v12 }
  0x72   : > { %917 = vmatprep.mubr.bf16.mxu1 %v6659_v12 }
  0x78   : > { %5504 = vmatmul.mubr.msk.bf16.gmra.mxu0 %vm507_vm2, %v6248_v33 }
  0x79   : > { %5520 = vmatmul.mubr.msk.bf16.gmra.mxu1 %vm507_vm2, %v6248_v33  ;;  %734 = vmatprep.mubr.bf16.mxu0 %v6659_v12 }
  0x7a   : > { %927 = vmatprep.mubr.bf16.mxu1 %v6659_v12 }
  0x80   : > { %5505 = vmatmul.mubr.msk.bf16.gmra.mxu0 %vm507_vm2, %v6255_v34 }
  0x81   : > { %5521 = vmatmul.mubr.msk.bf16.gmra.mxu1 %vm507_vm2, %v6255_v34  ;;  %744 = vmatprep.mubr.bf16.mxu0 %v6659_v12 }
  0x82   : > { %937 = vmatprep.mubr.bf16.mxu1 %v6659_v12 }
  0x88   : > { %5506 = vmatmul.mubr.msk.bf16.gmra.mxu0 %vm507_vm2, %v6262_v35 }
  0x89   : > { %5522 = vmatmul.mubr.msk.bf16.gmra.mxu1 %vm507_vm2, %v6262_v35  ;;  %754 = vmatprep.mubr.bf16.mxu0 %v6659_v12  ;;  %v6339_v35 = vld [vmem:[%s9635_s3 + $0x2c8] ss:$16 sps:$4 sm:$0xff]  }
  0x8a   : > { %947 = vmatprep.mubr.bf16.mxu1 %v6659_v12 }
  0x90   : > { %5507 = vmatmul.mubr.msk.bf16.gmra.mxu0 %vm507_vm2, %v6269_v36 }
  0x91   : > { %5523 = vmatmul.mubr.msk.bf16.gmra.mxu1 %vm507_vm2, %v6269_v36  ;;  %v6344_v36 = vld [vmem:[%s9635_s3 + $0xac] ss:$16 sps:$4 sm:$0xff]  }
  0xd8   : > { %v606_v12 = vpop.f32.mrf.mxu0 }
  0xd9   : > { %v799_v44 = vpop.f32.mrf.mxu1  ;;  %v607_v55 = vadd.f32 %v606_v12, %v7039_v46 }
  0xda   : > { %v608_v47 = vpop.f32.mrf.mxu0  ;;  %v800_v59 = vadd.f32 %v799_v44, %v7045_v49  ;;  %v6347_v44 = vld [vmem:[%s9635_s3 + $0x2ac] ss:$16 sps:$4 sm:$0xff]  }
  0xdb   : > { %v801_v50 = vpop.f32.mrf.mxu1  ;;  %v609_v52 = vadd.f32 %v608_v47, %v7036_v45  ;;  %v958_v5 = vmax.f32 %v607_v55, 0.0 }
  0xdc   : > { %v610_v51 = vpop.f32.mrf.mxu0  ;;  %v802_v56 = vadd.f32 %v801_v50, %v7042_v48  ;;  %v960_v9 = vmax.f32 %v800_v59, 0.0 }
  0xdd   : > { %v611_v53 = vadd.f32 %v610_v51, %v7039_v46  ;;  %v803_v54 = vpop.f32.mrf.mxu1  ;;  %v959_v1 = vmax.f32 %v609_v52, 0.0 }
  0xde   : > { %v804_v57 = vadd.f32 %v803_v54, %v7045_v49  ;;  %v612_v58 = vpop.f32.mrf.mxu0  ;;  %v961_v6 = vmax.f32 %v802_v56, 0.0  ;;  %v6342_v56 = vld [vmem:[%s9635_s3 + $0xa8] ss:$16 sps:$4 sm:$0xff]  }
  0xdf   : > { %v613_v60 = vadd.f32 %v612_v58, %v7036_v45  ;;  %v805_v61 = vpop.f32.mrf.mxu1  ;;  %v962_v62 = vmax.f32 %v611_v53, 0.0 }
  0xe0   : > { %v806_v63 = vadd.f32 %v805_v61, %v7042_v48  ;;  %v616_v0 = vpop.f32.mrf.mxu0  ;;  %v964_v2 = vmax.f32 %v804_v57, 0.0  ;;  %v6350_v61 = vld [vmem:[%s9635_s3 + $0x8c] ss:$16 sps:$4 sm:$0xff]  }
  0xe1   : > { %v963_v3 = vmax.f32 %v613_v60, 0.0  ;;  %v809_v4 = vpop.f32.mrf.mxu1  ;;  %v7060_v14 = vpack.c.bf16 %v962_v62, %v958_v5  ;;  %v617_v24 = vadd.f32 %v616_v0, %v7039_v46  ;;  %v6345_v60 = vld [vmem:[%s9635_s3 + $0x2a8] ss:$16 sps:$4 sm:$0xff]  }
  0xe2   : > { %v965_v7 = vmax.f32 %v806_v63, 0.0  ;;  %v618_v8 = vpop.f32.mrf.mxu0  ;;  %v7070_v19 = vpack.c.bf16 %v964_v2, %v960_v9  ;;  %v810_v28 = vadd.f32 %v809_v4, %v7045_v49  ;;  %v6353_v2 = vld [vmem:[%s9635_s3 + $0x28c] ss:$16 sps:$4 sm:$0xff]  }
  0xe3   : > { %v811_v10 = vpop.f32.mrf.mxu1  ;;  %v7055_v11 = vpack.c.bf16 %v963_v3, %v959_v1  ;;  %v619_v20 = vadd.f32 %v618_v8, %v7036_v45  ;;  %v966_v47 = vmax.f32 %v617_v24, 0.0 }
  0xe4   : > { %v620_v15 = vpop.f32.mrf.mxu0  ;;  %v7062_v16 = vpack.c.bf16 %v965_v7, %v961_v6  ;;  %v812_v25 = vadd.f32 %v811_v10, %v7042_v48  ;;  %v968_v53 = vmax.f32 %v810_v28, 0.0  ;;  %v6348_v10 = vld [vmem:[%s9635_s3 + $0x88] ss:$16 sps:$4 sm:$0xff]  }
  0xe5   : > { %v621_v21 = vadd.f32 %v620_v15, %v7039_v46  ;;  %v813_v22 = vpop.f32.mrf.mxu1  ;;  %1972 = vmatprep.mubr.bf16.mxu0 %v7055_v11  ;;  %v967_v37 = vmax.f32 %v619_v20, 0.0  ;;  %v6356_v20 = vld [vmem:[%s9635_s3 + $0x6c] ss:$16 sps:$4 sm:$0xff]  }
  0xe6   : > { %v814_v26 = vadd.f32 %v813_v22, %v7045_v49  ;;  %2165 = vmatprep.mubr.bf16.mxu1 %v7062_v16  ;;  %v622_v27 = vpop.f32.mrf.mxu0  ;;  %1973 = vmatmul.mubr.bf16.vlgmr.msra.gmra.mxu0 %v7060_v14  ;;  %v969_v50 = vmax.f32 %v812_v25, 0.0  ;;  %v6359_v25 = vld [vmem:[%s9635_s3 + $0x26c] ss:$16 sps:$4 sm:$0xff]  }
  0xe7   : > { %v623_v29 = vadd.f32 %v622_v27, %v7036_v45  ;;  %v815_v30 = vpop.f32.mrf.mxu1  ;;  %2166 = vmatmul.mubr.bf16.vlgmr.msra.gmra.mxu1 %v7070_v19  ;;  %2327 = vmatpush1.bf16.msra.mxu0 %v6330_v13  ;;  %v970_v32 = vmax.f32 %v621_v21, 0.0 }
  0xe8   : > { %v816_v33 = vadd.f32 %v815_v30, %v7042_v48  ;;  %v626_v34 = vpop.f32.mrf.mxu0  ;;  %2520 = vmatpush1.bf16.msra.mxu1 %v6333_v17  ;;  %2328 = vmatprep.subr.bf16.mxu0 %v6338_v18  ;;  %v972_v38 = vmax.f32 %v814_v26, 0.0  ;;  %v6351_v18 = vld [vmem:[%s9635_s3 + $0x288] ss:$16 sps:$4 sm:$0xff]  }
  0xe9   : > { %v971_v42 = vmax.f32 %v623_v29, 0.0  ;;  %v819_v12 = vpop.f32.mrf.mxu1  ;;  %2521 = vmatprep.subr.bf16.mxu1 %v6341_v23  ;;  %v7104_v57 = vpack.c.bf16 %v970_v32, %v966_v47  ;;  %v627_v3 = vadd.f32 %v626_v34, %v7039_v46 }
  0xea   : > { %v973_v51 = vmax.f32 %v816_v33, 0.0  ;;  %v628_v52 = vpop.f32.mrf.mxu0  ;;  %v7114_v62 = vpack.c.bf16 %v972_v38, %v968_v53  ;;  %v820_v7 = vadd.f32 %v819_v12, %v7045_v49  ;;  %v6354_v33 = vld [vmem:[%s9635_s3 + $0x68] ss:$16 sps:$4 sm:$0xff]   ;;  %v6362_v38 = vld [vmem:[%s9635_s3 + $0x4c] ss:$16 sps:$4 sm:$0xff]  }
  0xeb   : > { %v821_v54 = vpop.f32.mrf.mxu1  ;;  %v7099_v55 = vpack.c.bf16 %v971_v42, %v967_v37  ;;  %2329 = vmatpush1.bf16.msra.mxu0 %v6336_v31  ;;  %v629_v63 = vadd.f32 %v628_v52, %v7036_v45  ;;  %v974_v26 = vmax.f32 %v627_v3, 0.0  ;;  %v6357_v37 = vld [vmem:[%s9635_s3 + $0x268] ss:$16 sps:$4 sm:$0xff]   ;;  %v6368_v3 = vld [vmem:[%s9635_s3 + $0x2c] ss:$16 sps:$4 sm:$0xff]  }
  0xec   : > { %v630_v58 = vpop.f32.mrf.mxu0  ;;  %v7106_v59 = vpack.c.bf16 %v973_v51, %v969_v50  ;;  %2522 = vmatpush1.bf16.msra.mxu1 %v6339_v35  ;;  %2330 = vmatprep.subr.bf16.mxu0 %v6344_v36  ;;  %v822_v4 = vadd.f32 %v821_v54, %v7042_v48  ;;  %v976_v30 = vmax.f32 %v820_v7, 0.0  ;;  %v6365_v50 = vld [vmem:[%s9635_s3 + $0x24c] ss:$16 sps:$4 sm:$0xff]  }
  0xed   : > { %v631_v0 = vadd.f32 %v630_v58, %v7039_v46  ;;  %v823_v1 = vpop.f32.mrf.mxu1  ;;  %1982 = vmatprep.mubr.bf16.mxu0 %v7099_v55  ;;  %2523 = vmatprep.subr.bf16.mxu1 %v6347_v44  ;;  %v975_v21 = vmax.f32 %v629_v63, 0.0 }
  0xee   : > { %v824_v5 = vadd.f32 %v823_v1, %v7045_v49  ;;  %2175 = vmatprep.mubr.bf16.mxu1 %v7106_v59  ;;  %v632_v6 = vpop.f32.mrf.mxu0  ;;  %1983 = vmatmul.mubr.bf16.gmra.mxu0 %v7104_v57  ;;  %v977_v27 = vmax.f32 %v822_v4, 0.0 }
  0xef   : > { %v633_v8 = vadd.f32 %v632_v6, %v7036_v45  ;;  %v825_v9 = vpop.f32.mrf.mxu1  ;;  %2176 = vmatmul.mubr.bf16.gmra.mxu1 %v7114_v62  ;;  %2331 = vmatpush1.bf16.msra.mxu0 %v6342_v56  ;;  %v978_v13 = vmax.f32 %v631_v0, 0.0 }
  0xf0   : > { %v826_v15 = vadd.f32 %v825_v9, %v7042_v48  ;;  %v636_v17 = vpop.f32.mrf.mxu0  ;;  %2524 = vmatpush1.bf16.msra.mxu1 %v6345_v60  ;;  %2332 = vmatprep.subr.bf16.mxu0 %v6350_v61  ;;  %v980_v22 = vmax.f32 %v824_v5, 0.0  ;;  %v6360_v61 = vld [vmem:[%s9635_s3 + $0x48] ss:$16 sps:$4 sm:$0xff]  }
  0xf1   : > { %v979_v23 = vmax.f32 %v633_v8, 0.0  ;;  %v829_v24 = vpop.f32.mrf.mxu1  ;;  %2525 = vmatprep.subr.bf16.mxu1 %v6353_v2  ;;  %v7148_v34 = vpack.c.bf16 %v978_v13, %v974_v26  ;;  %v637_v51 = vadd.f32 %v636_v17, %v7039_v46  ;;  %v6363_v2 = vld [vmem:[%s9635_s3 + $0x248] ss:$16 sps:$4 sm:$0xff]   ;;  %v6371_v8 = vld [vmem:[%s9635_s3 + $0x22c] ss:$16 sps:$4 sm:$0xff]  }
  0xf2   : > { %v981_v28 = vmax.f32 %v826_v15, 0.0  ;;  %v638_v29 = vpop.f32.mrf.mxu0  ;;  %v7158_v42 = vpack.c.bf16 %v980_v22, %v976_v30  ;;  %v830_v56 = vadd.f32 %v829_v24, %v7045_v49  ;;  %v6374_v26 = vld [vmem:[%s9635_s3 + $0xc] ss:$16 sps:$4 sm:$0xff]  }
  0xf3   : > { %v831_v31 = vpop.f32.mrf.mxu1  ;;  %v7143_v32 = vpack.c.bf16 %v979_v23, %v975_v21  ;;  %2333 = vmatpush1.bf16.msra.mxu0 %v6348_v10  ;;  %v639_v12 = vadd.f32 %v638_v29, %v7036_v45  ;;  %v982_v9 = vmax.f32 %v637_v51, 0.0  ;;  %v6366_v21 = vld [vmem:[%s9635_s3 + $0x28] ss:$16 sps:$4 sm:$0xff]  }
  0xf4   : > { %v640_v35 = vpop.f32.mrf.mxu0  ;;  %v7150_v36 = vpack.c.bf16 %v981_v28, %v977_v27  ;;  %2526 = vmatpush1.bf16.msra.mxu1 %v6351_v18  ;;  %2334 = vmatprep.subr.bf16.mxu0 %v6356_v20  ;;  %v832_v52 = vadd.f32 %v831_v31, %v7042_v48  ;;  %v984_v17 = vmax.f32 %v830_v56, 0.0  ;;  %v6377_v31 = vld [vmem:[%s9635_s3 + $0x20c] ss:$16 sps:$4 sm:$0xff]  }
  0xf5   : > { %v641_v44 = vadd.f32 %v640_v35, %v7039_v46  ;;  %v833_v47 = vpop.f32.mrf.mxu1  ;;  %1992 = vmatprep.mubr.bf16.mxu0 %v7143_v32  ;;  %2527 = vmatprep.subr.bf16.mxu1 %v6359_v25  ;;  %v983_v4 = vmax.f32 %v639_v12, 0.0  ;;  %v6369_v25 = vld [vmem:[%s9635_s3 + $0x228] ss:$16 sps:$4 sm:$0xff]   ;;  %v6380_v56 = vld [vmem:[%s9635_s3 + $0x1ec] ss:$16 sps:$4 sm:$0xff]  }
  0xf6   : > { %v834_v53 = vadd.f32 %v833_v47, %v7045_v49  ;;  %2185 = vmatprep.mubr.bf16.mxu1 %v7150_v36  ;;  %v642_v54 = vpop.f32.mrf.mxu0  ;;  %1993 = vmatmul.mubr.bf16.gmra.mxu0 %v7148_v34  ;;  %v985_v10 = vmax.f32 %v832_v52, 0.0 }
  0xf7   : > { %v643_v58 = vadd.f32 %v642_v54, %v7036_v45  ;;  %v835_v60 = vpop.f32.mrf.mxu1  ;;  %2186 = vmatmul.mubr.bf16.gmra.mxu1 %v7158_v42  ;;  %2335 = vmatpush1.bf16.msra.mxu0 %v6354_v33  ;;  %v986_v63 = vmax.f32 %v641_v44, 0.0  ;;  %v6375_v54 = vld [vmem:[%s9635_s3 + $0x208] ss:$16 sps:$4 sm:$0xff]  }
  0xf8   : > { %v836_v0 = vadd.f32 %v835_v60, %v7042_v48  ;;  %v646_v1 = vpop.f32.mrf.mxu0  ;;  %2528 = vmatpush1.bf16.msra.mxu1 %v6357_v37  ;;  %2336 = vmatprep.subr.bf16.mxu0 %v6362_v38  ;;  %v988_v5 = vmax.f32 %v834_v53, 0.0 }
  0xf9   : > { %v987_v6 = vmax.f32 %v643_v58, 0.0  ;;  %v839_v7 = vpop.f32.mrf.mxu1  ;;  %2529 = vmatprep.subr.bf16.mxu1 %v6365_v50  ;;  %v7192_v22 = vpack.c.bf16 %v986_v63, %v982_v9  ;;  %v647_v33 = vadd.f32 %v646_v1, %v7039_v46  ;;  %v6372_v50 = vld [vmem:[%s9635_s3 + $0x8] ss:$16 sps:$4 sm:$0xff]  }
  0xfa   : > { %v989_v13 = vmax.f32 %v836_v0, 0.0  ;;  %v648_v15 = vpop.f32.mrf.mxu0  ;;  %v7202_v27 = vpack.c.bf16 %v988_v5, %v984_v17  ;;  %v840_v12 = vadd.f32 %v839_v7, %v7045_v49  ;;  %v6383_v0 = vld [vmem:[%s9635_s3 + $0x3ec] ss:$16 sps:$4 sm:$0xff]  }
  0xfb   : > { %v841_v18 = vpop.f32.mrf.mxu1  ;;  %v7187_v20 = vpack.c.bf16 %v987_v6, %v983_v4  ;;  %2337 = vmatpush1.bf16.msra.mxu0 %v6360_v61  ;;  %v649_v28 = vadd.f32 %v648_v15, %v7036_v45  ;;  %v990_v1 = vmax.f32 %v647_v33, 0.0  ;;  %v6381_v15 = vld [vmem:[%s9635_s3 + $0x3e8] ss:$16 sps:$4 sm:$0xff]   ;;  %v6386_v17 = vld [vmem:[%s9635_s3 + $0x1cc] ss:$16 sps:$4 sm:$0xff]  }
  0xfc   : > { %v650_v23 = vpop.f32.mrf.mxu0  ;;  %v7194_v24 = vpack.c.bf16 %v989_v13, %v985_v10  ;;  %2530 = vmatpush1.bf16.msra.mxu1 %v6363_v2  ;;  %2338 = vmatprep.subr.bf16.mxu0 %v6368_v3  ;;  %v842_v35 = vadd.f32 %v841_v18, %v7042_v48  ;;  %v992_v5 = vmax.f32 %v840_v12, 0.0 }
  0xfd   : > { %v651_v29 = vadd.f32 %v650_v23, %v7039_v46  ;;  %v843_v30 = vpop.f32.mrf.mxu1  ;;  %2002 = vmatprep.mubr.bf16.mxu0 %v7187_v20  ;;  %2531 = vmatprep.subr.bf16.mxu1 %v6371_v8  ;;  %v991_v58 = vmax.f32 %v649_v28, 0.0  ;;  %v6378_v8 = vld [vmem:[%s9635_s3 + $0x1e8] ss:$16 sps:$4 sm:$0xff]  }
  0xfe   : > { %v844_v37 = vadd.f32 %v843_v30, %v7045_v49  ;;  %2195 = vmatprep.mubr.bf16.mxu1 %v7194_v24  ;;  %v652_v38 = vpop.f32.mrf.mxu0  ;;  %2003 = vmatmul.mubr.bf16.gmra.mxu0 %v7192_v22  ;;  %v993_v2 = vmax.f32 %v842_v35, 0.0 }
  0xff   : > { %v653_v44 = vadd.f32 %v652_v38, %v7036_v45  ;;  %v845_v47 = vpop.f32.mrf.mxu1  ;;  %2196 = vmatmul.mubr.bf16.gmra.mxu1 %v7202_v27  ;;  %2339 = vmatpush1.bf16.msra.mxu0 %v6366_v21  ;;  %v994_v51 = vmax.f32 %v651_v29, 0.0  ;;  %v6384_v38 = vld [vmem:[%s9635_s3 + $0x1c8] ss:$16 sps:$4 sm:$0xff]  }
 0x100   : > { %v846_v52 = vadd.f32 %v845_v47, %v7042_v48  ;;  %v656_v53 = vpop.f32.mrf.mxu0  ;;  %2532 = vmatpush1.bf16.msra.mxu1 %v6369_v25  ;;  %2340 = vmatprep.subr.bf16.mxu0 %v6374_v26  ;;  %v996_v60 = vmax.f32 %v844_v37, 0.0  ;;  %v6389_v26 = vld [vmem:[%s9635_s3 + $0x3cc] ss:$16 sps:$4 sm:$0xff]  }
 0x101   : > { %v995_v61 = vmax.f32 %v653_v44, 0.0  ;;  %v849_v63 = vpop.f32.mrf.mxu1  ;;  %2533 = vmatprep.subr.bf16.mxu1 %v6377_v31  ;;  %v7236_v9 = vpack.c.bf16 %v994_v51, %v990_v1  ;;  %v657_v28 = vadd.f32 %v656_v53, %v7039_v46  ;;  %v6392_v51 = vld [vmem:[%s9635_s3 + $0x1ac] ss:$16 sps:$4 sm:$0xff]  }
 0x102   : > { %v997_v3 = vmax.f32 %v846_v52, 0.0  ;;  %v658_v4 = vpop.f32.mrf.mxu0  ;;  %v7246_v18 = vpack.c.bf16 %v996_v60, %v992_v5  ;;  %v850_v33 = vadd.f32 %v849_v63, %v7045_v49 }
 0x103   : > { %v851_v6 = vpop.f32.mrf.mxu1  ;;  %v7231_v7 = vpack.c.bf16 %v995_v61, %v991_v58  ;;  %2341 = vmatpush1.bf16.msra.mxu0 %v6372_v50  ;;  %v659_v21 = vadd.f32 %v658_v4, %v7036_v45  ;;  %v6387_v50 = vld [vmem:[%s9635_s3 + $0x3c8] ss:$16 sps:$4 sm:$0xff]   ;;  %v6395_v58 = vld [vmem:[%s9635_s3 + $0x3ac] ss:$16 sps:$4 sm:$0xff]   ;;  %v998_v60 = vmax.f32 %v657_v28, 0.0 }
 0x104   : > { %v660_v10 = vpop.f32.mrf.mxu0  ;;  %v7238_v13 = vpack.c.bf16 %v997_v3, %v993_v2  ;;  %2534 = vmatpush1.bf16.msra.mxu1 %v6375_v54  ;;  %2342 = vmatprep.subr.bf16.mxu0 %v6380_v56  ;;  %v852_v29 = vadd.f32 %v851_v6, %v7042_v48  ;;  %v1000_v1 = vmax.f32 %v850_v33, 0.0  ;;  %v6390_v4 = vld [vmem:[%s9635_s3 + $0x1a8] ss:$16 sps:$4 sm:$0xff]  }
 0x105   : > { %v661_v23 = vadd.f32 %v660_v10, %v7039_v46  ;;  %v853_v25 = vpop.f32.mrf.mxu1  ;;  %2012 = vmatprep.mubr.bf16.mxu0 %v7231_v7  ;;  %2535 = vmatprep.subr.bf16.mxu1 %v6383_v0  ;;  %v999_v52 = vmax.f32 %v659_v21, 0.0  ;;  %v6393_v10 = vld [vmem:[%s9635_s3 + $0x3a8] ss:$16 sps:$4 sm:$0xff]  }
 0x106   : > { %v854_v30 = vadd.f32 %v853_v25, %v7045_v49  ;;  %2205 = vmatprep.mubr.bf16.mxu1 %v7238_v13  ;;  %v662_v31 = vpop.f32.mrf.mxu0  ;;  %2013 = vmatmul.mubr.bf16.gmra.mxu0 %v7236_v9  ;;  %v1001_v61 = vmax.f32 %v852_v29, 0.0 }
 0x107   : > { %v663_v35 = vadd.f32 %v662_v31, %v7036_v45  ;;  %v855_v37 = vpop.f32.mrf.mxu1  ;;  %2206 = vmatmul.mubr.bf16.gmra.mxu1 %v7246_v18  ;;  %2343 = vmatpush2.bf16.msra.mxu0 %v6378_v8  ;;  %v1002_v12 = vmax.f32 %v661_v23, 0.0 }
 0x108   : > { %v856_v44 = vadd.f32 %v855_v37, %v7042_v48  ;;  %v666_v47 = vpop.f32.mrf.mxu0  ;;  %2536 = vmatpush2.bf16.msra.mxu1 %v6381_v15  ;;  %2344 = vmatprep.subr.bf16.mxu0 %v6386_v17  ;;  %v1004_v53 = vmax.f32 %v854_v30, 0.0  ;;  %v6398_v15 = vld [vmem:[%s9635_s3 + $0x18c] ss:$16 sps:$4 sm:$0xff]  }
 0x109   : > { %v1003_v54 = vmax.f32 %v663_v35, 0.0  ;;  %v859_v56 = vpop.f32.mrf.mxu1  ;;  %2537 = vmatprep.subr.bf16.mxu1 %v6389_v26  ;;  %v7280_v5 = vpack.c.bf16 %v1002_v12, %v998_v60  ;;  %v6401_v26 = vld [vmem:[%s9635_s3 + $0x38c] ss:$16 sps:$4 sm:$0xff]   ;;  %v667_v28 = vadd.f32 %v666_v47, %v7039_v46 }
 0x10a   : > { %v1005_v63 = vmax.f32 %v856_v44, 0.0  ;;  %v668_v0 = vpop.f32.mrf.mxu0  ;;  %v7290_v17 = vpack.c.bf16 %v1004_v53, %v1000_v1  ;;  %v860_v33 = vadd.f32 %v859_v56, %v7045_v49 }
 0x10b   : > { %v861_v2 = vpop.f32.mrf.mxu1  ;;  %v7275_v3 = vpack.c.bf16 %v1003_v54, %v999_v52  ;;  %2345 = vmatpush2.bf16.msra.mxu0 %v6384_v38  ;;  %v669_v21 = vadd.f32 %v668_v0, %v7036_v45  ;;  %v6396_v38 = vld [vmem:[%s9635_s3 + $0x188] ss:$16 sps:$4 sm:$0xff]   ;;  %v1006_v60 = vmax.f32 %v667_v28, 0.0 }
 0x10c   : > { %v670_v6 = vpop.f32.mrf.mxu0  ;;  %v7282_v8 = vpack.c.bf16 %v1005_v63, %v1001_v61  ;;  %2538 = vmatpush2.bf16.msra.mxu1 %v6387_v50  ;;  %2346 = vmatprep.subr.bf16.mxu0 %v6392_v51  ;;  %v862_v29 = vadd.f32 %v861_v2, %v7042_v48  ;;  %v6399_v50 = vld [vmem:[%s9635_s3 + $0x388] ss:$16 sps:$4 sm:$0xff]   ;;  %v6404_v51 = vld [vmem:[%s9635_s3 + $0x16c] ss:$16 sps:$4 sm:$0xff]   ;;  %v1008_v1 = vmax.f32 %v860_v33, 0.0 }
 0x10d   : > { %v671_v23 = vadd.f32 %v670_v6, %v7039_v46  ;;  %v863_v25 = vpop.f32.mrf.mxu1  ;;  %2022 = vmatprep.mubr.bf16.mxu0 %v7275_v3  ;;  %2539 = vmatprep.subr.bf16.mxu1 %v6395_v58  ;;  %v1007_v52 = vmax.f32 %v669_v21, 0.0  ;;  %v6407_v58 = vld [vmem:[%s9635_s3 + $0x36c] ss:$16 sps:$4 sm:$0xff]   ;;  %v6402_v6 = vld [vmem:[%s9635_s3 + $0x168] ss:$16 sps:$4 sm:$0xff]  }
 0x10e   : > { %v864_v30 = vadd.f32 %v863_v25, %v7045_v49  ;;  %2215 = vmatprep.mubr.bf16.mxu1 %v7282_v8  ;;  %v672_v31 = vpop.f32.mrf.mxu0  ;;  %2023 = vmatmul.mubr.bf16.gmra.mxu0 %v7280_v5  ;;  %v1009_v61 = vmax.f32 %v862_v29, 0.0  ;;  %v6410_v25 = vld [vmem:[%s9635_s3 + $0x14c] ss:$16 sps:$4 sm:$0xff]  }
 0x10f   : > { %v673_v35 = vadd.f32 %v672_v31, %v7036_v45  ;;  %v865_v37 = vpop.f32.mrf.mxu1  ;;  %2216 = vmatmul.mubr.bf16.gmra.mxu1 %v7290_v17  ;;  %2347 = vmatpush2.bf16.msra.mxu0 %v6390_v4  ;;  %v1010_v12 = vmax.f32 %v671_v23, 0.0  ;;  %v6405_v23 = vld [vmem:[%s9635_s3 + $0x368] ss:$16 sps:$4 sm:$0xff]   ;;  %v6413_v31 = vld [vmem:[%s9635_s3 + $0x34c] ss:$16 sps:$4 sm:$0xff]  }
 0x110   : > { %v866_v44 = vadd.f32 %v865_v37, %v7042_v48  ;;  %v676_v47 = vpop.f32.mrf.mxu0  ;;  %2540 = vmatpush2.bf16.msra.mxu1 %v6393_v10  ;;  %2348 = vmatprep.subr.bf16.mxu0 %v6398_v15  ;;  %v1012_v53 = vmax.f32 %v864_v30, 0.0 }
 0x111   : > { %v1011_v54 = vmax.f32 %v673_v35, 0.0  ;;  %v869_v56 = vpop.f32.mrf.mxu1  ;;  %2541 = vmatprep.subr.bf16.mxu1 %v6401_v26  ;;  %v7324_v10 = vpack.c.bf16 %v1010_v12, %v1006_v60  ;;  %v677_v33 = vadd.f32 %v676_v47, %v7039_v46  ;;  %v6408_v47 = vld [vmem:[%s9635_s3 + $0x148] ss:$16 sps:$4 sm:$0xff]  }
 0x112   : > { %v1013_v63 = vmax.f32 %v866_v44, 0.0  ;;  %v678_v0 = vpop.f32.mrf.mxu0  ;;  %v7334_v26 = vpack.c.bf16 %v1012_v53, %v1008_v1  ;;  %v870_v12 = vadd.f32 %v869_v56, %v7045_v49  ;;  %v6416_v56 = vld [vmem:[%s9635_s3 + $0x12c] ss:$16 sps:$4 sm:$0xff]  }
 0x113   : > { %v871_v2 = vpop.f32.mrf.mxu1  ;;  %v7319_v4 = vpack.c.bf16 %v1011_v54, %v1007_v52  ;;  %2349 = vmatpush2.bf16.msra.mxu0 %v6396_v38  ;;  %v679_v28 = vadd.f32 %v678_v0, %v7036_v45  ;;  %v6411_v54 = vld [vmem:[%s9635_s3 + $0x348] ss:$16 sps:$4 sm:$0xff]   ;;  %v6419_v0 = vld [vmem:[%s9635_s3 + $0x32c] ss:$16 sps:$4 sm:$0xff]   ;;  %v1014_v1 = vmax.f32 %v677_v33, 0.0 }
 0x114   : > { %v680_v15 = vpop.f32.mrf.mxu0  ;;  %v7326_v21 = vpack.c.bf16 %v1013_v63, %v1009_v61  ;;  %2542 = vmatpush2.bf16.msra.mxu1 %v6399_v50  ;;  %2350 = vmatprep.subr.bf16.mxu0 %v6404_v51  ;;  %v872_v35 = vadd.f32 %v871_v2, %v7042_v48  ;;  %v6417_v33 = vld [vmem:[%s9635_s3 + $0x328] ss:$16 sps:$4 sm:$0xff]  }
 0x115   : > { %v681_v29 = vadd.f32 %v680_v15, %v7039_v46  ;;  %v873_v30 = vpop.f32.mrf.mxu1  ;;  %2032 = vmatprep.mubr.bf16.mxu0 %v7319_v4  ;;  %2543 = vmatprep.subr.bf16.mxu1 %v6407_v58  ;;  %v1015_v58 = vmax.f32 %v679_v28, 0.0  ;;  %v6414_v28 = vld [vmem:[%s9635_s3 + $0x128] ss:$16 sps:$4 sm:$0xff]  }
 0x116   : > { %v874_v37 = vadd.f32 %v873_v30, %v7045_v49  ;;  %2225 = vmatprep.mubr.bf16.mxu1 %v7326_v21  ;;  %v682_v38 = vpop.f32.mrf.mxu0  ;;  %2033 = vmatmul.mubr.bf16.gmra.mxu0 %v7324_v10  ;;  %v1017_v2 = vmax.f32 %v872_v35, 0.0  ;;  %v6422_v35 = vld [vmem:[%s9635_s3 + $0x10c] ss:$16 sps:$4 sm:$0xff]  }
 0x117   : > { %v683_v44 = vadd.f32 %v682_v38, %v7036_v45  ;;  %v875_v50 = vpop.f32.mrf.mxu1  ;;  %2226 = vmatmul.mubr.bf16.gmra.mxu1 %v7334_v26  ;;  %2351 = vmatpush2.bf16.msra.mxu0 %v6402_v6  ;;  %v1018_v51 = vmax.f32 %v681_v29, 0.0 }
 0x118   : > { %v876_v52 = vadd.f32 %v875_v50, %v7042_v48  ;;  %v686_v53 = vpop.f32.mrf.mxu0  ;;  %2544 = vmatpush2.bf16.msra.mxu1 %v6405_v23  ;;  %2352 = vmatprep.subr.bf16.mxu0 %v6410_v25  ;;  %v1020_v60 = vmax.f32 %v874_v37, 0.0  ;;  %v1016_v23 = vmax.f32 %v870_v12, 0.0 }
 0x119   : > { %v1019_v61 = vmax.f32 %v683_v44, 0.0  ;;  %v879_v63 = vpop.f32.mrf.mxu1  ;;  %2545 = vmatprep.subr.bf16.mxu1 %v6413_v31  ;;  %v7368_v30 = vpack.c.bf16 %v1018_v51, %v1014_v1  ;;  %v687_v51 = vadd.f32 %v686_v53, %v7039_v46  ;;  %v6420_v53 = vld [vmem:[%s9635_s3 + $0x108] ss:$16 sps:$4 sm:$0xff]  }
 0x11a   : > { %v1021_v6 = vmax.f32 %v876_v52, 0.0  ;;  %v688_v15 = vpop.f32.mrf.mxu0  ;;  %v7378_v38 = vpack.c.bf16 %v1020_v60, %v1016_v23 }
 0x11b   : > { %v881_v25 = vpop.f32.mrf.mxu1  ;;  %v7363_v29 = vpack.c.bf16 %v1019_v61, %v1015_v58  ;;  %2353 = vmatpush2.bf16.msra.mxu0 %v6408_v47  ;;  %v689_v12 = vadd.f32 %v688_v15, %v7036_v45  ;;  %v6425_v47 = vld [vmem:[%s9635_s3 + $0x30c] ss:$16 sps:$4 sm:$0xff]   ;;  %v880_v58 = vadd.f32 %v879_v63, %v7045_v49  ;;  %v6423_v63 = vld [vmem:[%s9635_s3 + $0x308] ss:$16 sps:$4 sm:$0xff]  }
 0x11c   : > { %v690_v31 = vpop.f32.mrf.mxu0  ;;  %v7370_v37 = vpack.c.bf16 %v1021_v6, %v1017_v2  ;;  %2546 = vmatpush2.bf16.msra.mxu1 %v6411_v54  ;;  %2354 = vmatprep.subr.bf16.mxu0 %v6416_v56  ;;  %v882_v52 = vadd.f32 %v881_v25, %v7042_v48 }
 0x11d   : > { %v691_v44 = vadd.f32 %v690_v31, %v7039_v46  ;;  %v883_v50 = vpop.f32.mrf.mxu1  ;;  %2042 = vmatprep.mubr.bf16.mxu0 %v7363_v29  ;;  %2547 = vmatprep.subr.bf16.mxu1 %v6419_v0  ;;  %v1023_v6 = vmax.f32 %v689_v12, 0.0  ;;  %v1024_v43 = vmax.f32 %v880_v58, 0.0 }
 0x11e   : > { %v884_v54 = vadd.f32 %v883_v50, %v7045_v49  ;;  %2235 = vmatprep.mubr.bf16.mxu1 %v7370_v37  ;;  %v692_v56 = vpop.f32.mrf.mxu0  ;;  %2043 = vmatmul.mubr.bf16.gmra.mxu0 %v7368_v30  ;;  %v1025_v31 = vmax.f32 %v882_v52, 0.0  ;;  %v6428_v52 = vld [vmem:[%s9637_s5 + $0xe4] ss:$16 sps:$4 sm:$0xff]  }
 0x11f   : > { %v693_v60 = vadd.f32 %v692_v56, %v7036_v45  ;;  %v885_v61 = vpop.f32.mrf.mxu1  ;;  %2236 = vmatmul.mubr.bf16.gmra.mxu1 %v7378_v38  ;;  %2355 = vmatpush2.bf16.msra.mxu0 %v6414_v28  ;;  %v1026_v0 = vmax.f32 %v691_v44, 0.0  ;;  %v1022_v28 = vmax.f32 %v687_v51, 0.0 }
 0x120   : > { %v886_v1 = vadd.f32 %v885_v61, %v7042_v48  ;;  %v696_v2 = vpop.f32.mrf.mxu0  ;;  %2548 = vmatpush2.bf16.msra.mxu1 %v6417_v33  ;;  %2356 = vmatprep.subr.bf16.mxu0 %v6422_v35  ;;  %v1028_v15 = vmax.f32 %v884_v54, 0.0 }
 0x121   : > { %v1027_v23 = vmax.f32 %v693_v60, 0.0  ;;  %v889_v25 = vpop.f32.mrf.mxu1  ;;  %2549 = vmatprep.subr.bf16.mxu1 %v6425_v47  ;;  %v7403_v33 = vpack.c.bf16 %v1026_v0, %v1022_v28  ;;  %v697_v58 = vadd.f32 %v696_v2, %v7039_v46 }
 0x122   : > { %v1029_v50 = vmax.f32 %v886_v1, 0.0  ;;  %v698_v56 = vpop.f32.mrf.mxu0  ;;  %v7407_v12 = vpack.c.bf16 %v1028_v15, %v1024_v43  ;;  %v890_v0 = vadd.f32 %v889_v25, %v7045_v49 }
 0x123   : > { %v891_v44 = vpop.f32.mrf.mxu1  ;;  %v7401_v41 = vpack.c.bf16 %v1027_v23, %v1023_v6  ;;  %2357 = vmatpush2.bf16.msra.mxu0 %v6420_v53  ;;  %v699_v54 = vadd.f32 %v698_v56, %v7036_v45  ;;  %v1030_v56 = vmax.f32 %v697_v58, 0.0 }
 0x124   : > { %v700_v35 = vpop.f32.mrf.mxu0  ;;  %v7405_v61 = vpack.c.bf16 %v1029_v50, %v1025_v31  ;;  %2550 = vmatpush2.bf16.msra.mxu1 %v6423_v63  ;;  %9699 = vst [vmem:[#allocation6_spill] sm:$0xff] %v7407_v12  ;;  %v892_v60 = vadd.f32 %v891_v44, %v7042_v48  ;;  %3694 = vmatprep.subr.bf16.mxu0 %v6428_v52  ;;  %v1032_v40 = vmax.f32 %v890_v0, 0.0 }
 0x125   : > { %v701_v47 = vadd.f32 %v700_v35, %v7039_v46  ;;  %v893_v51 = vpop.f32.mrf.mxu1  ;;  %2052 = vmatprep.mubr.bf16.mxu0 %v7401_v41  ;;  %v1031_v23 = vmax.f32 %v699_v54, 0.0 }
 0x126   : > { %v894_v53 = vadd.f32 %v893_v51, %v7045_v49  ;;  %2245 = vmatprep.mubr.bf16.mxu1 %v7405_v61  ;;  %v702_v43 = vpop.f32.mrf.mxu0  ;;  %2053 = vmatmul.mubr.bf16.gmra.mxu0 %v7403_v33  ;;  %v1033_v44 = vmax.f32 %v892_v60, 0.0 }
 0x127   : > { %v703_v1 = vadd.f32 %v702_v43, %v7036_v45  ;;  %v895_v63 = vpop.f32.mrf.mxu1  ;;  %2246 = vmatmul.mubr.bf16.gmra.mxu1 %v7407_v12  ;;  %v1034_v6 = vmax.f32 %v701_v47, 0.0 }
 0x128   : > { %v896_v2 = vadd.f32 %v895_v63, %v7042_v48  ;;  %v706_v15 = vpop.f32.mrf.mxu0  ;;  %v1036_v28 = vmax.f32 %v894_v53, 0.0 }
 0x129   : > { %v1035_v31 = vmax.f32 %v703_v1, 0.0  ;;  %v899_v50 = vpop.f32.mrf.mxu1  ;;  %v7426_v43 = vpack.c.bf16 %v1034_v6, %v1030_v56  ;;  %v707_v58 = vadd.f32 %v706_v15, %v7039_v46 }
 0x12a   : > { %v1037_v35 = vmax.f32 %v896_v2, 0.0  ;;  %v708_v51 = vpop.f32.mrf.mxu0  ;;  %v7430_v47 = vpack.c.bf16 %v1036_v28, %v1032_v40  ;;  %v900_v40 = vadd.f32 %v899_v50, %v7045_v49 }
 0x12b   : > { %v901_v25 = vpop.f32.mrf.mxu1  ;;  %v7424_v39 = vpack.c.bf16 %v1035_v31, %v1031_v23  ;;  %9701 = vst [vmem:[#allocation8_spill] sm:$0xff] %v7426_v43  ;;  %v709_v54 = vadd.f32 %v708_v51, %v7036_v45 }
 0x12c   : > { %v710_v12 = vpop.f32.mrf.mxu0  ;;  %v7428_v52 = vpack.c.bf16 %v1037_v35, %v1033_v44  ;;  %9703 = vst [vmem:[#allocation10_spill] sm:$0xff] %v7430_v47  ;;  %v902_v60 = vadd.f32 %v901_v25, %v7042_v48  ;;  %v1038_v35 = vmax.f32 %v707_v58, 0.0 }
 0x12d   : > { %9700 = vst [vmem:[#allocation7_spill] sm:$0xff] %v7424_v39  ;;  %v711_v53 = vadd.f32 %v710_v12, %v7039_v46  ;;  %v903_v1 = vpop.f32.mrf.mxu1  ;;  %2062 = vmatprep.mubr.bf16.mxu0 %v7424_v39  ;;  %v1039_v28 = vmax.f32 %v709_v54, 0.0 }
 0x12e   : > { %9702 = vst [vmem:[#allocation9_spill] sm:$0xff] %v7428_v52  ;;  %v904_v0 = vadd.f32 %v903_v1, %v7045_v49  ;;  %2255 = vmatprep.mubr.bf16.mxu1 %v7428_v52  ;;  %v712_v63 = vpop.f32.mrf.mxu0  ;;  %2063 = vmatmul.mubr.bf16.gmra.mxu0 %v7426_v43  ;;  %v1041_v51 = vmax.f32 %v902_v60, 0.0  ;;  %v1040_v43 = vmax.f32 %v900_v40, 0.0 }
 0x12f   : > { %v713_v6 = vadd.f32 %v712_v63, %v7036_v45  ;;  %v905_v2 = vpop.f32.mrf.mxu1  ;;  %2256 = vmatmul.mubr.bf16.gmra.mxu1 %v7430_v47  ;;  %v1042_v12 = vmax.f32 %v711_v53, 0.0 }
 0x130   : > { %v906_v23 = vadd.f32 %v905_v2, %v7042_v48  ;;  %v716_v15 = vpop.f32.mrf.mxu0  ;;  %v1044_v31 = vmax.f32 %v904_v0, 0.0 }
 0x131   : > { %v1043_v56 = vmax.f32 %v713_v6, 0.0  ;;  %v909_v44 = vpop.f32.mrf.mxu1  ;;  %v7446_v63 = vpack.c.bf16 %v1042_v12, %v1038_v35  ;;  %v717_v58 = vadd.f32 %v716_v15, %v7039_v46 }
 0x132   : > { %v1045_v25 = vmax.f32 %v906_v23, 0.0  ;;  %v718_v1 = vpop.f32.mrf.mxu0  ;;  %v7450_v53 = vpack.c.bf16 %v1044_v31, %v1040_v43  ;;  %v910_v43 = vadd.f32 %v909_v44, %v7045_v49 }
 0x133   : > { %v911_v52 = vpop.f32.mrf.mxu1  ;;  %v7444_v50 = vpack.c.bf16 %v1043_v56, %v1039_v28  ;;  %9705 = vst [vmem:[#allocation12_spill] sm:$0xff] %v7446_v63  ;;  %v719_v54 = vadd.f32 %v718_v1, %v7036_v45 }
 0x134   : > { %v720_v39 = vpop.f32.mrf.mxu0  ;;  %v7448_v47 = vpack.c.bf16 %v1045_v25, %v1041_v51  ;;  %9707 = vst [vmem:[#allocation14_spill] sm:$0xff] %v7450_v53  ;;  %v912_v60 = vadd.f32 %v911_v52, %v7042_v48  ;;  %v6440_v51 = vld [vmem:[%s9637_s5 + $0x2e4] ss:$16 sps:$4 sm:$0xff]   ;;  %v1046_v25 = vmax.f32 %v717_v58, 0.0 }
 0x135   : > { %9704 = vst [vmem:[#allocation11_spill] sm:$0xff] %v7444_v50  ;;  %v721_v0 = vadd.f32 %v720_v39, %v7039_v46  ;;  %v913_v6 = vpop.f32.mrf.mxu1  ;;  %2072 = vmatprep.mubr.bf16.mxu0 %v7444_v50  ;;  %v1047_v31 = vmax.f32 %v719_v54, 0.0  ;;  %3887 = vmatprep.subr.bf16.mxu1 %v6440_v51 }
 0x136   : > { %9706 = vst [vmem:[#allocation13_spill] sm:$0xff] %v7448_v47  ;;  %v914_v40 = vadd.f32 %v913_v6, %v7045_v49  ;;  %2265 = vmatprep.mubr.bf16.mxu1 %v7448_v47  ;;  %v722_v2 = vpop.f32.mrf.mxu0  ;;  %2073 = vmatmul.mubr.bf16.gmra.mxu0 %v7446_v63  ;;  %v1049_v1 = vmax.f32 %v912_v60, 0.0 }
 0x137   : > { %v723_v12 = vadd.f32 %v722_v2, %v7036_v45  ;;  %v915_v23 = vpop.f32.mrf.mxu1  ;;  %2266 = vmatmul.mubr.bf16.gmra.mxu1 %v7450_v53  ;;  %v1050_v39 = vmax.f32 %v721_v0, 0.0  ;;  %v1048_v2 = vmax.f32 %v910_v43, 0.0 }
 0x138   : > { %v916_v28 = vadd.f32 %v915_v23, %v7042_v48  ;;  %v726_v15 = vpop.f32.mrf.mxu0  ;;  %v1052_v52 = vmax.f32 %v914_v40, 0.0 }
 0x139   : > { %v1051_v56 = vmax.f32 %v723_v12, 0.0  ;;  %v919_v35 = vpop.f32.mrf.mxu1  ;;  %v7469_v0 = vpack.c.bf16 %v1050_v39, %v1046_v25  ;;  %v727_v60 = vadd.f32 %v726_v15, %v7039_v46 }
 0x13a   : > { %v1053_v44 = vmax.f32 %v916_v28, 0.0  ;;  %v728_v6 = vpop.f32.mrf.mxu0  ;;  %v7473_v40 = vpack.c.bf16 %v1052_v52, %v1048_v2 }
 0x13b   : > { %v921_v63 = vpop.f32.mrf.mxu1  ;;  %v7467_v47 = vpack.c.bf16 %v1051_v56, %v1047_v31  ;;  %9709 = vst [vmem:[#allocation16_spill] sm:$0xff] %v7469_v0  ;;  %v729_v12 = vadd.f32 %v728_v6, %v7036_v45  ;;  %v920_v31 = vadd.f32 %v919_v35, %v7045_v49  ;;  %v1054_v2 = vmax.f32 %v727_v60, 0.0 }
 0x13c   : > { %v730_v23 = vpop.f32.mrf.mxu0  ;;  %v7471_v54 = vpack.c.bf16 %v1053_v44, %v1049_v1  ;;  %9711 = vst [vmem:[#allocation18_spill] sm:$0xff] %v7473_v40  ;;  %v922_v43 = vadd.f32 %v921_v63, %v7042_v48 }
 0x13d   : > { %9708 = vst [vmem:[#allocation15_spill] sm:$0xff] %v7467_v47  ;;  %v731_v53 = vadd.f32 %v730_v23, %v7039_v46  ;;  %v923_v58 = vpop.f32.mrf.mxu1  ;;  %2082 = vmatprep.mubr.bf16.mxu0 %v7467_v47  ;;  %v1055_v1 = vmax.f32 %v729_v12, 0.0 }
 0x13e   : > { %9710 = vst [vmem:[#allocation17_spill] sm:$0xff] %v7471_v54  ;;  %v924_v28 = vadd.f32 %v923_v58, %v7045_v49  ;;  %2275 = vmatprep.mubr.bf16.mxu1 %v7471_v54  ;;  %v732_v39 = vpop.f32.mrf.mxu0  ;;  %2083 = vmatmul.mubr.bf16.gmra.mxu0 %v7469_v0  ;;  %v1057_v23 = vmax.f32 %v922_v43, 0.0  ;;  %v1056_v0 = vmax.f32 %v920_v31, 0.0 }
 0x13f   : > { %v733_v52 = vadd.f32 %v732_v39, %v7036_v45  ;;  %v925_v56 = vpop.f32.mrf.mxu1  ;;  %2276 = vmatmul.mubr.bf16.gmra.mxu1 %v7473_v40  ;;  %v1058_v51 = vmax.f32 %v731_v53, 0.0 }
 0x140   : > { %v926_v25 = vadd.f32 %v925_v56, %v7042_v48  ;;  %v736_v15 = vpop.f32.mrf.mxu0  ;;  %v1060_v63 = vmax.f32 %v924_v28, 0.0 }
 0x141   : > { %v1059_v44 = vmax.f32 %v733_v52, 0.0  ;;  %v929_v6 = vpop.f32.mrf.mxu1  ;;  %v7489_v39 = vpack.c.bf16 %v1058_v51, %v1054_v2  ;;  %v737_v60 = vadd.f32 %v736_v15, %v7039_v46 }
 0x142   : > { %v1061_v58 = vmax.f32 %v926_v25, 0.0  ;;  %v738_v54 = vpop.f32.mrf.mxu0  ;;  %v7493_v53 = vpack.c.bf16 %v1060_v63, %v1056_v0  ;;  %v930_v0 = vadd.f32 %v929_v6, %v7045_v49 }
 0x143   : > { %v931_v47 = vpop.f32.mrf.mxu1  ;;  %v7487_v35 = vpack.c.bf16 %v1059_v44, %v1055_v1  ;;  %9713 = vst [vmem:[#allocation20_spill] sm:$0xff] %v7489_v39  ;;  %v739_v12 = vadd.f32 %v738_v54, %v7036_v45  ;;  %v1062_v2 = vmax.f32 %v737_v60, 0.0 }
 0x144   : > { %v740_v50 = vpop.f32.mrf.mxu0  ;;  %v7491_v40 = vpack.c.bf16 %v1061_v58, %v1057_v23  ;;  %9715 = vst [vmem:[#allocation22_spill] sm:$0xff] %v7493_v53  ;;  %v932_v43 = vadd.f32 %v931_v47, %v7042_v48 }
 0x145   : > { %9712 = vst [vmem:[#allocation19_spill] sm:$0xff] %v7487_v35  ;;  %v741_v28 = vadd.f32 %v740_v50, %v7039_v46  ;;  %v933_v52 = vpop.f32.mrf.mxu1  ;;  %2092 = vmatprep.mubr.bf16.mxu0 %v7487_v35  ;;  %v1063_v1 = vmax.f32 %v739_v12, 0.0 }
 0x146   : > { %9714 = vst [vmem:[#allocation21_spill] sm:$0xff] %v7491_v40  ;;  %v934_v31 = vadd.f32 %v933_v52, %v7045_v49  ;;  %2285 = vmatprep.mubr.bf16.mxu1 %v7491_v40  ;;  %v742_v56 = vpop.f32.mrf.mxu0  ;;  %2093 = vmatmul.mubr.bf16.gmra.mxu0 %v7489_v39  ;;  %v1065_v23 = vmax.f32 %v932_v43, 0.0  ;;  %v1064_v39 = vmax.f32 %v930_v0, 0.0 }
 0x147   : > { %v743_v54 = vadd.f32 %v742_v56, %v7036_v45  ;;  %v935_v51 = vpop.f32.mrf.mxu1  ;;  %2286 = vmatmul.mubr.bf16.gmra.mxu1 %v7493_v53  ;;  %v1066_v50 = vmax.f32 %v741_v28, 0.0 }
 0x148   : > { %v936_v25 = vadd.f32 %v935_v51, %v7042_v48  ;;  %v746_v15 = vpop.f32.mrf.mxu0  ;;  %v1068_v47 = vmax.f32 %v934_v31, 0.0 }
 0x149   : > { %v1067_v63 = vmax.f32 %v743_v54, 0.0  ;;  %v939_v44 = vpop.f32.mrf.mxu1  ;;  %v7509_v56 = vpack.c.bf16 %v1066_v50, %v1062_v2  ;;  %v747_v60 = vadd.f32 %v746_v15, %v7039_v46 }
 0x14a   : > { %v1069_v58 = vmax.f32 %v936_v25, 0.0  ;;  %v748_v52 = vpop.f32.mrf.mxu0  ;;  %v7513_v28 = vpack.c.bf16 %v1068_v47, %v1064_v39  ;;  %v940_v39 = vadd.f32 %v939_v44, %v7045_v49 }
 0x14b   : > { %v941_v40 = vpop.f32.mrf.mxu1  ;;  %v7507_v6 = vpack.c.bf16 %v1067_v63, %v1063_v1  ;;  %9717 = vst [vmem:[#allocation24_spill] sm:$0xff] %v7509_v56  ;;  %v749_v12 = vadd.f32 %v748_v52, %v7036_v45 }
 0x14c   : > { %v750_v35 = vpop.f32.mrf.mxu0  ;;  %v7511_v53 = vpack.c.bf16 %v1069_v58, %v1065_v23  ;;  %9719 = vst [vmem:[#allocation26_spill] sm:$0xff] %v7513_v28  ;;  %v942_v43 = vadd.f32 %v941_v40, %v7042_v48  ;;  %v1070_v23 = vmax.f32 %v747_v60, 0.0 }
 0x14d   : > { %9716 = vst [vmem:[#allocation23_spill] sm:$0xff] %v7507_v6  ;;  %v751_v31 = vadd.f32 %v750_v35, %v7039_v46  ;;  %v943_v54 = vpop.f32.mrf.mxu1  ;;  %2102 = vmatprep.mubr.bf16.mxu0 %v7507_v6  ;;  %v1071_v47 = vmax.f32 %v749_v12, 0.0 }
 0x14e   : > { %9718 = vst [vmem:[#allocation25_spill] sm:$0xff] %v7511_v53  ;;  %v944_v0 = vadd.f32 %v943_v54, %v7045_v49  ;;  %2295 = vmatprep.mubr.bf16.mxu1 %v7511_v53  ;;  %v752_v51 = vpop.f32.mrf.mxu0  ;;  %2103 = vmatmul.mubr.bf16.gmra.mxu0 %v7509_v56  ;;  %v1073_v58 = vmax.f32 %v942_v43, 0.0  ;;  %v1072_v56 = vmax.f32 %v940_v39, 0.0 }
 0x14f   : > { %v753_v50 = vadd.f32 %v752_v51, %v7036_v45  ;;  %v945_v25 = vpop.f32.mrf.mxu1  ;;  %2296 = vmatmul.mubr.bf16.gmra.mxu1 %v7513_v28  ;;  %v1074_v35 = vmax.f32 %v751_v31, 0.0 }
 0x150   : > { %v946_v1 = vadd.f32 %v945_v25, %v7042_v48  ;;  %v756_v15 = vpop.f32.mrf.mxu0  ;;  %v1076_v40 = vmax.f32 %v944_v0, 0.0 }
 0x151   : > { %v1075_v63 = vmax.f32 %v753_v50, 0.0  ;;  %v949_v2 = vpop.f32.mrf.mxu1  ;;  %v7529_v51 = vpack.c.bf16 %v1074_v35, %v1070_v23  ;;  %v757_v60 = vadd.f32 %v756_v15, %v7039_v46 }
 0x152   : > { %v1077_v52 = vmax.f32 %v946_v1, 0.0  ;;  %v758_v54 = vpop.f32.mrf.mxu0  ;;  %v7533_v31 = vpack.c.bf16 %v1076_v40, %v1072_v56  ;;  %v950_v56 = vadd.f32 %v949_v2, %v7045_v49  ;;  %v6431_v2 = vld [vmem:[%s9637_s5 + $0xc4] ss:$16 sps:$4 sm:$0xff]  }
 0x153   : > { %v951_v53 = vpop.f32.mrf.mxu1  ;;  %v7527_v44 = vpack.c.bf16 %v1075_v63, %v1071_v47  ;;  %v759_v12 = vadd.f32 %v758_v54, %v7036_v45  ;;  %v1078_v40 = vmax.f32 %v757_v60, 0.0  ;;  %v6467_v60 = vld [vmem:[%s9637_s5 + $0x284] ss:$16 sps:$4 sm:$0xff]  }
 0x154   : > { %v760_v6 = vpop.f32.mrf.mxu0  ;;  %v7531_v28 = vpack.c.bf16 %v1077_v52, %v1073_v58  ;;  %v952_v43 = vadd.f32 %v951_v53, %v7042_v48  ;;  %v1080_v58 = vmax.f32 %v950_v56, 0.0  ;;  %v6485_v56 = vld [vmem:[%s9637_s5 + $0x244] ss:$16 sps:$4 sm:$0xff]  }
 0x155   : > { %v761_v0 = vadd.f32 %v760_v6, %v7039_v46  ;;  %v953_v50 = vpop.f32.mrf.mxu1  ;;  %2112 = vmatprep.mubr.bf16.mxu0 %v7527_v44  ;;  %v1079_v46 = vmax.f32 %v759_v12, 0.0  ;;  %v6438_v12 = vld [vmem:[%s9637_s5 + $0x2e0] ss:$16 sps:$4 sm:$0xff]  }
 0x156   : > { %v954_v39 = vadd.f32 %v953_v50, %v7045_v49  ;;  %2305 = vmatprep.mubr.bf16.mxu1 %v7531_v28  ;;  %v762_v25 = vpop.f32.mrf.mxu0  ;;  %2113 = vmatmul.mubr.bf16.gmra.mxu0 %v7529_v51  ;;  %v1081_v63 = vmax.f32 %v952_v43, 0.0  ;;  %v6456_v50 = vld [vmem:[%s9637_s5 + $0x2a0] ss:$16 sps:$4 sm:$0xff]  }
 0x157   : > { %v763_v35 = vadd.f32 %v762_v25, %v7036_v45  ;;  %v955_v1 = vpop.f32.mrf.mxu1  ;;  %2306 = vmatmul.mubr.bf16.gmra.mxu1 %v7533_v31  ;;  %v1082_v6 = vmax.f32 %v761_v0, 0.0  ;;  %v6447_v0 = vld [vmem:[%s9637_s5 + $0x2c0] ss:$16 sps:$4 sm:$0xff]  }
 0x158   : > { %v956_v47 = vadd.f32 %v955_v1, %v7042_v48  ;;  %v1084_v15 = vmax.f32 %v954_v39, 0.0  ;;  %v6426_v48 = vld [vmem:[%s9637_s5 + $0xe0] ss:$16 sps:$4 sm:$0xff]  }
 0x159   : > { %v1083_v53 = vmax.f32 %v763_v35, 0.0  ;;  %v7549_v54 = vpack.c.bf16 %v1082_v6, %v1078_v40  ;;  %v6435_v43 = vld [vmem:[%s9637_s5 + $0x80] ss:$16 sps:$4 sm:$0xff]   ;;  %v6503_v40 = vld [vmem:[%s9637_s5 + $0x3c4] ss:$16 sps:$4 sm:$0xff]  }
 0x15a   : > { %v1085_v23 = vmax.f32 %v956_v47, 0.0  ;;  %v7553_v45 = vpack.c.bf16 %v1084_v15, %v1080_v58  ;;  %v6465_v39 = vld [vmem:[%s9637_s5 + $0x280] ss:$16 sps:$4 sm:$0xff]   ;;  %v6497_v47 = vld [vmem:[%s9637_s5 + $0x204] ss:$16 sps:$4 sm:$0xff]  }
 0x15b   : > { %v7547_v52 = vpack.c.bf16 %v1083_v53, %v1079_v46  ;;  %v6474_v25 = vld [vmem:[%s9637_s5 + $0x260] ss:$16 sps:$4 sm:$0xff]  }
 0x15c   : > { %v7551_v49 = vpack.c.bf16 %v1085_v23, %v1081_v63  ;;  %v6444_v35 = vld [vmem:[%s9637_s5 + $0x40] ss:$16 sps:$4 sm:$0xff]  }
 0x15d   : > { %2122 = vmatprep.mubr.bf16.mxu0 %v7547_v52  ;;  %v6483_v1 = vld [vmem:[%s9637_s5 + $0x240] ss:$16 sps:$4 sm:$0xff]  }
 0x15e   : > { %2315 = vmatprep.mubr.bf16.mxu1 %v7551_v49  ;;  %2123 = vmatmul.mubr.bf16.gmra.mxu0 %v7549_v54  ;;  %v6492_v6 = vld [vmem:[%s9637_s5 + $0x220] ss:$16 sps:$4 sm:$0xff]  }
 0x15f   : > { %2316 = vmatmul.mubr.bf16.gmra.mxu1 %v7553_v45  ;;  %2358 = vmatprep.mubr.bf16.mxu0 %v7055_v11  ;;  %v6449_v11 = vld [vmem:[%s9637_s5 + $0x2c4] ss:$16 sps:$4 sm:$0xff]   ;;  %v6453_v46 = vld [vmem:[%s9637_s5] ss:$16 sps:$4 sm:$0xff]  }
 0x160   : > { %2551 = vmatprep.mubr.bf16.mxu1 %v7062_v16  ;;  %v6429_v16 = vld [vmem:[%s9637_s5 + $0xc0] ss:$16 sps:$4 sm:$0xff]  }
 0x161   : > { %v6495_v15 = vld [vmem:[%s9637_s5 + $0x200] ss:$16 sps:$4 sm:$0xff]  }
 0x162   : > { %v6498_v53 = vld [vmem:[%s9637_s5 + $0x3e0] ss:$16 sps:$4 sm:$0xff]  }
 0x163   : > { %v6462_v63 = vld [vmem:[%s9637_s5 + $0x1c0] ss:$16 sps:$4 sm:$0xff]  }
 0x164   : > { %v6501_v23 = vld [vmem:[%s9637_s5 + $0x3c0] ss:$16 sps:$4 sm:$0xff]  }
 0x165   : > { %v6504_v58 = vld [vmem:[%s9637_s5 + $0x3a0] ss:$16 sps:$4 sm:$0xff]  }
 0x166   : > { %2359 = vmatmul.mubr.bf16.vlgmr.msra.gmra.mxu0 %v7060_v14  ;;  %v6434_v14 = vld [vmem:[%s9637_s5 + $0xa4] ss:$16 sps:$4 sm:$0xff]  }
 0x167   : > { %2552 = vmatmul.mubr.bf16.vlgmr.msra.gmra.mxu1 %v7070_v19  ;;  %2368 = vmatprep.mubr.bf16.mxu0 %v7099_v55  ;;  %v6458_v19 = vld [vmem:[%s9637_s5 + $0x2a4] ss:$16 sps:$4 sm:$0xff]   ;;  %v6432_v55 = vld [vmem:[%s9637_s5 + $0xa0] ss:$16 sps:$4 sm:$0xff]  }
 0x168   : > { %2561 = vmatprep.mubr.bf16.mxu1 %v7106_v59  ;;  %3695 = vmatpush1.bf16.msra.mxu0 %v6426_v48  ;;  %v6437_v59 = vld [vmem:[%s9637_s5 + $0x84] ss:$16 sps:$4 sm:$0xff]   ;;  %v6471_v48 = vld [vmem:[%s9637_s5 + $0x180] ss:$16 sps:$4 sm:$0xff]  }
 0x169   : > { %3696 = vmatprep.subr.bf16.mxu0 %v6431_v2  ;;  %3888 = vmatpush1.bf16.msra.mxu1 %v6438_v12  ;;  %v6479_v2 = vld [vmem:[%s9637_s5 + $0x164] ss:$16 sps:$4 sm:$0xff]   ;;  %v6480_v12 = vld [vmem:[%s9637_s5 + $0x140] ss:$16 sps:$4 sm:$0xff]  }
 0x16a   : > { %3889 = vmatprep.subr.bf16.mxu1 %v6449_v11  ;;  %v6488_v11 = vld [vmem:[%s9637_s5 + $0x124] ss:$16 sps:$4 sm:$0xff]  }
 0x16c   : > { %3697 = vmatpush1.bf16.msra.mxu0 %v6429_v16  ;;  %v6489_v16 = vld [vmem:[%s9637_s5 + $0x100] ss:$16 sps:$4 sm:$0xff]  }
 0x16d   : > { %3698 = vmatprep.subr.bf16.mxu0 %v6434_v14  ;;  %3890 = vmatpush1.bf16.msra.mxu1 %v6447_v0  ;;  %v6513_v14 = vld [vmem:[%s9637_s5 + $0x340] ss:$16 sps:$4 sm:$0xff]  }
 0x16e   : > { %2369 = vmatmul.mubr.bf16.gmra.mxu0 %v7104_v57  ;;  %3891 = vmatprep.subr.bf16.mxu1 %v6458_v19  ;;  %v6443_v57 = vld [vmem:[%s9637_s5 + $0x64] ss:$16 sps:$4 sm:$0xff]   ;;  %v9721_v19 = vld [vmem:[#allocation7_spill] sm:$0xff] }
 0x16f   : > { %2562 = vmatmul.mubr.bf16.gmra.mxu1 %v7114_v62  ;;  %2378 = vmatprep.mubr.bf16.mxu0 %v7143_v32  ;;  %v6476_v62 = vld [vmem:[%s9637_s5 + $0x264] ss:$16 sps:$4 sm:$0xff]   ;;  %v6441_v32 = vld [vmem:[%s9637_s5 + $0x60] ss:$16 sps:$4 sm:$0xff]  }
 0x170   : > { %2571 = vmatprep.mubr.bf16.mxu1 %v7150_v36  ;;  %3699 = vmatpush1.bf16.msra.mxu0 %v6432_v55  ;;  %v6446_v36 = vld [vmem:[%s9637_s5 + $0x44] ss:$16 sps:$4 sm:$0xff]   ;;  %v9722_v55 = vld [vmem:[#allocation9_spill] sm:$0xff] }
 0x171   : > { %3700 = vmatprep.subr.bf16.mxu0 %v6437_v59  ;;  %3892 = vmatpush1.bf16.msra.mxu1 %v6456_v50  ;;  %v9720_v0 = vld [vmem:[#allocation6_spill] sm:$0xff] }
 0x172   : > { %3893 = vmatprep.subr.bf16.mxu1 %v6467_v60  ;;  %v6516_v60 = vld [vmem:[%s9637_s5 + $0x320] ss:$16 sps:$4 sm:$0xff]  }
 0x174   : > { %3701 = vmatpush1.bf16.msra.mxu0 %v6435_v43 }
 0x175   : > { %3702 = vmatprep.subr.bf16.mxu0 %v6443_v57  ;;  %3894 = vmatpush1.bf16.msra.mxu1 %v6465_v39 }
 0x176   : > { %2379 = vmatmul.mubr.bf16.gmra.mxu0 %v7148_v34  ;;  %3895 = vmatprep.subr.bf16.mxu1 %v6476_v62  ;;  %v6452_v34 = vld [vmem:[%s9637_s5 + $0x24] ss:$16 sps:$4 sm:$0xff]  }
 0x177   : > { %2572 = vmatmul.mubr.bf16.gmra.mxu1 %v7158_v42  ;;  %2388 = vmatprep.mubr.bf16.mxu0 %v7187_v20  ;;  %v6494_v42 = vld [vmem:[%s9637_s5 + $0x224] ss:$16 sps:$4 sm:$0xff]   ;;  %v6450_v20 = vld [vmem:[%s9637_s5 + $0x20] ss:$16 sps:$4 sm:$0xff]  }
 0x178   : > { %2581 = vmatprep.mubr.bf16.mxu1 %v7194_v24  ;;  %3703 = vmatpush1.bf16.msra.mxu0 %v6441_v32  ;;  %v6455_v24 = vld [vmem:[%s9637_s5 + $0x4] ss:$16 sps:$4 sm:$0xff]  }
 0x179   : > { %3704 = vmatprep.subr.bf16.mxu0 %v6446_v36  ;;  %3896 = vmatpush1.bf16.msra.mxu1 %v6474_v25  ;;  %v9723_v36 = vld [vmem:[#allocation8_spill] sm:$0xff] }
 0x17a   : > { %3897 = vmatprep.subr.bf16.mxu1 %v6485_v56  ;;  %v9724_v56 = vld [vmem:[#allocation10_spill] sm:$0xff] }
 0x17c   : > { %3705 = vmatpush1.bf16.msra.mxu0 %v6444_v35  ;;  %v9725_v35 = vld [vmem:[#allocation11_spill] sm:$0xff] }
 0x17d   : > { %3706 = vmatprep.subr.bf16.mxu0 %v6452_v34  ;;  %3898 = vmatpush1.bf16.msra.mxu1 %v6483_v1  ;;  %v9726_v34 = vld [vmem:[#allocation13_spill] sm:$0xff] }
 0x17e   : > { %2389 = vmatmul.mubr.bf16.gmra.mxu0 %v7192_v22  ;;  %3899 = vmatprep.subr.bf16.mxu1 %v6494_v42  ;;  %v6461_v22 = vld [vmem:[%s9637_s5 + $0x1e4] ss:$16 sps:$4 sm:$0xff]  }
 0x17f   : > { %2582 = vmatmul.mubr.bf16.gmra.mxu1 %v7202_v27  ;;  %2398 = vmatprep.mubr.bf16.mxu0 %v7231_v7  ;;  %v6500_v27 = vld [vmem:[%s9637_s5 + $0x3e4] ss:$16 sps:$4 sm:$0xff]   ;;  %v6459_v7 = vld [vmem:[%s9637_s5 + $0x1e0] ss:$16 sps:$4 sm:$0xff]  }
 0x180   : > { %2591 = vmatprep.mubr.bf16.mxu1 %v7238_v13  ;;  %3707 = vmatpush1.bf16.msra.mxu0 %v6450_v20  ;;  %v6464_v13 = vld [vmem:[%s9637_s5 + $0x1c4] ss:$16 sps:$4 sm:$0xff]   ;;  %v6525_v20 = vld [vmem:[%s9637_s5 + $0x300] ss:$16 sps:$4 sm:$0xff]  }
 0x181   : > { %3708 = vmatprep.subr.bf16.mxu0 %v6455_v24  ;;  %3900 = vmatpush1.bf16.msra.mxu1 %v6492_v6  ;;  %v6527_v24 = vld [vmem:[%s9637_s5 + $0x304] ss:$16 sps:$4 sm:$0xff]  }
 0x182   : > { %3901 = vmatprep.subr.bf16.mxu1 %v6497_v47 }
 0x184   : > { %3709 = vmatpush1.bf16.msra.mxu0 %v6453_v46 }
 0x185   : > { %3710 = vmatprep.subr.bf16.mxu0 %v6461_v22  ;;  %3902 = vmatpush1.bf16.msra.mxu1 %v6495_v15 }
 0x186   : > { %2399 = vmatmul.mubr.bf16.gmra.mxu0 %v7236_v9  ;;  %3903 = vmatprep.subr.bf16.mxu1 %v6500_v27  ;;  %v6470_v9 = vld [vmem:[%s9637_s5 + $0x1a4] ss:$16 sps:$4 sm:$0xff]  }
 0x187   : > { %2592 = vmatmul.mubr.bf16.gmra.mxu1 %v7246_v18  ;;  %2408 = vmatprep.mubr.bf16.mxu0 %v7275_v3  ;;  %v6506_v18 = vld [vmem:[%s9637_s5 + $0x3a4] ss:$16 sps:$4 sm:$0xff]   ;;  %v6468_v3 = vld [vmem:[%s9637_s5 + $0x1a0] ss:$16 sps:$4 sm:$0xff]  }
 0x188   : > { %2601 = vmatprep.mubr.bf16.mxu1 %v7282_v8  ;;  %3711 = vmatpush2.bf16.msra.mxu0 %v6459_v7  ;;  %v6473_v8 = vld [vmem:[%s9637_s5 + $0x184] ss:$16 sps:$4 sm:$0xff]  }
 0x189   : > { %3712 = vmatprep.subr.bf16.mxu0 %v6464_v13  ;;  %3904 = vmatpush2.bf16.msra.mxu1 %v6498_v53  ;;  %v9727_v27 = vld [vmem:[#allocation12_spill] sm:$0xff]  ;;  %v9728_v13 = vld [vmem:[#allocation14_spill] sm:$0xff]  ;;  %v9729_v53 = vld [vmem:[#allocation15_spill] sm:$0xff] }
 0x18a   : > { %3905 = vmatprep.subr.bf16.mxu1 %v6503_v40  ;;  %v9730_v40 = vld [vmem:[#allocation17_spill] sm:$0xff] }
 0x18c   : > { %3713 = vmatpush2.bf16.msra.mxu0 %v6462_v63 }
 0x18d   : > { %3714 = vmatprep.subr.bf16.mxu0 %v6470_v9  ;;  %3906 = vmatpush2.bf16.msra.mxu1 %v6501_v23  ;;  %v6536_v23 = vld [vmem:[%s9637_s5 + $0x2ec] ss:$16 sps:$4 sm:$0xff]  }
 0x18e   : > { %2409 = vmatmul.mubr.bf16.gmra.mxu0 %v7280_v5  ;;  %3907 = vmatprep.subr.bf16.mxu1 %v6506_v18  ;;  %v6507_v5 = vld [vmem:[%s9637_s5 + $0x380] ss:$16 sps:$4 sm:$0xff]  }
 0x18f   : > { %2602 = vmatmul.mubr.bf16.gmra.mxu1 %v7290_v17  ;;  %2418 = vmatprep.mubr.bf16.mxu0 %v7319_v4  ;;  %v6509_v17 = vld [vmem:[%s9637_s5 + $0x384] ss:$16 sps:$4 sm:$0xff]   ;;  %v6477_v4 = vld [vmem:[%s9637_s5 + $0x160] ss:$16 sps:$4 sm:$0xff]  }
 0x190   : > { %2611 = vmatprep.mubr.bf16.mxu1 %v7326_v21  ;;  %3715 = vmatpush2.bf16.msra.mxu0 %v6468_v3  ;;  %v6482_v21 = vld [vmem:[%s9637_s5 + $0x144] ss:$16 sps:$4 sm:$0xff]  }
 0x191   : > { %3716 = vmatprep.subr.bf16.mxu0 %v6473_v8  ;;  %3908 = vmatpush2.bf16.msra.mxu1 %v6504_v58 }
 0x192   : > { %3909 = vmatprep.subr.bf16.mxu1 %v6509_v17  ;;  %v9732_v17 = vld [vmem:[#allocation18_spill] sm:$0xff] }
 0x194   : > { %3717 = vmatpush2.bf16.msra.mxu0 %v6471_v48 }
 0x195   : > { %3718 = vmatprep.subr.bf16.mxu0 %v6479_v2  ;;  %3910 = vmatpush2.bf16.msra.mxu1 %v6507_v5  ;;  %v9731_v2 = vld [vmem:[#allocation16_spill] sm:$0xff] }
 0x196   : > { %2419 = vmatmul.mubr.bf16.gmra.mxu0 %v7324_v10  ;;  %v6510_v10 = vld [vmem:[%s9637_s5 + $0x360] ss:$16 sps:$4 sm:$0xff]  }
 0x197   : > { %2612 = vmatmul.mubr.bf16.gmra.mxu1 %v7334_v26  ;;  %2428 = vmatprep.mubr.bf16.mxu0 %v7363_v29  ;;  %v6512_v26 = vld [vmem:[%s9637_s5 + $0x364] ss:$16 sps:$4 sm:$0xff]   ;;  %v6486_v29 = vld [vmem:[%s9637_s5 + $0x120] ss:$16 sps:$4 sm:$0xff]  }
 0x198   : > { %2621 = vmatprep.mubr.bf16.mxu1 %v7370_v37  ;;  %3719 = vmatpush2.bf16.msra.mxu0 %v6477_v4  ;;  %v6491_v37 = vld [vmem:[%s9637_s5 + $0x104] ss:$16 sps:$4 sm:$0xff]   ;;  %v9733_v4 = vld [vmem:[#allocation19_spill] sm:$0xff] }
 0x199   : > { %3720 = vmatprep.subr.bf16.mxu0 %v6482_v21  ;;  %3911 = vmatprep.subr.bf16.mxu1 %v6512_v26  ;;  %v9734_v21 = vld [vmem:[#allocation21_spill] sm:$0xff] }
 0x19a   : > { %3912 = vmatpush2.bf16.msra.mxu1 %v6510_v10 }
 0x19c   : > { %3721 = vmatpush2.bf16.msra.mxu0 %v6480_v12 }
 0x19d   : > { %3722 = vmatprep.subr.bf16.mxu0 %v6488_v11 }
 0x19e   : > { %2429 = vmatmul.mubr.bf16.gmra.mxu0 %v7368_v30  ;;  %v6515_v30 = vld [vmem:[%s9637_s5 + $0x344] ss:$16 sps:$4 sm:$0xff]  }
 0x19f   : > { %2622 = vmatmul.mubr.bf16.gmra.mxu1 %v7378_v38  ;;  %2438 = vmatprep.mubr.bf16.mxu0 %v7401_v41  ;;  %v6521_v41 = vld [vmem:[%s9637_s5 + $0xec] ss:$16 sps:$4 sm:$0xff]  }
 0x1a0   : > { %2631 = vmatprep.mubr.bf16.mxu1 %v7405_v61  ;;  %3723 = vmatpush2.bf16.msra.mxu0 %v6486_v29 }
 0x1a1   : > { %3724 = vmatprep.subr.bf16.mxu0 %v6491_v37  ;;  %3913 = vmatprep.subr.bf16.mxu1 %v6515_v30 }
 0x1a2   : > { %3914 = vmatpush2.bf16.msra.mxu1 %v6513_v14  ;;  %v9735_v14 = vld [vmem:[#allocation20_spill] sm:$0xff] }
 0x1a4   : > { %3725 = vmatpush2.bf16.msra.mxu0 %v6489_v16 }
 0x1a5   : > { %4080 = vmatprep.subr.bf16.mxu0 %v6521_v41  ;;  %v9736_v41 = vld [vmem:[#allocation22_spill] sm:$0xff] }
 0x1a6   : > { %v7770_v38 = vpop.f32.mrf.mxu0  ;;  %2439 = vmatmul.mubr.bf16.gmra.mxu0 %v7403_v33  ;;  %v6518_v33 = vld [vmem:[%s9637_s5 + $0x324] ss:$16 sps:$4 sm:$0xff]  }
 0x1a7   : > { %v7773_v61 = vpop.f32.mrf.mxu1  ;;  %2632 = vmatmul.mubr.bf16.gmra.mxu1 %v9720_v0  ;;  %2448 = vmatprep.mubr.bf16.mxu0 %v9721_v19  ;;  %v9737_v0 = vld [vmem:[#allocation23_spill] sm:$0xff]  ;;  %v9738_v19 = vld [vmem:[#allocation25_spill] sm:$0xff] }
 0x1a8   : > { %2641 = vmatprep.mubr.bf16.mxu1 %v9722_v55  ;;  %v7778_v59 = vpop.f32.mrf.mxu0  ;;  %3915 = vmatprep.subr.bf16.mxu1 %v6518_v33 }
 0x1a9   : > { %v7780_v50 = vpop.f32.mrf.mxu1  ;;  %3916 = vmatpush2.bf16.msra.mxu1 %v6516_v60 }
 0x1aa   : > { %v7788_v43 = vpop.f32.mrf.mxu0  ;;  %3917 = vmatprep.subr.bf16.mxu1 %v6527_v24  ;;  %v9740_v24 = vld [vmem:[#allocation24_spill] sm:$0xff] }
 0x1ab   : > { %v7790_v57 = vpop.f32.mrf.mxu1 }
 0x1ac   : > { %v7792_v39 = vpop.f32.mrf.mxu0 }
 0x1ad   : > { %v7794_v62 = vpop.f32.mrf.mxu1  ;;  %3918 = vmatpush2.bf16.msra.mxu1 %v6525_v20 }
 0x1ae   : > { %v7796_v32 = vpop.f32.mrf.mxu0  ;;  %2449 = vmatmul.mubr.bf16.gmra.mxu0 %v9723_v36  ;;  %4273 = vmatprep.subr.bf16.mxu1 %v6536_v23 }
 0x1af   : > { %v7799_v25 = vpop.f32.mrf.mxu1  ;;  %2642 = vmatmul.mubr.bf16.gmra.mxu1 %v9724_v56  ;;  %2458 = vmatprep.mubr.bf16.mxu0 %v9725_v35 }
 0x1b0   : > { %2651 = vmatprep.mubr.bf16.mxu1 %v9726_v34  ;;  %v7804_v1 = vpop.f32.mrf.mxu0  ;;  %v7888_v34 = vld [vmem:[%s9636_s4] sm:$0xf] }
 0x1b1   : > { %v7806_v42 = vpop.f32.mrf.mxu1  ;;  %9739 = vst [vmem:[#allocation6_spill] sm:$0xff] %v7888_v34 }
 0x1b2   : > { %v7814_v6 = vpop.f32.mrf.mxu0 }
 0x1b3   : > { %v7816_v47 = vpop.f32.mrf.mxu1 }
 0x1b4   : > { %v7818_v46 = vpop.f32.mrf.mxu0 }
 0x1b5   : > { %v7820_v22 = vpop.f32.mrf.mxu1 }
 0x1b6   : > { %v7822_v15 = vpop.f32.mrf.mxu0  ;;  %2459 = vmatmul.mubr.bf16.gmra.mxu0 %v9727_v27  ;;  %v9741_v27 = vld [vmem:[#allocation2_spill] sm:$0xff] }
 0x1b7   : > { %v7825_v7 = vpop.f32.mrf.mxu1  ;;  %2652 = vmatmul.mubr.bf16.gmra.mxu1 %v9728_v13  ;;  %2468 = vmatprep.mubr.bf16.mxu0 %v9729_v53  ;;  %v7895_v13 = vrot.slane %v7888_v34, %v9741_v27 }
 0x1b8   : > { %2661 = vmatprep.mubr.bf16.mxu1 %v9730_v40  ;;  %v7830_v63 = vpop.f32.mrf.mxu0  ;;  %v9742_v40 = vld [vmem:[#allocation26_spill] sm:$0xff] }
 0x1b9   : > { %v7832_v9 = vpop.f32.mrf.mxu1 }
 0x1ba   : > { %v7837_v18 = vpop.f32.mrf.mxu0 }
 0x1bb   : > { %v7839_v3 = vpop.f32.mrf.mxu1 }
 0x1bc   : > { %v7841_v8 = vpop.f32.mrf.mxu0 }
 0x1bd   : > { %v7843_v58 = vpop.f32.mrf.mxu1 }
 0x1be   : > { %v7845_v48 = vpop.f32.mrf.mxu0  ;;  %2469 = vmatmul.mubr.bf16.gmra.mxu0 %v9731_v2  ;;  %v1981_v2 = vadd.f32 %v7792_v39, %v7895_v13 }
 0x1bf   : > { %v7848_v5 = vpop.f32.mrf.mxu1  ;;  %2662 = vmatmul.mubr.bf16.gmra.mxu1 %v9732_v17  ;;  %2478 = vmatprep.mubr.bf16.mxu0 %v9733_v4 }
 0x1c0   : > { %2671 = vmatprep.mubr.bf16.mxu1 %v9734_v21  ;;  %v7853_v12 = vpop.f32.mrf.mxu0  ;;  %v1977_v21 = vadd.f32 %v7778_v59, %v7895_v13 }
 0x1c1   : > { %v7855_v11 = vpop.f32.mrf.mxu1 }
 0x1c2   : > { %v7857_v10 = vpop.f32.mrf.mxu0 }
 0x1c3   : > { %v7859_v26 = vpop.f32.mrf.mxu1 }
 0x1c4   : > { %v7861_v29 = vpop.f32.mrf.mxu0 }
 0x1c5   : > { %v7863_v37 = vpop.f32.mrf.mxu1 }
 0x1c6   : > { %v7865_v16 = vpop.f32.mrf.mxu0  ;;  %2479 = vmatmul.mubr.bf16.gmra.mxu0 %v9735_v14 }
 0x1c7   : > { %v7868_v30 = vpop.f32.mrf.mxu1  ;;  %2672 = vmatmul.mubr.bf16.gmra.mxu1 %v9736_v41  ;;  %2488 = vmatprep.mubr.bf16.mxu0 %v9737_v0 }
 0x1c8   : > { %2681 = vmatprep.mubr.bf16.mxu1 %v9738_v19  ;;  %v7873_v55 = vpop.f32.mrf.mxu0 }
 0x1c9   : > { %v7875_v60 = vpop.f32.mrf.mxu1 }
 0x1ca   : > { %v7877_v33 = vpop.f32.mrf.mxu0 }
 0x1cb   : > { %v7879_v36 = vpop.f32.mrf.mxu1 }
 0x1cc   : > { %v7881_v56 = vpop.f32.mrf.mxu0 }
 0x1cd   : > { %v7883_v35 = vpop.f32.mrf.mxu1 }
 0x1ce   : > { %v7890_v20 = vpop.f32.mrf.mxu0  ;;  %2489 = vmatmul.mubr.bf16.gmra.mxu0 %v9740_v24  ;;  %v2170_v24 = vadd.f32 %v7780_v50, %v1977_v21 }
 0x1cf   : > { %v7897_v53 = vpop.f32.mrf.mxu1  ;;  %2682 = vmatmul.mubr.bf16.gmra.mxu1 %v9742_v40  ;;  %2498 = vmatprep.mubr.bf16.mxu0 %v7527_v44  ;;  %v2174_v44 = vadd.f32 %v7794_v62, %v1981_v2 }
 0x1d0   : > { %2691 = vmatprep.mubr.bf16.mxu1 %v7531_v28  ;;  %v7902_v23 = vpop.f32.mrf.mxu0  ;;  %v9743_v28 = vld [vmem:[#allocation3_spill] sm:$0xff] }
 0x1d1   : > { %v7906_v17 = vpop.f32.mrf.mxu1  ;;  %v7921_v19 = vrot.slane %v7888_v34, %v9743_v28  ;;  %v2717_v2 = vmax.f32 %v2174_v44, 0.0  ;;  %v1991_v28 = vadd.f32 %v7818_v46, %v7895_v13 }
 0x1d2   : > { %v7908_v4 = vpop.f32.mrf.mxu0 }
 0x1d3   : > { %v7912_v14 = vpop.f32.mrf.mxu1  ;;  %v1979_v59 = vadd.f32 %v7788_v43, %v7921_v19  ;;  %v1975_v50 = vadd.f32 %v7770_v38, %v7921_v19  ;;  %v2184_v44 = vadd.f32 %v7820_v22, %v1991_v28  ;;  %v1989_v22 = vadd.f32 %v7814_v6, %v7921_v19  ;;  %v6519_v6 = vld [vmem:[%s9637_s5 + $0xe8] ss:$16 sps:$4 sm:$0xff]  }
 0x1d4   : > { %v7914_v41 = vpop.f32.mrf.mxu0 }
 0x1d5   : > { %v7917_v0 = vpop.f32.mrf.mxu1  ;;  %v2168_v38 = vadd.f32 %v7773_v61, %v1975_v50  ;;  %v2001_v61 = vadd.f32 %v7841_v8, %v7895_v13  ;;  %v2182_v8 = vadd.f32 %v7816_v47, %v1989_v22 }
 0x1d6   : > { %v7923_v39 = vpop.f32.mrf.mxu0  ;;  %2499 = vmatmul.mubr.bf16.gmra.mxu0 %v7529_v51 }
 0x1d7   : > { %v7927_v40 = vpop.f32.mrf.mxu1  ;;  %2692 = vmatmul.mubr.bf16.gmra.mxu1 %v7533_v31  ;;  %2508 = vmatprep.mubr.bf16.mxu0 %v7547_v52  ;;  %v2713_v31 = vmax.f32 %v2170_v24, 0.0  ;;  %v1987_v52 = vadd.f32 %v7804_v1, %v7895_v13  ;;  %v2724_v22 = vmax.f32 %v2182_v8, 0.0  ;;  %v2007_v8 = vadd.f32 %v7853_v12, %v7895_v13 }
 0x1d8   : > { %9744 = vst [vmem:[#allocation7_spill] sm:$0xff] %v7927_v40  ;;  %2701 = vmatprep.mubr.bf16.mxu1 %v7551_v49  ;;  %v7934_v62 = vpop.f32.mrf.mxu0  ;;  %v2172_v49 = vadd.f32 %v7790_v57, %v1979_v59  ;;  %v2725_v59 = vmax.f32 %v2184_v44, 0.0 }
 0x1d9   : > { %v7938_v51 = vpop.f32.mrf.mxu1  ;;  %v7954_v34 = vpack.c.bf16 %v2717_v2, %v2713_v31  ;;  %v2180_v1 = vadd.f32 %v7806_v42, %v1987_v52  ;;  %v1985_v42 = vadd.f32 %v7796_v32, %v7921_v19  ;;  %v1997_v31 = vadd.f32 %v7830_v63, %v7895_v13  ;;  %v6524_v32 = vld [vmem:[%s9637_s5 + $0xcc] ss:$16 sps:$4 sm:$0xff]  }
 0x1da   : > { %v7942_v21 = vpop.f32.mrf.mxu0  ;;  %v2716_v57 = vmax.f32 %v2172_v49, 0.0 }
 0x1db   : > { %v7946_v43 = vpop.f32.mrf.mxu1  ;;  %9745 = vst [vmem:[#allocation9_spill] sm:$0xff] %v7954_v34  ;;  %v2190_v47 = vadd.f32 %v7832_v9, %v1997_v31  ;;  %v6530_v9 = vld [vmem:[%s9637_s5 + $0xac] ss:$16 sps:$4 sm:$0xff]   ;;  %v1995_v31 = vadd.f32 %v7822_v15, %v7921_v19 }
 0x1dc   : > { %v7949_v27 = vpop.f32.mrf.mxu0  ;;  %v6533_v15 = vld [vmem:[%s9637_s5 + $0x8c] ss:$16 sps:$4 sm:$0xff]  }
 0x1dd   : > { %v7952_v46 = vpop.f32.mrf.mxu1 }
 0x1de   : > { %v7957_v40 = vpop.f32.mrf.mxu0  ;;  %2509 = vmatmul.mubr.bf16.gmra.mxu0 %v7549_v54  ;;  %v2712_v54 = vmax.f32 %v2168_v38, 0.0  ;;  %v2194_v38 = vadd.f32 %v7843_v58, %v2001_v61  ;;  %v6522_v58 = vld [vmem:[%s9637_s5 + $0xc8] ss:$16 sps:$4 sm:$0xff]  }
 0x1df   : > { %v7961_v24 = vpop.f32.mrf.mxu1  ;;  %2702 = vmatmul.mubr.bf16.gmra.mxu1 %v7553_v45  ;;  %3726 = vmatprep.mubr.bf16.mxu0 %v7954_v34  ;;  %v2721_v45 = vmax.f32 %v2180_v1, 0.0  ;;  %v2178_v34 = vadd.f32 %v7799_v25, %v1985_v42 }
 0x1e0   : > { %9746 = vst [vmem:[#allocation8_spill] sm:$0xff] %v7961_v24  ;;  %v7967_v28 = vpop.f32.mrf.mxu0  ;;  %v7984_v49 = vpack.c.bf16 %v2716_v57, %v2712_v54  ;;  %v2733_v61 = vmax.f32 %v2194_v38, 0.0  ;;  %v2011_v54 = vadd.f32 %v7861_v29, %v7895_v13  ;;  %v6528_v38 = vld [vmem:[%s9637_s5 + $0xa8] ss:$16 sps:$4 sm:$0xff]  }
 0x1e1   : > { %v7971_v2 = vpop.f32.mrf.mxu1  ;;  %v7995_v63 = vpack.c.bf16 %v2725_v59, %v2721_v45  ;;  %v1999_v59 = vadd.f32 %v7837_v18, %v7921_v19  ;;  %v2720_v45 = vmax.f32 %v2178_v34, 0.0  ;;  %v2729_v18 = vmax.f32 %v2190_v47, 0.0 }
 0x1e2   : > { %v7975_v50 = vpop.f32.mrf.mxu0  ;;  %9747 = vst [vmem:[#allocation10_spill] sm:$0xff] %v7984_v49  ;;  %v2204_v12 = vadd.f32 %v7863_v37, %v2011_v54  ;;  %v6531_v37 = vld [vmem:[%s9637_s5 + $0x88] ss:$16 sps:$4 sm:$0xff]   ;;  %v2021_v54 = vadd.f32 %v7881_v56, %v7895_v13 }
 0x1e3   : > { %v7979_v52 = vpop.f32.mrf.mxu1  ;;  %9748 = vst [vmem:[#allocation11_spill] sm:$0xff] %v7995_v63  ;;  %v8030_v29 = vpack.c.bf16 %v2724_v22, %v2720_v45  ;;  %v2192_v34 = vadd.f32 %v7839_v3, %v1999_v59  ;;  %v2200_v3 = vadd.f32 %v7855_v11, %v2007_v8  ;;  %v6539_v11 = vld [vmem:[%s9637_s5 + $0x6c] ss:$16 sps:$4 sm:$0xff]  }
 0x1e4   : > { %v7987_v44 = vpop.f32.mrf.mxu0 }
 0x1e5   : > { %v7993_v1 = vpop.f32.mrf.mxu1  ;;  %9750 = vst [vmem:[#allocation12_spill] sm:$0xff] %v8030_v29  ;;  %v2732_v59 = vmax.f32 %v2192_v34, 0.0 }
 0x1e6   : > { %v7998_v24 = vpop.f32.mrf.mxu0  ;;  %3727 = vmatmul.mubr.bf16.vlgmr.msra.gmra.mxu0 %v7984_v49  ;;  %v2188_v49 = vadd.f32 %v7825_v7, %v1995_v31 }
 0x1e7   : > { %v8002_v57 = vpop.f32.mrf.mxu1  ;;  %3736 = vmatprep.mubr.bf16.mxu0 %v7995_v63  ;;  %4081 = vmatpush1.bf16.msra.mxu0 %v6519_v6 }
 0x1e8   : > { %9749 = vst [vmem:[#allocation13_spill] sm:$0xff] %v8002_v57  ;;  %v8010_v25 = vpop.f32.mrf.mxu0  ;;  %4082 = vmatprep.subr.bf16.mxu0 %v6524_v32  ;;  %v2728_v31 = vmax.f32 %v2188_v49, 0.0 }
 0x1e9   : > { %v8017_v42 = vpop.f32.mrf.mxu1 }
 0x1ea   : > { %v8021_v6 = vpop.f32.mrf.mxu0  ;;  %v8076_v56 = vpack.c.bf16 %v2732_v59, %v2728_v31 }
 0x1eb   : > { %v8025_v32 = vpop.f32.mrf.mxu1  ;;  %4083 = vmatpush1.bf16.msra.mxu0 %v6522_v58  ;;  %v8041_v58 = vpack.c.bf16 %v2733_v61, %v2729_v18  ;;  %v2741_v61 = vmax.f32 %v2204_v12, 0.0  ;;  %v2005_v18 = vadd.f32 %v7845_v48, %v7921_v19  ;;  %v6542_v48 = vld [vmem:[%s9637_s5 + $0x4c] ss:$16 sps:$4 sm:$0xff]  }
 0x1ec   : > { %v8033_v63 = vpop.f32.mrf.mxu0  ;;  %4084 = vmatprep.subr.bf16.mxu0 %v6530_v9  ;;  %v2009_v9 = vadd.f32 %v7857_v10, %v7921_v19  ;;  %v2737_v10 = vmax.f32 %v2200_v3, 0.0  ;;  %9752 = vst [vmem:[#allocation15_spill] sm:$0xff] %v8076_v56 }
 0x1ed   : > { %v8039_v47 = vpop.f32.mrf.mxu1  ;;  %9751 = vst [vmem:[#allocation14_spill] sm:$0xff] %v8041_v58 }
 0x1ee   : > { %v8044_v57 = vpop.f32.mrf.mxu0  ;;  %3737 = vmatmul.mubr.bf16.gmra.mxu0 %v8030_v29  ;;  %v2202_v49 = vadd.f32 %v7859_v26, %v2009_v9 }
 0x1ef   : > { %v8048_v22 = vpop.f32.mrf.mxu1  ;;  %3746 = vmatprep.mubr.bf16.mxu0 %v8041_v58  ;;  %4085 = vmatpush1.bf16.msra.mxu0 %v6528_v38  ;;  %v2017_v38 = vadd.f32 %v7873_v55, %v7895_v13  ;;  %v2214_v55 = vadd.f32 %v7883_v35, %v2021_v54  ;;  %v2198_v58 = vadd.f32 %v7848_v5, %v2005_v18  ;;  %v6540_v35 = vld [vmem:[%s9637_s5 + $0x48] ss:$16 sps:$4 sm:$0xff]  }
 0x1f0   : > { %v8056_v7 = vpop.f32.mrf.mxu0  ;;  %4086 = vmatprep.subr.bf16.mxu0 %v6533_v15  ;;  %v6537_v15 = vld [vmem:[%s9637_s5 + $0x68] ss:$16 sps:$4 sm:$0xff]   ;;  %v2740_v9 = vmax.f32 %v2202_v49, 0.0  ;;  %v2031_v54 = vadd.f32 %v7914_v41, %v7895_v13 }
 0x1f1   : > { %v8063_v45 = vpop.f32.mrf.mxu1  ;;  %v2210_v26 = vadd.f32 %v7875_v60, %v2017_v38  ;;  %v6548_v60 = vld [vmem:[%s9637_s5 + $0x2c] ss:$16 sps:$4 sm:$0xff]   ;;  %v2736_v18 = vmax.f32 %v2198_v58, 0.0 }
 0x1f2   : > { %v8067_v8 = vpop.f32.mrf.mxu0 }
 0x1f3   : > { %v8071_v34 = vpop.f32.mrf.mxu1  ;;  %4087 = vmatpush1.bf16.msra.mxu0 %v6531_v37  ;;  %v8087_v37 = vpack.c.bf16 %v2741_v61, %v2737_v10  ;;  %v2749_v61 = vmax.f32 %v2214_v55, 0.0  ;;  %v2015_v10 = vadd.f32 %v7865_v16, %v7921_v19  ;;  %v8122_v41 = vpack.c.bf16 %v2740_v9, %v2736_v18  ;;  %v6551_v16 = vld [vmem:[%s9637_s5 + $0xc] ss:$16 sps:$4 sm:$0xff]  }
 0x1f4   : > { %v8079_v12 = vpop.f32.mrf.mxu0  ;;  %4088 = vmatprep.subr.bf16.mxu0 %v6539_v11  ;;  %v2019_v11 = vadd.f32 %v7877_v33, %v7921_v19  ;;  %v2745_v33 = vmax.f32 %v2210_v26, 0.0 }
 0x1f5   : > { %v8085_v3 = vpop.f32.mrf.mxu1  ;;  %9753 = vst [vmem:[#allocation17_spill] sm:$0xff] %v8087_v37  ;;  %9754 = vst [vmem:[#allocation16_spill] sm:$0xff] %v8122_v41 }
 0x1f6   : > { %v8090_v29 = vpop.f32.mrf.mxu0  ;;  %3747 = vmatmul.mubr.bf16.gmra.mxu0 %v8076_v56  ;;  %v2212_v58 = vadd.f32 %v7879_v36, %v2019_v11 }
 0x1f7   : > { %v8094_v59 = vpop.f32.mrf.mxu1  ;;  %3756 = vmatprep.mubr.bf16.mxu0 %v8087_v37  ;;  %4089 = vmatpush1.bf16.msra.mxu0 %v6537_v15  ;;  %v2027_v15 = vadd.f32 %v7902_v23, %v7895_v13  ;;  %v2224_v23 = vadd.f32 %v7917_v0, %v2031_v54  ;;  %v2208_v37 = vadd.f32 %v7868_v30, %v2015_v10  ;;  %v6549_v0 = vld [vmem:[%s9637_s5 + $0x8] ss:$16 sps:$4 sm:$0xff]  }
 0x1f8   : > { %v8102_v5 = vpop.f32.mrf.mxu0  ;;  %4090 = vmatprep.subr.bf16.mxu0 %v6542_v48  ;;  %v6546_v48 = vld [vmem:[%s9637_s5 + $0x28] ss:$16 sps:$4 sm:$0xff]   ;;  %v2748_v11 = vmax.f32 %v2212_v58, 0.0  ;;  %v2041_v54 = vadd.f32 %v7949_v27, %v7895_v13 }
 0x1f9   : > { %v8109_v31 = vpop.f32.mrf.mxu1  ;;  %v2220_v36 = vadd.f32 %v7906_v17, %v2027_v15  ;;  %v6557_v17 = vld [vmem:[%s9637_s5 + $0x1ec] ss:$16 sps:$4 sm:$0xff]   ;;  %v2744_v10 = vmax.f32 %v2208_v37, 0.0 }
 0x1fa   : > { %v8113_v38 = vpop.f32.mrf.mxu0 }
 0x1fb   : > { %v8117_v49 = vpop.f32.mrf.mxu1  ;;  %4091 = vmatpush1.bf16.msra.mxu0 %v6540_v35  ;;  %v8133_v35 = vpack.c.bf16 %v2749_v61, %v2745_v33  ;;  %v2757_v61 = vmax.f32 %v2224_v23, 0.0  ;;  %v2025_v33 = vadd.f32 %v7890_v20, %v7921_v19  ;;  %v8168_v27 = vpack.c.bf16 %v2748_v11, %v2744_v10  ;;  %v6560_v20 = vld [vmem:[%s9637_s5 + $0x1cc] ss:$16 sps:$4 sm:$0xff]  }
 0x1fc   : > { %v8125_v55 = vpop.f32.mrf.mxu0  ;;  %4092 = vmatprep.subr.bf16.mxu0 %v6548_v60  ;;  %v2029_v60 = vadd.f32 %v7908_v4, %v7921_v19  ;;  %v2753_v4 = vmax.f32 %v2220_v36, 0.0 }
 0x1fd   : > { %v8131_v26 = vpop.f32.mrf.mxu1  ;;  %9755 = vst [vmem:[#allocation18_spill] sm:$0xff] %v8133_v35  ;;  %9756 = vst [vmem:[#allocation19_spill] sm:$0xff] %v8168_v27 }
 0x1fe   : > { %v8136_v56 = vpop.f32.mrf.mxu0  ;;  %3757 = vmatmul.mubr.bf16.gmra.mxu0 %v8122_v41  ;;  %v2222_v37 = vadd.f32 %v7912_v14, %v2029_v60 }
 0x1ff   : > { %v8140_v9 = vpop.f32.mrf.mxu1  ;;  %3766 = vmatprep.mubr.bf16.mxu0 %v8133_v35  ;;  %4093 = vmatpush1.bf16.msra.mxu0 %v6546_v48  ;;  %v2037_v48 = vadd.f32 %v7934_v62, %v7895_v13  ;;  %v2234_v62 = vadd.f32 %v7952_v46, %v2041_v54  ;;  %v2218_v35 = vadd.f32 %v7897_v53, %v2025_v33  ;;  %v6558_v46 = vld [vmem:[%s9637_s5 + $0x1c8] ss:$16 sps:$4 sm:$0xff]  }
 0x200   : > { %v8148_v30 = vpop.f32.mrf.mxu0  ;;  %4094 = vmatprep.subr.bf16.mxu0 %v6551_v16  ;;  %v6555_v16 = vld [vmem:[%s9637_s5 + $0x1e8] ss:$16 sps:$4 sm:$0xff]   ;;  %v2756_v60 = vmax.f32 %v2222_v37, 0.0  ;;  %v2051_v54 = vadd.f32 %v7987_v44, %v7895_v13 }
 0x201   : > { %v8155_v18 = vpop.f32.mrf.mxu1  ;;  %v2230_v14 = vadd.f32 %v7938_v51, %v2037_v48  ;;  %v6566_v51 = vld [vmem:[%s9637_s5 + $0x1ac] ss:$16 sps:$4 sm:$0xff]   ;;  %v2752_v33 = vmax.f32 %v2218_v35, 0.0 }
 0x202   : > { %v8159_v15 = vpop.f32.mrf.mxu0 }
 0x203   : > { %v8163_v58 = vpop.f32.mrf.mxu1  ;;  %4095 = vmatpush1.bf16.msra.mxu0 %v6549_v0  ;;  %v8179_v0 = vpack.c.bf16 %v2757_v61, %v2753_v4  ;;  %v2765_v61 = vmax.f32 %v2234_v62, 0.0  ;;  %v2035_v4 = vadd.f32 %v7923_v39, %v7921_v19  ;;  %v8214_v44 = vpack.c.bf16 %v2756_v60, %v2752_v33  ;;  %v6569_v39 = vld [vmem:[%s9637_s5 + $0x18c] ss:$16 sps:$4 sm:$0xff]  }
 0x204   : > { %v8171_v23 = vpop.f32.mrf.mxu0  ;;  %4096 = vmatprep.subr.bf16.mxu0 %v6557_v17  ;;  %v2039_v17 = vadd.f32 %v7942_v21, %v7921_v19  ;;  %v2761_v21 = vmax.f32 %v2230_v14, 0.0 }
 0x205   : > { %v8177_v36 = vpop.f32.mrf.mxu1  ;;  %9757 = vst [vmem:[#allocation21_spill] sm:$0xff] %v8179_v0  ;;  %9759 = vst [vmem:[#allocation22_spill] sm:$0xff] %v8214_v44 }
 0x206   : > { %v8182_v41 = vpop.f32.mrf.mxu0  ;;  %3767 = vmatmul.mubr.bf16.gmra.mxu0 %v8168_v27  ;;  %v2232_v35 = vadd.f32 %v7946_v43, %v2039_v17 }
 0x207   : > { %v8186_v11 = vpop.f32.mrf.mxu1  ;;  %3776 = vmatprep.mubr.bf16.mxu0 %v8179_v0  ;;  %4097 = vmatpush2.bf16.msra.mxu0 %v6555_v16  ;;  %v2047_v16 = vadd.f32 %v7967_v28, %v7895_v13  ;;  %v2244_v28 = vadd.f32 %v7993_v1, %v2051_v54  ;;  %v9761_v0 = vld [vmem:[#allocation7_spill] sm:$0xff]  ;;  %v2061_v54 = vadd.f32 %v8033_v63, %v7895_v13 }
 0x208   : > { %9758 = vst [vmem:[#allocation20_spill] sm:$0xff] %v8186_v11  ;;  %v8194_v53 = vpop.f32.mrf.mxu0  ;;  %4098 = vmatprep.subr.bf16.mxu0 %v6560_v20  ;;  %v6564_v20 = vld [vmem:[%s9637_s5 + $0x1a8] ss:$16 sps:$4 sm:$0xff]   ;;  %v2228_v27 = vadd.f32 %v9761_v0, %v2035_v4  ;;  %v2764_v17 = vmax.f32 %v2232_v35, 0.0 }
 0x209   : > { %v8201_v10 = vpop.f32.mrf.mxu1  ;;  %v2240_v43 = vadd.f32 %v7971_v2, %v2047_v16  ;;  %v6567_v1 = vld [vmem:[%s9637_s5 + $0x188] ss:$16 sps:$4 sm:$0xff]   ;;  %v6575_v2 = vld [vmem:[%s9637_s5 + $0x16c] ss:$16 sps:$4 sm:$0xff]  }
 0x20a   : > { %v8205_v48 = vpop.f32.mrf.mxu0  ;;  %v2760_v4 = vmax.f32 %v2228_v27, 0.0 }
 0x20b   : > { %v8209_v37 = vpop.f32.mrf.mxu1  ;;  %4099 = vmatpush2.bf16.msra.mxu0 %v6558_v46  ;;  %v8225_v46 = vpack.c.bf16 %v2765_v61, %v2761_v21  ;;  %v2773_v61 = vmax.f32 %v2244_v28, 0.0  ;;  %v2045_v21 = vadd.f32 %v7957_v40, %v7921_v19  ;;  %v6578_v40 = vld [vmem:[%s9637_s5 + $0x14c] ss:$16 sps:$4 sm:$0xff]  }
 0x20c   : > { %v8217_v62 = vpop.f32.mrf.mxu0  ;;  %4100 = vmatprep.subr.bf16.mxu0 %v6566_v51  ;;  %v2049_v51 = vadd.f32 %v7975_v50, %v7921_v19  ;;  %v2769_v50 = vmax.f32 %v2240_v43, 0.0  ;;  %v8260_v63 = vpack.c.bf16 %v2764_v17, %v2760_v4 }
 0x20d   : > { %v8223_v14 = vpop.f32.mrf.mxu1  ;;  %9760 = vst [vmem:[#allocation23_spill] sm:$0xff] %v8225_v46 }
 0x20e   : > { %v8228_v11 = vpop.f32.mrf.mxu0  ;;  %3777 = vmatmul.mubr.bf16.gmra.mxu0 %v8214_v44  ;;  %9763 = vst [vmem:[#allocation24_spill] sm:$0xff] %v8260_v63  ;;  %v2242_v27 = vadd.f32 %v7979_v52, %v2049_v51 }
 0x20f   : > { %v8232_v60 = vpop.f32.mrf.mxu1  ;;  %3786 = vmatprep.mubr.bf16.mxu0 %v8225_v46  ;;  %4101 = vmatpush2.bf16.msra.mxu0 %v6564_v20  ;;  %v2057_v20 = vadd.f32 %v8010_v25, %v7895_v13  ;;  %v2254_v25 = vadd.f32 %v8039_v47, %v2061_v54  ;;  %v9765_v46 = vld [vmem:[#allocation8_spill] sm:$0xff]  ;;  %v6576_v47 = vld [vmem:[%s9637_s5 + $0x148] ss:$16 sps:$4 sm:$0xff]   ;;  %v2071_v54 = vadd.f32 %v8079_v12, %v7895_v13 }
 0x210   : > { %v8240_v0 = vpop.f32.mrf.mxu0  ;;  %4102 = vmatprep.subr.bf16.mxu0 %v6569_v39  ;;  %v6573_v39 = vld [vmem:[%s9637_s5 + $0x168] ss:$16 sps:$4 sm:$0xff]   ;;  %v2238_v44 = vadd.f32 %v9765_v46, %v2045_v21  ;;  %v2772_v51 = vmax.f32 %v2242_v27, 0.0 }
 0x211   : > { %v8247_v33 = vpop.f32.mrf.mxu1  ;;  %v2250_v52 = vadd.f32 %v8017_v42, %v2057_v20  ;;  %v6584_v42 = vld [vmem:[%s9637_s5 + $0x12c] ss:$16 sps:$4 sm:$0xff]  }
 0x212   : > { %v8251_v16 = vpop.f32.mrf.mxu0  ;;  %v2768_v21 = vmax.f32 %v2238_v44, 0.0 }
 0x213   : > { %v8255_v35 = vpop.f32.mrf.mxu1  ;;  %4103 = vmatpush2.bf16.msra.mxu0 %v6567_v1  ;;  %v8271_v1 = vpack.c.bf16 %v2773_v61, %v2769_v50  ;;  %v2781_v61 = vmax.f32 %v2254_v25, 0.0  ;;  %v2055_v50 = vadd.f32 %v7998_v24, %v7921_v19  ;;  %v6587_v24 = vld [vmem:[%s9637_s5 + $0x10c] ss:$16 sps:$4 sm:$0xff]  }
 0x214   : > { %9762 = vst [vmem:[#allocation25_spill] sm:$0xff] %v8255_v35  ;;  %v8263_v28 = vpop.f32.mrf.mxu0  ;;  %4104 = vmatprep.subr.bf16.mxu0 %v6575_v2  ;;  %v2059_v2 = vadd.f32 %v8021_v6, %v7921_v19  ;;  %v2777_v6 = vmax.f32 %v2250_v52, 0.0  ;;  %v8306_v12 = vpack.c.bf16 %v2772_v51, %v2768_v21 }
 0x215   : > { %v8269_v43 = vpop.f32.mrf.mxu1  ;;  %9764 = vst [vmem:[#allocation26_spill] sm:$0xff] %v8271_v1 }
 0x216   : > { %v8274_v35 = vpop.f32.mrf.mxu0  ;;  %3787 = vmatmul.mubr.bf16.gmra.mxu0 %v8260_v63  ;;  %9767 = vst [vmem:[#allocation8_spill] sm:$0xff] %v8306_v12  ;;  %v2252_v44 = vadd.f32 %v8025_v32, %v2059_v2 }
 0x217   : > { %v8278_v17 = vpop.f32.mrf.mxu1  ;;  %3796 = vmatprep.mubr.bf16.mxu0 %v8271_v1  ;;  %4105 = vmatpush2.bf16.msra.mxu0 %v6573_v39  ;;  %v2067_v39 = vadd.f32 %v8056_v7, %v7895_v13  ;;  %v2264_v7 = vadd.f32 %v8085_v3, %v2071_v54  ;;  %v9769_v1 = vld [vmem:[#allocation13_spill] sm:$0xff] }
 0x218   : > { %9766 = vst [vmem:[#allocation7_spill] sm:$0xff] %v8278_v17  ;;  %v8286_v46 = vpop.f32.mrf.mxu0  ;;  %4106 = vmatprep.subr.bf16.mxu0 %v6578_v40  ;;  %v6582_v40 = vld [vmem:[%s9637_s5 + $0x128] ss:$16 sps:$4 sm:$0xff]   ;;  %v2248_v63 = vadd.f32 %v9769_v1, %v2055_v50  ;;  %v2780_v2 = vmax.f32 %v2252_v44, 0.0  ;;  %v2081_v1 = vadd.f32 %v8125_v55, %v7895_v13  ;;  %v2065_v50 = vadd.f32 %v8044_v57, %v7921_v19 }
 0x219   : > { %v8293_v4 = vpop.f32.mrf.mxu1  ;;  %v2260_v32 = vadd.f32 %v8063_v45, %v2067_v39  ;;  %v6585_v3 = vld [vmem:[%s9637_s5 + $0x108] ss:$16 sps:$4 sm:$0xff]   ;;  %v2789_v45 = vmax.f32 %v2264_v7, 0.0 }
 0x21a   : > { %v8297_v20 = vpop.f32.mrf.mxu0  ;;  %v2776_v21 = vmax.f32 %v2248_v63, 0.0 }
 0x21b   : > { %v8301_v27 = vpop.f32.mrf.mxu1  ;;  %4107 = vmatpush2.bf16.msra.mxu0 %v6576_v47  ;;  %v8317_v47 = vpack.c.bf16 %v2781_v61, %v2777_v6  ;;  %v2077_v6 = vadd.f32 %v8102_v5, %v7895_v13  ;;  %v9777_v5 = vld [vmem:[#allocation6_spill] sm:$0xff] }
 0x21c   : > { %v8309_v25 = vpop.f32.mrf.mxu0  ;;  %4108 = vmatprep.subr.bf16.mxu0 %v6584_v42  ;;  %v2069_v42 = vadd.f32 %v8067_v8, %v7921_v19  ;;  %v8346_v55 = vpack.c.bf16 %v2780_v2, %v2776_v21  ;;  %v9778_v2 = vld [vmem:[#allocation5_spill] sm:$0xff] }
 0x21d   : > { %v8315_v52 = vpop.f32.mrf.mxu1  ;;  %9768 = vst [vmem:[#allocation27_spill] sm:$0xff] %v8317_v47  ;;  %v8364_v21 = vrot.slane %v9777_v5, %v9778_v2 }
 0x21e   : > { %v8320_v17 = vpop.f32.mrf.mxu0  ;;  %3797 = vmatmul.mubr.bf16.gmra.mxu0 %v8306_v12  ;;  %9774 = vst [vmem:[#allocation31_spill] sm:$0xff] %v8346_v55  ;;  %v2262_v44 = vadd.f32 %v8071_v34, %v2069_v42 }
 0x21f   : > { %9770 = vst [vmem:[#allocation13_spill] sm:$0xff] %v8320_v17  ;;  %v8324_v51 = vpop.f32.mrf.mxu1  ;;  %3806 = vmatprep.mubr.bf16.mxu0 %v8317_v47  ;;  %4109 = vmatpush2.bf16.msra.mxu0 %v6582_v40  ;;  %v2785_v40 = vmax.f32 %v2260_v32, 0.0  ;;  %v9776_v47 = vld [vmem:[#allocation4_spill] sm:$0xff]  ;;  %v2258_v32 = vadd.f32 %v8048_v22, %v2065_v50  ;;  %v2091_v22 = vadd.f32 %v8171_v23, %v7895_v13 }
 0x220   : > { %9771 = vst [vmem:[#allocation28_spill] sm:$0xff] %v8324_v51  ;;  %v8334_v61 = vpop.f32.mrf.mxu0  ;;  %4110 = vmatprep.subr.bf16.mxu0 %v6587_v24  ;;  %v2274_v24 = vadd.f32 %v8131_v26, %v2081_v1  ;;  %v8358_v12 = vrot.slane %v9777_v5, %v9776_v47  ;;  %v2788_v42 = vmax.f32 %v2262_v44, 0.0  ;;  %v2079_v1 = vadd.f32 %v8113_v38, %v7921_v19 }
 0x221   : > { %v8336_v54 = vpop.f32.mrf.mxu1  ;;  %v8354_v57 = vpack.c.bf16 %v2789_v45, %v2785_v40  ;;  %v2075_v5 = vadd.f32 %v8090_v29, %v7921_v19  ;;  %v2087_v44 = vadd.f32 %v8148_v30, %v7895_v13 }
 0x222   : > { %v8342_v39 = vpop.f32.mrf.mxu0  ;;  %v2797_v45 = vmax.f32 %v2274_v24, 0.0  ;;  %v2272_v23 = vadd.f32 %v8117_v49, %v2079_v1  ;;  %v2089_v1 = vadd.f32 %v8159_v15, %v7921_v19 }
 0x223   : > { %9772 = vst [vmem:[#allocation29_spill] sm:$0xff] %v8342_v39  ;;  %v8344_v8 = vpop.f32.mrf.mxu1  ;;  %4111 = vmatpush2.bf16.msra.mxu0 %v6585_v3  ;;  %9775 = vst [vmem:[#allocation32_spill] sm:$0xff] %v8354_v57  ;;  %v2270_v3 = vadd.f32 %v8109_v31, %v2077_v6  ;;  %v2784_v6 = vmax.f32 %v2258_v32, 0.0  ;;  %v2284_v32 = vadd.f32 %v8177_v36, %v2091_v22 }
 0x224   : > { %9773 = vst [vmem:[#allocation30_spill] sm:$0xff] %v8344_v8  ;;  %v8350_v7 = vpop.f32.mrf.mxu0  ;;  %v2268_v17 = vadd.f32 %v8094_v59, %v2075_v5  ;;  %v2280_v49 = vadd.f32 %v8155_v18, %v2087_v44  ;;  %v2796_v36 = vmax.f32 %v2272_v23, 0.0  ;;  %v2101_v59 = vadd.f32 %v8217_v62, %v7895_v13 }
 0x225   : > { %v8352_v63 = vpop.f32.mrf.mxu1  ;;  %v2793_v2 = vmax.f32 %v2270_v3, 0.0 }
 0x226   : > { %v2360_v34 = vpop.f32.mrf.mxu0  ;;  %3807 = vmatmul.mubr.bf16.gmra.mxu0 %v8346_v55  ;;  %v8379_v55 = vpack.c.bf16 %v2788_v42, %v2784_v6  ;;  %v2792_v18 = vmax.f32 %v2268_v17, 0.0 }
 0x227   : > { %v2553_v26 = vpop.f32.mrf.mxu1  ;;  %3816 = vmatprep.mubr.bf16.mxu0 %v8354_v57  ;;  %v2361_v47 = vadd.f32 %v2360_v34, %v8364_v21  ;;  %v8382_v51 = vpack.c.bf16 %v2797_v45, %v2793_v2  ;;  %v2805_v45 = vmax.f32 %v2284_v32, 0.0  ;;  %v2294_v32 = vadd.f32 %v8223_v14, %v2101_v59 }
 0x228   : > { %v2362_v40 = vpop.f32.mrf.mxu0  ;;  %v8407_v17 = vpack.c.bf16 %v2796_v36, %v2792_v18 }
 0x229   : > { %v2363_v31 = vadd.f32 %v2362_v40, %v8358_v12  ;;  %v2555_v50 = vpop.f32.mrf.mxu1  ;;  %v2554_v30 = vadd.f32 %v2553_v26, %v2361_v47 }
 0x22a   : > { %v2364_v57 = vpop.f32.mrf.mxu0 }
 0x22b   : > { %v2365_v38 = vadd.f32 %v2364_v57, %v8364_v21  ;;  %v2557_v24 = vpop.f32.mrf.mxu1  ;;  %v2556_v29 = vadd.f32 %v2555_v50, %v2363_v31  ;;  %v2085_v57 = vadd.f32 %v8136_v56, %v7921_v19  ;;  %v2714_v6 = vmax.f32 %v2554_v30, 0.0 }
 0x22c   : > { %v2366_v40 = vpop.f32.mrf.mxu0 }
 0x22d   : > { %v2558_v3 = vadd.f32 %v2557_v24, %v2365_v38  ;;  %v2367_v34 = vadd.f32 %v2366_v40, %v8358_v12  ;;  %v2559_v8 = vpop.f32.mrf.mxu1  ;;  %v2715_v22 = vmax.f32 %v2556_v29, 0.0  ;;  %v2278_v15 = vadd.f32 %v8140_v9, %v2085_v57  ;;  %v6534_v40 = vld [vmem:[%s9637_s5 + $0x2e8] ss:$16 sps:$4 sm:$0xff]   ;;  %v6545_v9 = vld [vmem:[%s9637_s5 + $0x2cc] ss:$16 sps:$4 sm:$0xff]  }
 0x22e   : > { %v2370_v39 = vpop.f32.mrf.mxu0  ;;  %3817 = vmatmul.mubr.bf16.gmra.mxu0 %v8379_v55  ;;  %v2801_v38 = vmax.f32 %v2280_v49, 0.0 }
 0x22f   : > { %v2560_v2 = vadd.f32 %v2559_v8, %v2367_v34  ;;  %v2563_v42 = vpop.f32.mrf.mxu1  ;;  %3826 = vmatprep.mubr.bf16.mxu0 %v8382_v51  ;;  %v2718_v47 = vmax.f32 %v2558_v3, 0.0  ;;  %v2097_v8 = vadd.f32 %v8194_v53, %v7895_v13  ;;  %v2371_v5 = vadd.f32 %v2370_v39, %v8364_v21 }
 0x230   : > { %v2372_v26 = vpop.f32.mrf.mxu0  ;;  %v2282_v53 = vadd.f32 %v8163_v58, %v2089_v1  ;;  %v8418_v49 = vpack.c.bf16 %v2805_v45, %v2801_v38  ;;  %v2800_v36 = vmax.f32 %v2278_v15, 0.0 }
 0x231   : > { %v2719_v31 = vmax.f32 %v2560_v2, 0.0  ;;  %v2373_v56 = vadd.f32 %v2372_v26, %v8358_v12  ;;  %v2565_v50 = vpop.f32.mrf.mxu1  ;;  %v8411_v39 = vpack.c.bf16 %v2718_v47, %v2714_v6  ;;  %v2290_v58 = vadd.f32 %v8201_v10, %v2097_v8  ;;  %v6543_v47 = vld [vmem:[%s9637_s5 + $0x2c8] ss:$16 sps:$4 sm:$0xff]  }
 0x232   : > { %v2374_v44 = vpop.f32.mrf.mxu0  ;;  %v2564_v2 = vadd.f32 %v2563_v42, %v2371_v5  ;;  %v2804_v26 = vmax.f32 %v2282_v53, 0.0  ;;  %v2099_v10 = vadd.f32 %v8205_v48, %v7921_v19  ;;  %v2813_v42 = vmax.f32 %v2294_v32, 0.0  ;;  %v6552_v53 = vld [vmem:[%s9637_s5 + $0x2a8] ss:$16 sps:$4 sm:$0xff]  }
 0x233   : > { %v2375_v62 = vadd.f32 %v2374_v44, %v8364_v21  ;;  %v2567_v24 = vpop.f32.mrf.mxu1  ;;  %v8402_v23 = vpack.c.bf16 %v2719_v31, %v2715_v22  ;;  %v2566_v3 = vadd.f32 %v2565_v50, %v2373_v56  ;;  %v6554_v31 = vld [vmem:[%s9637_s5 + $0x2ac] ss:$16 sps:$4 sm:$0xff]   ;;  %v2111_v56 = vadd.f32 %v8263_v28, %v7895_v13 }
 0x234   : > { %v2376_v29 = vpop.f32.mrf.mxu0  ;;  %v2095_v5 = vadd.f32 %v8182_v41, %v7921_v19  ;;  %v2809_v48 = vmax.f32 %v2290_v58, 0.0  ;;  %v2722_v44 = vmax.f32 %v2564_v2, 0.0  ;;  %v8446_v32 = vpack.c.bf16 %v2804_v26, %v2800_v36 }
 0x235   : > { %v2568_v34 = vadd.f32 %v2567_v24, %v2375_v62  ;;  %v2377_v30 = vadd.f32 %v2376_v29, %v8358_v12  ;;  %v2569_v57 = vpop.f32.mrf.mxu1  ;;  %3919 = vmatprep.mubr.bf16.mxu1 %v8402_v23  ;;  %v2723_v50 = vmax.f32 %v2566_v3, 0.0  ;;  %v2107_v62 = vadd.f32 %v8240_v0, %v7895_v13  ;;  %v6563_v0 = vld [vmem:[%s9637_s5 + $0x28c] ss:$16 sps:$4 sm:$0xff]  }
 0x236   : > { %v2380_v14 = vpop.f32.mrf.mxu0  ;;  %3827 = vmatmul.mubr.bf16.gmra.mxu0 %v8407_v17  ;;  %3920 = vmatmul.mubr.bf16.vlgmr.msra.gmra.mxu1 %v8411_v39  ;;  %v2292_v41 = vadd.f32 %v8209_v37, %v2099_v10  ;;  %v8451_v3 = vpack.c.bf16 %v2813_v42, %v2809_v48  ;;  %v9779_v37 = vld [vmem:[#allocation20_spill] sm:$0xff]  ;;  %v6561_v42 = vld [vmem:[%s9637_s5 + $0x288] ss:$16 sps:$4 sm:$0xff]  }
 0x237   : > { %v2570_v1 = vadd.f32 %v2569_v57, %v2377_v30  ;;  %v2573_v59 = vpop.f32.mrf.mxu1  ;;  %4274 = vmatpush1.bf16.msra.mxu1 %v6534_v40  ;;  %3836 = vmatprep.mubr.bf16.mxu0 %v8418_v49  ;;  %v2726_v45 = vmax.f32 %v2568_v34, 0.0  ;;  %v2381_v15 = vadd.f32 %v2380_v14, %v8364_v21  ;;  %v2304_v34 = vadd.f32 %v8269_v43, %v2111_v56 }
 0x238   : > { %v2382_v22 = vpop.f32.mrf.mxu0  ;;  %4275 = vmatprep.subr.bf16.mxu1 %v6545_v9  ;;  %v2288_v14 = vadd.f32 %v9779_v37, %v2095_v5  ;;  %v2300_v43 = vadd.f32 %v8247_v33, %v2107_v62  ;;  %v6572_v33 = vld [vmem:[%s9637_s5 + $0x26c] ss:$16 sps:$4 sm:$0xff]  }
 0x239   : > { %v2727_v18 = vmax.f32 %v2570_v1, 0.0  ;;  %v2383_v8 = vadd.f32 %v2382_v22, %v8358_v12  ;;  %v2575_v6 = vpop.f32.mrf.mxu1  ;;  %v8449_v29 = vpack.c.bf16 %v2726_v45, %v2722_v44  ;;  %v2574_v36 = vadd.f32 %v2573_v59, %v2381_v15 }
 0x23a   : > { %v2384_v38 = vpop.f32.mrf.mxu0  ;;  %v2812_v59 = vmax.f32 %v2292_v41, 0.0  ;;  %v2109_v45 = vadd.f32 %v8251_v16, %v7921_v19  ;;  %v2121_v22 = vadd.f32 %v8309_v25, %v7895_v13  ;;  %v2821_v56 = vmax.f32 %v2304_v34, 0.0 }
 0x23b   : > { %v2385_v24 = vadd.f32 %v2384_v38, %v8364_v21  ;;  %v2577_v40 = vpop.f32.mrf.mxu1  ;;  %v8441_v28 = vpack.c.bf16 %v2727_v18, %v2723_v50  ;;  %4276 = vmatpush1.bf16.msra.mxu1 %v6543_v47  ;;  %v2576_v30 = vadd.f32 %v2575_v6, %v2383_v8  ;;  %v2105_v47 = vadd.f32 %v8228_v11, %v7921_v19 }
 0x23c   : > { %v2386_v9 = vpop.f32.mrf.mxu0  ;;  %4277 = vmatprep.subr.bf16.mxu1 %v6554_v31  ;;  %v2808_v5 = vmax.f32 %v2288_v14, 0.0  ;;  %v2117_v16 = vadd.f32 %v8286_v46, %v7895_v13  ;;  %v2730_v48 = vmax.f32 %v2574_v36, 0.0  ;;  %v2817_v38 = vmax.f32 %v2300_v43, 0.0  ;;  %v9780_v46 = vld [vmem:[#allocation25_spill] sm:$0xff] }
 0x23d   : > { %v2578_v57 = vadd.f32 %v2577_v40, %v2385_v24  ;;  %v2387_v58 = vadd.f32 %v2386_v9, %v8358_v12  ;;  %v2579_v2 = vpop.f32.mrf.mxu1  ;;  %3929 = vmatprep.mubr.bf16.mxu1 %v8441_v28  ;;  %v2731_v50 = vmax.f32 %v2576_v30, 0.0  ;;  %v2298_v15 = vadd.f32 %v8232_v60, %v2105_v47  ;;  %v6581_v30 = vld [vmem:[%s9637_s5 + $0x24c] ss:$16 sps:$4 sm:$0xff]  }
 0x23e   : > { %v2390_v1 = vpop.f32.mrf.mxu0  ;;  %3837 = vmatmul.mubr.bf16.gmra.mxu0 %v8446_v32  ;;  %3930 = vmatmul.mubr.bf16.gmra.mxu1 %v8449_v29  ;;  %v8487_v41 = vpack.c.bf16 %v2812_v59, %v2808_v5  ;;  %v2302_v9 = vadd.f32 %v9780_v46, %v2109_v45  ;;  %v8498_v14 = vpack.c.bf16 %v2821_v56, %v2817_v38 }
 0x23f   : > { %v2580_v26 = vadd.f32 %v2579_v2, %v2387_v58  ;;  %v2583_v10 = vpop.f32.mrf.mxu1  ;;  %3846 = vmatprep.mubr.bf16.mxu0 %v8451_v3  ;;  %4278 = vmatpush1.bf16.msra.mxu1 %v6552_v53  ;;  %v2734_v31 = vmax.f32 %v2578_v57, 0.0  ;;  %v2391_v25 = vadd.f32 %v2390_v1, %v8364_v21  ;;  %v6570_v53 = vld [vmem:[%s9637_s5 + $0x268] ss:$16 sps:$4 sm:$0xff]   ;;  %v2310_v36 = vadd.f32 %v8293_v4, %v2117_v16 }
 0x240   : > { %v2392_v11 = vpop.f32.mrf.mxu0  ;;  %4279 = vmatprep.subr.bf16.mxu1 %v6563_v0  ;;  %v2314_v0 = vadd.f32 %v8315_v52, %v2121_v22  ;;  %v2816_v47 = vmax.f32 %v2298_v15, 0.0  ;;  %v2820_v59 = vmax.f32 %v2302_v9, 0.0  ;;  %v2119_v4 = vadd.f32 %v8297_v20, %v7921_v19  ;;  %v6588_v15 = vld [vmem:[%s9637_s5 + $0x228] ss:$16 sps:$4 sm:$0xff]  }
 0x241   : > { %v2735_v18 = vmax.f32 %v2580_v26, 0.0  ;;  %v2393_v8 = vadd.f32 %v2392_v11, %v8358_v12  ;;  %v2585_v6 = vpop.f32.mrf.mxu1  ;;  %v8491_v34 = vpack.c.bf16 %v2734_v31, %v2730_v48  ;;  %v2584_v52 = vadd.f32 %v2583_v10, %v2391_v25  ;;  %v6590_v31 = vld [vmem:[%s9637_s5 + $0x22c] ss:$16 sps:$4 sm:$0xff]  }
 0x242   : > { %v2394_v44 = vpop.f32.mrf.mxu0  ;;  %v2829_v10 = vmax.f32 %v2314_v0, 0.0  ;;  %v2131_v11 = vadd.f32 %v8350_v7, %v7895_v13  ;;  %v2825_v20 = vmax.f32 %v2310_v36, 0.0  ;;  %v2127_v48 = vadd.f32 %v8334_v61, %v7895_v13  ;;  %v6593_v13 = vld [vmem:[%s9637_s5 + $0x20c] ss:$16 sps:$4 sm:$0xff]  }
 0x243   : > { %v2395_v62 = vadd.f32 %v2394_v44, %v8364_v21  ;;  %v2587_v24 = vpop.f32.mrf.mxu1  ;;  %v8482_v40 = vpack.c.bf16 %v2735_v18, %v2731_v50  ;;  %4280 = vmatpush1.bf16.msra.mxu1 %v6561_v42  ;;  %v2586_v57 = vadd.f32 %v2585_v6, %v2393_v8  ;;  %v6579_v42 = vld [vmem:[%s9637_s5 + $0x248] ss:$16 sps:$4 sm:$0xff]   ;;  %v2115_v8 = vadd.f32 %v8274_v35, %v7921_v19 }
 0x244   : > { %v2396_v60 = vpop.f32.mrf.mxu0  ;;  %4281 = vmatprep.subr.bf16.mxu1 %v6572_v33  ;;  %v2738_v6 = vmax.f32 %v2584_v52, 0.0  ;;  %v8526_v38 = vpack.c.bf16 %v2820_v59, %v2816_v47  ;;  %v2312_v35 = vadd.f32 %v8301_v27, %v2119_v4  ;;  %v2324_v61 = vadd.f32 %v8352_v63, %v2131_v11  ;;  %v9781_v27 = vld [vmem:[#allocation7_spill] sm:$0xff] }
 0x245   : > { %v2588_v58 = vadd.f32 %v2587_v24, %v2395_v62  ;;  %v2397_v2 = vadd.f32 %v2396_v60, %v8358_v12  ;;  %v2589_v37 = vpop.f32.mrf.mxu1  ;;  %3939 = vmatprep.mubr.bf16.mxu1 %v8482_v40  ;;  %v2739_v33 = vmax.f32 %v2586_v57, 0.0  ;;  %v6591_v63 = vld [vmem:[%s9637_s5 + $0x208] ss:$16 sps:$4 sm:$0xff]  }
 0x246   : > { %v2400_v1 = vpop.f32.mrf.mxu0  ;;  %3847 = vmatmul.mubr.bf16.gmra.mxu0 %v8487_v41  ;;  %3940 = vmatmul.mubr.bf16.gmra.mxu1 %v8491_v34  ;;  %v2828_v52 = vmax.f32 %v2312_v35, 0.0 }
 0x247   : > { %v2590_v43 = vadd.f32 %v2589_v37, %v2397_v2  ;;  %v2593_v26 = vpop.f32.mrf.mxu1  ;;  %3856 = vmatprep.mubr.bf16.mxu0 %v8498_v14  ;;  %4282 = vmatpush1.bf16.msra.mxu1 %v6570_v53  ;;  %v2742_v45 = vmax.f32 %v2588_v58, 0.0  ;;  %v2401_v5 = vadd.f32 %v2400_v1, %v8364_v21  ;;  %v8531_v53 = vpack.c.bf16 %v2829_v10, %v2825_v20  ;;  %v9782_v1 = vld [vmem:[#allocation29_spill] sm:$0xff] }
 0x248   : > { %v2402_v22 = vpop.f32.mrf.mxu0  ;;  %4283 = vmatprep.subr.bf16.mxu1 %v6581_v30  ;;  %v2308_v30 = vadd.f32 %v9781_v27, %v2115_v8  ;;  %v2320_v2 = vadd.f32 %v8336_v54, %v2127_v48  ;;  %v2129_v47 = vadd.f32 %v9782_v1, %v7921_v19  ;;  %v6596_v54 = vld [vmem:[%s9637_s5 + $0x3ec] ss:$16 sps:$4 sm:$0xff]   ;;  %v9784_v48 = vld [vmem:[#allocation30_spill] sm:$0xff] }
 0x249   : > { %v2743_v56 = vmax.f32 %v2590_v43, 0.0  ;;  %v2403_v50 = vadd.f32 %v2402_v22, %v8358_v12  ;;  %v2595_v18 = vpop.f32.mrf.mxu1  ;;  %v8529_v62 = vpack.c.bf16 %v2742_v45, %v2738_v6  ;;  %v2594_v57 = vadd.f32 %v2593_v26, %v2401_v5  ;;  %v6594_v5 = vld [vmem:[%s9637_s5 + $0x3e8] ss:$16 sps:$4 sm:$0xff]  }
 0x24a   : > { %v2404_v16 = vpop.f32.mrf.mxu0  ;;  %v2824_v22 = vmax.f32 %v2308_v30, 0.0 }
 0x24b   : > { %v2405_v25 = vadd.f32 %v2404_v16, %v8364_v21  ;;  %v2597_v44 = vpop.f32.mrf.mxu1  ;;  %v8521_v7 = vpack.c.bf16 %v2743_v56, %v2739_v33  ;;  %4284 = vmatpush1.bf16.msra.mxu1 %v6579_v42  ;;  %v2596_v46 = vadd.f32 %v2595_v18, %v2403_v50  ;;  %v2837_v42 = vmax.f32 %v2324_v61, 0.0 }
 0x24c   : > { %v2406_v24 = vpop.f32.mrf.mxu0  ;;  %4285 = vmatprep.subr.bf16.mxu1 %v6590_v31  ;;  %v9783_v31 = vld [vmem:[#allocation13_spill] sm:$0xff]  ;;  %v2746_v33 = vmax.f32 %v2594_v57, 0.0  ;;  %v2833_v18 = vmax.f32 %v2320_v2, 0.0  ;;  %v8562_v16 = vpack.c.bf16 %v2828_v52, %v2824_v22 }
 0x24d   : > { %v2598_v9 = vadd.f32 %v2597_v44, %v2405_v25  ;;  %v2407_v0 = vadd.f32 %v2406_v24, %v8358_v12  ;;  %v2599_v60 = vpop.f32.mrf.mxu1  ;;  %3949 = vmatprep.mubr.bf16.mxu1 %v8521_v7  ;;  %v2747_v59 = vmax.f32 %v2596_v46, 0.0  ;;  %v2125_v11 = vadd.f32 %v9783_v31, %v7921_v19  ;;  %v6600_v22 = vld [vmem:[%s9637_s5 + $0x3a8] ss:$16 sps:$4 sm:$0xff]  }
 0x24e   : > { %v2410_v58 = vpop.f32.mrf.mxu0  ;;  %3857 = vmatmul.mubr.bf16.gmra.mxu0 %v8526_v38  ;;  %3950 = vmatmul.mubr.bf16.gmra.mxu1 %v8529_v62  ;;  %v2322_v25 = vadd.f32 %v9784_v48, %v2129_v47  ;;  %v8572_v46 = vpack.c.bf16 %v2837_v42, %v2833_v18 }
 0x24f   : > { %v2600_v37 = vadd.f32 %v2599_v60, %v2407_v0  ;;  %v2603_v36 = vpop.f32.mrf.mxu1  ;;  %3866 = vmatprep.mubr.bf16.mxu0 %v8531_v53  ;;  %4286 = vmatpush1.bf16.msra.mxu1 %v6588_v15  ;;  %v2750_v43 = vmax.f32 %v2598_v9, 0.0  ;;  %v2411_v56 = vadd.f32 %v2410_v58, %v8364_v21  ;;  %v6599_v15 = vld [vmem:[%s9637_s5 + $0x3cc] ss:$16 sps:$4 sm:$0xff]   ;;  %v9785_v9 = vld [vmem:[#allocation28_spill] sm:$0xff]  ;;  %v6597_v58 = vld [vmem:[%s9637_s5 + $0x3c8] ss:$16 sps:$4 sm:$0xff]  }
 0x250   : > { %v2412_v26 = vpop.f32.mrf.mxu0  ;;  %4287 = vmatprep.subr.bf16.mxu1 %v6593_v13  ;;  %v2318_v0 = vadd.f32 %v9785_v9, %v2125_v11  ;;  %v2836_v2 = vmax.f32 %v2322_v25, 0.0 }
 0x251   : > { %v2751_v4 = vmax.f32 %v2600_v37, 0.0  ;;  %v2413_v10 = vadd.f32 %v2412_v26, %v8358_v12  ;;  %v2605_v45 = vpop.f32.mrf.mxu1  ;;  %v8565_v19 = vpack.c.bf16 %v2750_v43, %v2746_v33  ;;  %v2604_v60 = vadd.f32 %v2603_v36, %v2411_v56  ;;  %v6602_v36 = vld [vmem:[%s9637_s5 + $0x3ac] ss:$16 sps:$4 sm:$0xff]  }
 0x252   : > { %v2414_v50 = vpop.f32.mrf.mxu0  ;;  %v2832_v26 = vmax.f32 %v2318_v0, 0.0  ;;  %v6605_v56 = vld [vmem:[%s9637_s5 + $0x38c] ss:$16 sps:$4 sm:$0xff]  }
 0x253   : > { %v2415_v8 = vadd.f32 %v2414_v50, %v8364_v21  ;;  %v2607_v20 = vpop.f32.mrf.mxu1  ;;  %v8557_v6 = vpack.c.bf16 %v2751_v4, %v2747_v59  ;;  %4288 = vmatpush1.bf16.msra.mxu1 %v6591_v63  ;;  %v2606_v35 = vadd.f32 %v2605_v45, %v2413_v10 }
 0x254   : > { %v2416_v44 = vpop.f32.mrf.mxu0  ;;  %4289 = vmatprep.subr.bf16.mxu1 %v6596_v54  ;;  %v2754_v54 = vmax.f32 %v2604_v60, 0.0  ;;  %v8592_v31 = vpack.c.bf16 %v2836_v2, %v2832_v26  ;;  %v6619_v26 = vld [vmem:[%s9639_s7 + $0x38] sm:$0xff]  }
 0x255   : > { %v2608_v24 = vadd.f32 %v2607_v20, %v2415_v8  ;;  %v2417_v13 = vadd.f32 %v2416_v44, %v8358_v12  ;;  %v2609_v61 = vpop.f32.mrf.mxu1  ;;  %3959 = vmatprep.mubr.bf16.mxu1 %v8557_v6  ;;  %v2755_v52 = vmax.f32 %v2606_v35, 0.0  ;;  %v6603_v35 = vld [vmem:[%s9637_s5 + $0x388] ss:$16 sps:$4 sm:$0xff]  }
 0x256   : > { %v2420_v27 = vpop.f32.mrf.mxu0  ;;  %3867 = vmatmul.mubr.bf16.gmra.mxu0 %v8562_v16  ;;  %3960 = vmatmul.mubr.bf16.gmra.mxu1 %v8565_v19 }
 0x257   : > { %v2610_v30 = vadd.f32 %v2609_v61, %v2417_v13  ;;  %v2613_v57 = vpop.f32.mrf.mxu1  ;;  %3876 = vmatprep.mubr.bf16.mxu0 %v8572_v46  ;;  %4290 = vmatpush2.bf16.msra.mxu1 %v6594_v5  ;;  %v2758_v37 = vmax.f32 %v2608_v24, 0.0  ;;  %v2421_v42 = vadd.f32 %v2420_v27, %v8364_v21  ;;  %v6608_v61 = vld [vmem:[%s9637_s5 + $0x36c] ss:$16 sps:$4 sm:$0xff]  }
 0x258   : > { %v2422_v63 = vpop.f32.mrf.mxu0  ;;  %4291 = vmatprep.subr.bf16.mxu1 %v6599_v15  ;;  %v9786_v15 = vld [vmem:[#allocation9_spill] sm:$0xff] }
 0x259   : > { %v2759_v1 = vmax.f32 %v2610_v30, 0.0  ;;  %v2423_v47 = vadd.f32 %v2422_v63, %v8358_v12  ;;  %v2615_v43 = vpop.f32.mrf.mxu1  ;;  %v8594_v11 = vpack.c.bf16 %v2758_v37, %v2754_v54  ;;  %v2614_v5 = vadd.f32 %v2613_v57, %v2421_v42 }
 0x25a   : > { %v2424_v59 = vpop.f32.mrf.mxu0 }
 0x25b   : > { %v2425_v4 = vadd.f32 %v2424_v59, %v8364_v21  ;;  %v2617_v10 = vpop.f32.mrf.mxu1  ;;  %v8587_v45 = vpack.c.bf16 %v2759_v1, %v2755_v52  ;;  %4292 = vmatpush2.bf16.msra.mxu1 %v6597_v58  ;;  %v2616_v50 = vadd.f32 %v2615_v43, %v2423_v47  ;;  %v2762_v30 = vmax.f32 %v2614_v5, 0.0  ;;  %v6618_v52 = vld [vmem:[%s9639_s7 + $0x78] sm:$0xff]  }
 0x25c   : > { %v2426_v33 = vpop.f32.mrf.mxu0  ;;  %4293 = vmatprep.subr.bf16.mxu1 %v6602_v36  ;;  %v6606_v36 = vld [vmem:[%s9637_s5 + $0x368] ss:$16 sps:$4 sm:$0xff]   ;;  %v6611_v43 = vld [vmem:[%s9637_s5 + $0x34c] ss:$16 sps:$4 sm:$0xff]   ;;  %5974 = vmatprep.subr.bf16.mxu0 %v6618_v52 }
 0x25d   : > { %v2618_v18 = vadd.f32 %v2617_v10, %v2425_v4  ;;  %v2427_v8 = vadd.f32 %v2426_v33, %v8358_v12  ;;  %v2619_v20 = vpop.f32.mrf.mxu1  ;;  %3969 = vmatprep.mubr.bf16.mxu1 %v8587_v45  ;;  %v2763_v9 = vmax.f32 %v2616_v50, 0.0  ;;  %v9787_v33 = vld [vmem:[#allocation10_spill] sm:$0xff]  ;;  %v6623_v52 = vld [vmem:[%s9639_s7 + $0x28] sm:$0xff]  }
 0x25e   : > { %v2430_v48 = vpop.f32.mrf.mxu0  ;;  %3877 = vmatmul.mubr.bf16.gmra.mxu0 %v8592_v31  ;;  %3970 = vmatmul.mubr.bf16.gmra.mxu1 %v8594_v11 }
 0x25f   : > { %v2620_v25 = vadd.f32 %v2619_v20, %v2427_v8  ;;  %v2623_v44 = vpop.f32.mrf.mxu1  ;;  %4112 = vmatprep.mubr.bf16.mxu0 %v9786_v15  ;;  %4294 = vmatpush2.bf16.msra.mxu1 %v6600_v22  ;;  %v2766_v24 = vmax.f32 %v2618_v18, 0.0  ;;  %v2431_v57 = vadd.f32 %v2430_v48, %v8364_v21  ;;  %v9788_v18 = vld [vmem:[#allocation11_spill] sm:$0xff]  ;;  %v6620_v20 = vld [vmem:[%s9639_s7 + $0x70] sm:$0xff]  }
 0x260   : > { %v2432_v13 = vpop.f32.mrf.mxu0  ;;  %4295 = vmatprep.subr.bf16.mxu1 %v6605_v56  ;;  %v6609_v8 = vld [vmem:[%s9637_s5 + $0x348] ss:$16 sps:$4 sm:$0xff]  }
 0x261   : > { %v2767_v0 = vmax.f32 %v2620_v25, 0.0  ;;  %v2433_v60 = vadd.f32 %v2432_v13, %v8358_v12  ;;  %v2625_v27 = vpop.f32.mrf.mxu1  ;;  %v8621_v1 = vpack.c.bf16 %v2766_v24, %v2762_v30  ;;  %v2624_v10 = vadd.f32 %v2623_v44, %v2431_v57  ;;  %v6614_v25 = vld [vmem:[%s9637_s5 + $0x32c] ss:$16 sps:$4 sm:$0xff]   ;;  %v6621_v44 = vld [vmem:[%s9639_s7 + $0x30] sm:$0xff]   ;;  %v6612_v57 = vld [vmem:[%s9637_s5 + $0x328] ss:$16 sps:$4 sm:$0xff]  }
 0x262   : > { %v2434_v58 = vpop.f32.mrf.mxu0 }
 0x263   : > { %v2435_v2 = vadd.f32 %v2434_v58, %v8364_v21  ;;  %v2627_v37 = vpop.f32.mrf.mxu1  ;;  %v8613_v63 = vpack.c.bf16 %v2767_v0, %v2763_v9  ;;  %4296 = vmatpush2.bf16.msra.mxu1 %v6603_v35  ;;  %v2626_v54 = vadd.f32 %v2625_v27, %v2433_v60  ;;  %v6622_v58 = vld [vmem:[%s9639_s7 + $0x68] sm:$0xff]  }
 0x264   : > { %v2436_v47 = vpop.f32.mrf.mxu0  ;;  %4297 = vmatprep.subr.bf16.mxu1 %v6608_v61  ;;  %v2770_v61 = vmax.f32 %v2624_v10, 0.0 }
 0x265   : > { %v2628_v42 = vadd.f32 %v2627_v37, %v2435_v2  ;;  %v2437_v59 = vadd.f32 %v2436_v47, %v8358_v12  ;;  %v2629_v4 = vpop.f32.mrf.mxu1  ;;  %3979 = vmatprep.mubr.bf16.mxu1 %v8613_v63  ;;  %v2771_v15 = vmax.f32 %v2626_v54, 0.0 }
 0x266   : > { %v2440_v22 = vpop.f32.mrf.mxu0  ;;  %3980 = vmatmul.mubr.bf16.gmra.mxu1 %v8621_v1  ;;  %4113 = vmatmul.mubr.bf16.vlgmr.msra.gmra.mxu0 %v9787_v33  ;;  %v9790_v33 = vld [vmem:[#allocation14_spill] sm:$0xff] }
 0x267   : > { %v2630_v56 = vadd.f32 %v2629_v4, %v2437_v59  ;;  %v2633_v50 = vpop.f32.mrf.mxu1  ;;  %4122 = vmatprep.mubr.bf16.mxu0 %v9788_v18  ;;  %4298 = vmatpush2.bf16.msra.mxu1 %v6606_v36  ;;  %v2774_v5 = vmax.f32 %v2628_v42, 0.0  ;;  %v2441_v9 = vadd.f32 %v2440_v22, %v8364_v21  ;;  %v6617_v36 = vld [vmem:[%s9637_s5 + $0x30c] ss:$16 sps:$4 sm:$0xff]   ;;  %v9789_v4 = vld [vmem:[#allocation12_spill] sm:$0xff]  ;;  %v6624_v18 = vld [vmem:[%s9639_s7 + $0x60] sm:$0xff]  }
 0x268   : > { %v2442_v48 = vpop.f32.mrf.mxu0  ;;  %4299 = vmatprep.subr.bf16.mxu1 %v6611_v43  ;;  %5975 = vmatpush3.bf16.msra.mxu0 %v6619_v26 }
 0x269   : > { %v2775_v35 = vmax.f32 %v2630_v56, 0.0  ;;  %v2443_v24 = vadd.f32 %v2442_v48, %v8358_v12  ;;  %v2635_v13 = vpop.f32.mrf.mxu1  ;;  %5976 = vmatprep.subr.bf16.mxu0 %v6620_v20  ;;  %v8657_v2 = vpack.c.bf16 %v2774_v5, %v2770_v61  ;;  %v2634_v42 = vadd.f32 %v2633_v50, %v2441_v9  ;;  %v6615_v56 = vld [vmem:[%s9637_s5 + $0x308] ss:$16 sps:$4 sm:$0xff]   ;;  %v6625_v20 = vld [vmem:[%s9639_s7 + $0x20] sm:$0xff]  }
 0x26a   : > { %v2444_v0 = vpop.f32.mrf.mxu0 }
 0x26b   : > { %v2445_v60 = vadd.f32 %v2444_v0, %v8364_v21  ;;  %v2637_v27 = vpop.f32.mrf.mxu1  ;;  %v8649_v30 = vpack.c.bf16 %v2775_v35, %v2771_v15  ;;  %4300 = vmatpush2.bf16.msra.mxu1 %v6609_v8  ;;  %v2636_v47 = vadd.f32 %v2635_v13, %v2443_v24  ;;  %v2778_v15 = vmax.f32 %v2634_v42, 0.0  ;;  %v6626_v0 = vld [vmem:[%s9639_s7 + $0x58] sm:$0xff]  }
 0x26c   : > { %v2446_v37 = vpop.f32.mrf.mxu0  ;;  %4301 = vmatprep.subr.bf16.mxu1 %v6614_v25  ;;  %5977 = vmatpush3.bf16.msra.mxu0 %v6621_v44 }
 0x26d   : > { %v2638_v43 = vadd.f32 %v2637_v27, %v2445_v60  ;;  %v2447_v26 = vadd.f32 %v2446_v37, %v8358_v12  ;;  %v2639_v54 = vpop.f32.mrf.mxu1  ;;  %3989 = vmatprep.mubr.bf16.mxu1 %v8649_v30  ;;  %5978 = vmatprep.subr.bf16.mxu0 %v6622_v58  ;;  %v2779_v5 = vmax.f32 %v2636_v47, 0.0 }
 0x26e   : > { %v2450_v59 = vpop.f32.mrf.mxu0  ;;  %3990 = vmatmul.mubr.bf16.gmra.mxu1 %v8657_v2  ;;  %4123 = vmatmul.mubr.bf16.gmra.mxu0 %v9789_v4  ;;  %v6628_v4 = vld [vmem:[%s9639_s7 + $0x50] sm:$0xff]  }
 0x26f   : > { %v2640_v10 = vadd.f32 %v2639_v54, %v2447_v26  ;;  %v2643_v22 = vpop.f32.mrf.mxu1  ;;  %4132 = vmatprep.mubr.bf16.mxu0 %v9790_v33  ;;  %4302 = vmatpush2.bf16.msra.mxu1 %v6612_v57  ;;  %v2782_v8 = vmax.f32 %v2638_v43, 0.0  ;;  %v2451_v35 = vadd.f32 %v2450_v59, %v8364_v21  ;;  %v6627_v57 = vld [vmem:[%s9639_s7 + $0x18] sm:$0xff]   ;;  %v9791_v26 = vld [vmem:[#allocation15_spill] sm:$0xff] }
 0x270   : > { %v2452_v50 = vpop.f32.mrf.mxu0  ;;  %4303 = vmatprep.subr.bf16.mxu1 %v6617_v36  ;;  %5979 = vmatpush3.bf16.msra.mxu0 %v6623_v52  ;;  %v9792_v59 = vld [vmem:[#allocation17_spill] sm:$0xff] }
 0x271   : > { %v2783_v48 = vmax.f32 %v2640_v10, 0.0  ;;  %v2453_v25 = vadd.f32 %v2452_v50, %v8358_v12  ;;  %v2645_v44 = vpop.f32.mrf.mxu1  ;;  %5980 = vmatprep.subr.bf16.mxu0 %v6624_v18  ;;  %v8687_v60 = vpack.c.bf16 %v2782_v8, %v2778_v15  ;;  %v2644_v47 = vadd.f32 %v2643_v22, %v2451_v35  ;;  %v6629_v22 = vld [vmem:[%s9639_s7 + $0x10] sm:$0xff]   ;;  %v6630_v35 = vld [vmem:[%s9639_s7 + $0x48] sm:$0xff]  }
 0x272   : > { %v2454_v24 = vpop.f32.mrf.mxu0 }
 0x273   : > { %v2455_v13 = vadd.f32 %v2454_v24, %v8364_v21  ;;  %v2647_v61 = vpop.f32.mrf.mxu1  ;;  %v8682_v9 = vpack.c.bf16 %v2783_v48, %v2779_v5  ;;  %4304 = vmatpush2.bf16.msra.mxu1 %v6615_v56  ;;  %v2646_v58 = vadd.f32 %v2645_v44, %v2453_v25 }
 0x274   : > { %v2456_v27 = vpop.f32.mrf.mxu0  ;;  %5981 = vmatpush3.bf16.msra.mxu0 %v6625_v20  ;;  %v2786_v20 = vmax.f32 %v2644_v47, 0.0 }
 0x275   : > { %v2648_v37 = vadd.f32 %v2647_v61, %v2455_v13  ;;  %v2457_v36 = vadd.f32 %v2456_v27, %v8358_v12  ;;  %v2649_v52 = vpop.f32.mrf.mxu1  ;;  %3999 = vmatprep.mubr.bf16.mxu1 %v8682_v9  ;;  %5982 = vmatprep.subr.bf16.mxu0 %v6626_v0  ;;  %v2787_v56 = vmax.f32 %v2646_v58, 0.0  ;;  %v6631_v61 = vld [vmem:[%s9639_s7 + $0x8] sm:$0xff]  }
 0x276   : > { %v2460_v43 = vpop.f32.mrf.mxu0  ;;  %4000 = vmatmul.mubr.bf16.gmra.mxu1 %v8687_v60  ;;  %4133 = vmatmul.mubr.bf16.gmra.mxu0 %v9791_v26  ;;  %v9794_v26 = vld [vmem:[#allocation18_spill] sm:$0xff] }
 0x277   : > { %v2650_v54 = vadd.f32 %v2649_v52, %v2457_v36  ;;  %v2653_v42 = vpop.f32.mrf.mxu1  ;;  %4142 = vmatprep.mubr.bf16.mxu0 %v9792_v59  ;;  %v2790_v10 = vmax.f32 %v2648_v37, 0.0  ;;  %v2461_v5 = vadd.f32 %v2460_v43, %v8364_v21  ;;  %v9793_v52 = vld [vmem:[#allocation16_spill] sm:$0xff] }
 0x278   : > { %v2462_v33 = vpop.f32.mrf.mxu0  ;;  %5983 = vmatpush3.bf16.msra.mxu0 %v6627_v57 }
 0x279   : > { %v2791_v18 = vmax.f32 %v2650_v54, 0.0  ;;  %v2463_v8 = vadd.f32 %v2462_v33, %v8358_v12  ;;  %v2655_v50 = vpop.f32.mrf.mxu1  ;;  %5984 = vmatprep.subr.bf16.mxu0 %v6628_v4  ;;  %v8711_v24 = vpack.c.bf16 %v2790_v10, %v2786_v20  ;;  %v2654_v37 = vadd.f32 %v2653_v42, %v2461_v5  ;;  %v6632_v54 = vld [vmem:[%s9639_s7 + $0x40] sm:$0xff]  }
 0x27a   : > { %v2464_v48 = vpop.f32.mrf.mxu0  ;;  %v6633_v42 = vld [vmem:[%s9639_s7] sm:$0xff]  }
 0x27b   : > { %v2465_v25 = vadd.f32 %v2464_v48, %v8364_v21  ;;  %v2657_v44 = vpop.f32.mrf.mxu1  ;;  %v8706_v15 = vpack.c.bf16 %v2791_v18, %v2787_v56  ;;  %v2656_v0 = vadd.f32 %v2655_v50, %v2463_v8  ;;  %v2794_v18 = vmax.f32 %v2654_v37, 0.0 }
 0x27c   : > { %v2466_v13 = vpop.f32.mrf.mxu0  ;;  %5985 = vmatpush3.bf16.msra.mxu0 %v6629_v22 }
 0x27d   : > { %v2658_v27 = vadd.f32 %v2657_v44, %v2465_v25  ;;  %v2467_v57 = vadd.f32 %v2466_v13, %v8358_v12  ;;  %v2659_v58 = vpop.f32.mrf.mxu1  ;;  %4009 = vmatprep.mubr.bf16.mxu1 %v8706_v15  ;;  %5986 = vmatprep.subr.bf16.mxu0 %v6630_v35  ;;  %v2795_v10 = vmax.f32 %v2656_v0, 0.0 }
 0x27e   : > { %v2470_v36 = vpop.f32.mrf.mxu0  ;;  %4010 = vmatmul.mubr.bf16.gmra.mxu1 %v8711_v24  ;;  %4143 = vmatmul.mubr.bf16.gmra.mxu0 %v9793_v52  ;;  %v9796_v52 = vld [vmem:[#allocation21_spill] sm:$0xff] }
 0x27f   : > { %v2660_v47 = vadd.f32 %v2659_v58, %v2467_v57  ;;  %v2663_v43 = vpop.f32.mrf.mxu1  ;;  %4152 = vmatprep.mubr.bf16.mxu0 %v9794_v26  ;;  %v2798_v59 = vmax.f32 %v2658_v27, 0.0  ;;  %v2471_v8 = vadd.f32 %v2470_v36, %v8364_v21  ;;  %v9795_v58 = vld [vmem:[#allocation19_spill] sm:$0xff] }
 0x280   : > { %v2472_v4 = vpop.f32.mrf.mxu0  ;;  %5987 = vmatpush3.bf16.msra.mxu0 %v6631_v61 }
 0x281   : > { %v2799_v33 = vmax.f32 %v2660_v47, 0.0  ;;  %v2473_v22 = vadd.f32 %v2472_v4, %v8358_v12  ;;  %v2665_v56 = vpop.f32.mrf.mxu1  ;;  %5988 = vmatprep.subr.bf16.mxu0 %v6632_v54  ;;  %v8732_v25 = vpack.c.bf16 %v2798_v59, %v2794_v18  ;;  %v2664_v27 = vadd.f32 %v2663_v43, %v2471_v8  ;;  %v6634_v47 = vld [vmem:[%s9639_s7 + $0xf8] sm:$0xff]  }
 0x282   : > { %v2474_v50 = vpop.f32.mrf.mxu0  ;;  %6086 = vmatprep.subr.bf16.mxu1 %v6634_v47 }
 0x283   : > { %v2475_v20 = vadd.f32 %v2474_v50, %v8364_v21  ;;  %v2667_v5 = vpop.f32.mrf.mxu1  ;;  %v8730_v48 = vpack.c.bf16 %v2799_v33, %v2795_v10  ;;  %v2666_v35 = vadd.f32 %v2665_v56, %v2473_v22  ;;  %v2802_v10 = vmax.f32 %v2664_v27, 0.0  ;;  %v9797_v27 = vld [vmem:[#allocation22_spill] sm:$0xff] }
 0x284   : > { %v2476_v44 = vpop.f32.mrf.mxu0  ;;  %5989 = vmatpush3.bf16.msra.mxu0 %v6633_v42 }
 0x285   : > { %v2668_v13 = vadd.f32 %v2667_v5, %v2475_v20  ;;  %v2477_v61 = vadd.f32 %v2476_v44, %v8358_v12  ;;  %v2669_v0 = vpop.f32.mrf.mxu1  ;;  %4019 = vmatprep.mubr.bf16.mxu1 %v8730_v48  ;;  %v2803_v59 = vmax.f32 %v2666_v35, 0.0 }
 0x286   : > { %v2480_v57 = vpop.f32.mrf.mxu0  ;;  %4020 = vmatmul.mubr.bf16.gmra.mxu1 %v8732_v25  ;;  %4153 = vmatmul.mubr.bf16.gmra.mxu0 %v9795_v58 }
 0x287   : > { %v2670_v37 = vadd.f32 %v2669_v0, %v2477_v61  ;;  %v2673_v36 = vpop.f32.mrf.mxu1  ;;  %4162 = vmatprep.mubr.bf16.mxu0 %v9796_v52  ;;  %v2806_v26 = vmax.f32 %v2668_v13, 0.0  ;;  %v2481_v33 = vadd.f32 %v2480_v57, %v8364_v21 }
 0x288   : > { %v2482_v54 = vpop.f32.mrf.mxu0 }
 0x289   : > { %v2807_v4 = vmax.f32 %v2670_v37, 0.0  ;;  %v2483_v42 = vadd.f32 %v2482_v54, %v8358_v12  ;;  %v2675_v43 = vpop.f32.mrf.mxu1  ;;  %v8747_v50 = vpack.c.bf16 %v2806_v26, %v2802_v10  ;;  %v2674_v61 = vadd.f32 %v2673_v36, %v2481_v33  ;;  %v9798_v37 = vld [vmem:[#allocation23_spill] sm:$0xff] }
 0x28a   : > { %v2484_v22 = vpop.f32.mrf.mxu0 }
 0x28b   : > { %v2485_v56 = vadd.f32 %v2484_v22, %v8364_v21  ;;  %v2677_v18 = vpop.f32.mrf.mxu1  ;;  %v8745_v8 = vpack.c.bf16 %v2807_v4, %v2803_v59  ;;  %v2676_v5 = vadd.f32 %v2675_v43, %v2483_v42  ;;  %v2810_v42 = vmax.f32 %v2674_v61, 0.0 }
 0x28c   : > { %v2486_v20 = vpop.f32.mrf.mxu0 }
 0x28d   : > { %v2678_v44 = vadd.f32 %v2677_v18, %v2485_v56  ;;  %v2487_v35 = vadd.f32 %v2486_v20, %v8358_v12  ;;  %v2679_v13 = vpop.f32.mrf.mxu1  ;;  %4029 = vmatprep.mubr.bf16.mxu1 %v8745_v8  ;;  %v2811_v26 = vmax.f32 %v2676_v5, 0.0 }
 0x28e   : > { %v2490_v0 = vpop.f32.mrf.mxu0  ;;  %4030 = vmatmul.mubr.bf16.gmra.mxu1 %v8747_v50  ;;  %4163 = vmatmul.mubr.bf16.gmra.mxu0 %v9797_v27 }
 0x28f   : > { %v2680_v57 = vadd.f32 %v2679_v13, %v2487_v35  ;;  %v2683_v58 = vpop.f32.mrf.mxu1  ;;  %4172 = vmatprep.mubr.bf16.mxu0 %v9798_v37  ;;  %v2814_v52 = vmax.f32 %v2678_v44, 0.0  ;;  %v2491_v43 = vadd.f32 %v2490_v0, %v8364_v21  ;;  %v9799_v0 = vld [vmem:[#allocation24_spill] sm:$0xff]  ;;  %v9800_v37 = vld [vmem:[#allocation26_spill] sm:$0xff] }
 0x290   : > { %v2492_v47 = vpop.f32.mrf.mxu0 }
 0x291   : > { %v2815_v54 = vmax.f32 %v2680_v57, 0.0  ;;  %v2493_v59 = vadd.f32 %v2492_v47, %v8358_v12  ;;  %v2685_v4 = vpop.f32.mrf.mxu1  ;;  %v8759_v56 = vpack.c.bf16 %v2814_v52, %v2810_v42  ;;  %v2684_v13 = vadd.f32 %v2683_v58, %v2491_v43 }
 0x292   : > { %v2494_v36 = vpop.f32.mrf.mxu0 }
 0x293   : > { %v2495_v10 = vadd.f32 %v2494_v36, %v8364_v21  ;;  %v2687_v33 = vpop.f32.mrf.mxu1  ;;  %v8757_v22 = vpack.c.bf16 %v2815_v54, %v2811_v26  ;;  %v2686_v20 = vadd.f32 %v2685_v4, %v2493_v59  ;;  %v2818_v42 = vmax.f32 %v2684_v13, 0.0 }
 0x294   : > { %v2496_v18 = vpop.f32.mrf.mxu0 }
 0x295   : > { %v2688_v44 = vadd.f32 %v2687_v33, %v2495_v10  ;;  %v2497_v5 = vadd.f32 %v2496_v18, %v8358_v12  ;;  %v2689_v35 = vpop.f32.mrf.mxu1  ;;  %4039 = vmatprep.mubr.bf16.mxu1 %v8757_v22  ;;  %v2819_v26 = vmax.f32 %v2686_v20, 0.0 }
 0x296   : > { %v2500_v61 = vpop.f32.mrf.mxu0  ;;  %4040 = vmatmul.mubr.bf16.gmra.mxu1 %v8759_v56  ;;  %4173 = vmatmul.mubr.bf16.gmra.mxu0 %v9799_v0 }
 0x297   : > { %v2690_v27 = vadd.f32 %v2689_v35, %v2497_v5  ;;  %v2693_v57 = vpop.f32.mrf.mxu1  ;;  %4182 = vmatprep.mubr.bf16.mxu0 %v9800_v37  ;;  %v2822_v52 = vmax.f32 %v2688_v44, 0.0  ;;  %v2501_v36 = vadd.f32 %v2500_v61, %v8364_v21  ;;  %v9802_v61 = vld [vmem:[#allocation8_spill] sm:$0xff] }
 0x298   : > { %v2502_v47 = vpop.f32.mrf.mxu0 }
 0x299   : > { %v2823_v54 = vmax.f32 %v2690_v27, 0.0  ;;  %v2503_v59 = vadd.f32 %v2502_v47, %v8358_v12  ;;  %v2695_v4 = vpop.f32.mrf.mxu1  ;;  %v8771_v18 = vpack.c.bf16 %v2822_v52, %v2818_v42  ;;  %v2694_v27 = vadd.f32 %v2693_v57, %v2501_v36 }
 0x29a   : > { %v2504_v58 = vpop.f32.mrf.mxu0 }
 0x29b   : > { %v2505_v43 = vadd.f32 %v2504_v58, %v8364_v21  ;;  %v2697_v10 = vpop.f32.mrf.mxu1  ;;  %v8769_v33 = vpack.c.bf16 %v2823_v54, %v2819_v26  ;;  %9801 = vst [vmem:[#allocation6_spill] sm:$0xff] %v8771_v18  ;;  %v2696_v35 = vadd.f32 %v2695_v4, %v2503_v59  ;;  %v9803_v26 = vld [vmem:[#allocation27_spill] sm:$0xff] }
 0x29c   : > { %v2506_v5 = vpop.f32.mrf.mxu0 }
 0x29d   : > { %v2698_v44 = vadd.f32 %v2697_v10, %v2505_v43  ;;  %v2507_v20 = vadd.f32 %v2506_v5, %v8358_v12  ;;  %v2699_v0 = vpop.f32.mrf.mxu1  ;;  %4049 = vmatprep.mubr.bf16.mxu1 %v8769_v33  ;;  %v2827_v42 = vmax.f32 %v2696_v35, 0.0  ;;  %v2826_v43 = vmax.f32 %v2694_v27, 0.0 }
 0x29e   : > { %v2510_v13 = vpop.f32.mrf.mxu0  ;;  %4050 = vmatmul.mubr.bf16.gmra.mxu1 %v8771_v18  ;;  %4183 = vmatmul.mubr.bf16.gmra.mxu0 %v9802_v61 }
 0x29f   : > { %v2700_v37 = vadd.f32 %v2699_v0, %v2507_v20  ;;  %v2703_v47 = vpop.f32.mrf.mxu1  ;;  %4192 = vmatprep.mubr.bf16.mxu0 %v9803_v26  ;;  %v2830_v52 = vmax.f32 %v2698_v44, 0.0  ;;  %v2511_v10 = vadd.f32 %v2510_v13, %v8364_v21  ;;  %v9804_v13 = vld [vmem:[#allocation31_spill] sm:$0xff] }
 0x2a0   : > { %v2512_v54 = vpop.f32.mrf.mxu0 }
 0x2a1   : > { %v2831_v59 = vmax.f32 %v2700_v37, 0.0  ;;  %v2513_v4 = vadd.f32 %v2512_v54, %v8358_v12  ;;  %v2705_v58 = vpop.f32.mrf.mxu1  ;;  %v8783_v20 = vpack.c.bf16 %v2830_v52, %v2826_v43  ;;  %v2704_v37 = vadd.f32 %v2703_v47, %v2511_v10  ;;  %v9805_v54 = vld [vmem:[#allocation32_spill] sm:$0xff] }
 0x2a2   : > { %v2514_v57 = vpop.f32.mrf.mxu0 }
 0x2a3   : > { %v2515_v36 = vadd.f32 %v2514_v57, %v8364_v21  ;;  %v2707_v5 = vpop.f32.mrf.mxu1  ;;  %v8781_v18 = vpack.c.bf16 %v2831_v59, %v2827_v42  ;;  %v2706_v61 = vadd.f32 %v2705_v58, %v2513_v4  ;;  %v2834_v58 = vmax.f32 %v2704_v37, 0.0 }
 0x2a4   : > { %v2516_v0 = vpop.f32.mrf.mxu0 }
 0x2a5   : > { %v2708_v44 = vadd.f32 %v2707_v5, %v2515_v36  ;;  %v2517_v35 = vadd.f32 %v2516_v0, %v8358_v12  ;;  %4059 = vmatprep.mubr.bf16.mxu1 %v8781_v18  ;;  %v2709_v26 = vpop.f32.mrf.mxu1  ;;  %v2835_v59 = vmax.f32 %v2706_v61, 0.0  ;;  %v6635_v61 = vld [vmem:[%s9639_s7 + $0xb8] sm:$0xff]  }
 0x2a6   : > { %v8787_v27 = vpop.f32.mrf.mxu0  ;;  %4060 = vmatmul.mubr.bf16.gmra.mxu1 %v8783_v20  ;;  %4193 = vmatmul.mubr.bf16.gmra.mxu0 %v9804_v13  ;;  %v6641_v13 = vld [vmem:[%s9639_s7 + $0xa0] sm:$0xff]  }
 0x2a7   : > { %v2710_v21 = vadd.f32 %v2709_v26, %v2517_v35  ;;  %4202 = vmatprep.mubr.bf16.mxu0 %v9805_v54  ;;  %v2838_v52 = vmax.f32 %v2708_v44, 0.0  ;;  %v6636_v44 = vld [vmem:[%s9639_s7 + $0xf0] sm:$0xff]  }
 0x2a8   : > { %v8792_v42 = vpop.f32.mrf.mxu0 }
 0x2a9   : > { %v2839_v4 = vmax.f32 %v2710_v21, 0.0  ;;  %v8798_v47 = vpack.c.bf16 %v2838_v52, %v2834_v58 }
 0x2aa   : > { %v8794_v12 = vpop.f32.mrf.mxu0 }
 0x2ab   : > { %v8796_v43 = vpack.c.bf16 %v2839_v4, %v2835_v59 }
 0x2ac   : > { %v8800_v10 = vpop.f32.mrf.mxu0 }
 0x2ad   : > { %4069 = vmatprep.mubr.bf16.mxu1 %v8796_v43 }
 0x2ae   : > { %v8803_v57 = vpop.f32.mrf.mxu0  ;;  %4070 = vmatmul.mubr.bf16.gmra.mxu1 %v8798_v47  ;;  %4203 = vmatmul.mubr.bf16.gmra.mxu0 %v8379_v55  ;;  %v6637_v55 = vld [vmem:[%s9639_s7 + $0xb0] sm:$0xff]  }
 0x2af   : > { %4212 = vmatprep.mubr.bf16.mxu0 %v8382_v51  ;;  %4305 = vmatprep.mubr.bf16.mxu1 %v8402_v23  ;;  %v6638_v23 = vld [vmem:[%s9639_s7 + $0xe8] sm:$0xff]  }
 0x2b0   : > { %v8809_v36 = vpop.f32.mrf.mxu0 }
 0x2b2   : > { %v8811_v5 = vpop.f32.mrf.mxu0 }
 0x2b4   : > { %v8813_v0 = vpop.f32.mrf.mxu0 }
 0x2b6   : > { %v8821_v35 = vpop.f32.mrf.mxu0  ;;  %4213 = vmatmul.mubr.bf16.gmra.mxu0 %v8407_v17  ;;  %4306 = vmatmul.mubr.bf16.vlgmr.msra.gmra.mxu1 %v8411_v39  ;;  %v6639_v39 = vld [vmem:[%s9639_s7 + $0xa8] sm:$0xff]  }
 0x2b7   : > { %4222 = vmatprep.mubr.bf16.mxu0 %v8418_v49  ;;  %4315 = vmatprep.mubr.bf16.mxu1 %v8441_v28  ;;  %v6640_v49 = vld [vmem:[%s9639_s7 + $0xe0] sm:$0xff]  }
 0x2b8   : > { %v8827_v51 = vpop.f32.mrf.mxu0  ;;  %6087 = vmatpush3.bf16.msra.mxu1 %v6635_v61 }
 0x2b9   : > { %6088 = vmatprep.subr.bf16.mxu1 %v6636_v44 }
 0x2ba   : > { %v8835_v37 = vpop.f32.mrf.mxu0 }
 0x2bc   : > { %v8837_v17 = vpop.f32.mrf.mxu0  ;;  %6089 = vmatpush3.bf16.msra.mxu1 %v6637_v55 }
 0x2bd   : > { %6090 = vmatprep.subr.bf16.mxu1 %v6638_v23 }
 0x2be   : > { %v8845_v28 = vpop.f32.mrf.mxu0  ;;  %4223 = vmatmul.mubr.bf16.gmra.mxu0 %v8446_v32  ;;  %4316 = vmatmul.mubr.bf16.gmra.mxu1 %v8449_v29  ;;  %v6642_v29 = vld [vmem:[%s9639_s7 + $0xd8] sm:$0xff]  }
 0x2bf   : > { %4232 = vmatprep.mubr.bf16.mxu0 %v8451_v3  ;;  %4325 = vmatprep.mubr.bf16.mxu1 %v8482_v40  ;;  %v6643_v3 = vld [vmem:[%s9639_s7 + $0x98] sm:$0xff]  }
 0x2c0   : > { %v8851_v26 = vpop.f32.mrf.mxu0  ;;  %6091 = vmatpush3.bf16.msra.mxu1 %v6639_v39  ;;  %v8946_v39 = vld [vmem:[%s9638_s6] sm:$0xf] }
 0x2c1   : > { %6092 = vmatprep.subr.bf16.mxu1 %v6640_v49  ;;  %9812 = vst [vmem:[#allocation28_spill] sm:$0xff] %v8946_v39 }
 0x2c2   : > { %v8856_v21 = vpop.f32.mrf.mxu0 }
 0x2c4   : > { %v8858_v54 = vpop.f32.mrf.mxu0  ;;  %6093 = vmatpush3.bf16.msra.mxu1 %v6641_v13  ;;  %v9814_v13 = vld [vmem:[#allocation2_spill] sm:$0xff] }
 0x2c5   : > { %6094 = vmatprep.subr.bf16.mxu1 %v6642_v29  ;;  %v8952_v29 = vrot.slane %v8946_v39, %v9814_v13 }
 0x2c6   : > { %v8860_v32 = vpop.f32.mrf.mxu0  ;;  %4233 = vmatmul.mubr.bf16.gmra.mxu0 %v8487_v41  ;;  %4326 = vmatmul.mubr.bf16.gmra.mxu1 %v8491_v34 }
 0x2c7   : > { %4242 = vmatprep.mubr.bf16.mxu0 %v8498_v14  ;;  %4335 = vmatprep.mubr.bf16.mxu1 %v8521_v7 }
 0x2c8   : > { %v8872_v40 = vpop.f32.mrf.mxu0  ;;  %6095 = vmatpush3.bf16.msra.mxu1 %v6643_v3  ;;  %v9815_v3 = vld [vmem:[#allocation3_spill] sm:$0xff] }
 0x2ca   : > { %v8874_v52 = vpop.f32.mrf.mxu0 }
 0x2cc   : > { %v8876_v41 = vpop.f32.mrf.mxu0 }
 0x2ce   : > { %v8878_v34 = vpop.f32.mrf.mxu0  ;;  %4243 = vmatmul.mubr.bf16.gmra.mxu0 %v8526_v38  ;;  %4336 = vmatmul.mubr.bf16.gmra.mxu1 %v8529_v62  ;;  %v6644_v38 = vld [vmem:[%s9639_s7 + $0xd0] sm:$0xff]  }
 0x2cf   : > { %4252 = vmatprep.mubr.bf16.mxu0 %v8531_v53  ;;  %4345 = vmatprep.mubr.bf16.mxu1 %v8557_v6  ;;  %v6645_v62 = vld [vmem:[%s9639_s7 + $0x90] sm:$0xff]  }
 0x2d0   : > { %v8884_v14 = vpop.f32.mrf.mxu0  ;;  %6096 = vmatprep.subr.bf16.mxu1 %v6644_v38 }
 0x2d1   : > { %6097 = vmatpush3.bf16.msra.mxu1 %v6645_v62  ;;  %v6648_v62 = vld [vmem:[%s9639_s7 + $0xc0] sm:$0xff]  }
 0x2d2   : > { %v8886_v7 = vpop.f32.mrf.mxu0 }
 0x2d4   : > { %v8888_v59 = vpop.f32.mrf.mxu0 }
 0x2d6   : > { %v8890_v4 = vpop.f32.mrf.mxu0  ;;  %4253 = vmatmul.mubr.bf16.gmra.mxu0 %v8562_v16  ;;  %4346 = vmatmul.mubr.bf16.gmra.mxu1 %v8565_v19 }
 0x2d7   : > { %4262 = vmatprep.mubr.bf16.mxu0 %v8572_v46  ;;  %4355 = vmatprep.mubr.bf16.mxu1 %v8587_v45 }
 0x2d8   : > { %v8902_v53 = vpop.f32.mrf.mxu0 }
 0x2da   : > { %v8904_v6 = vpop.f32.mrf.mxu0 }
 0x2dc   : > { %v8906_v16 = vpop.f32.mrf.mxu0 }
 0x2de   : > { %v8908_v19 = vpop.f32.mrf.mxu0  ;;  %4263 = vmatmul.mubr.bf16.gmra.mxu0 %v8592_v31  ;;  %4356 = vmatmul.mubr.bf16.gmra.mxu1 %v8594_v11  ;;  %v6646_v31 = vld [vmem:[%s9639_s7 + $0xc8] sm:$0xff]  }
 0x2df   : > { %4365 = vmatprep.mubr.bf16.mxu1 %v8613_v63  ;;  %v6647_v11 = vld [vmem:[%s9639_s7 + $0x88] sm:$0xff]   ;;  %6098 = vmatprep.subr.bf16.mxu1 %v6646_v31  ;;  %v6649_v31 = vld [vmem:[%s9639_s7 + $0x80] sm:$0xff]  }
 0x2e0   : > { %v8913_v46 = vpop.f32.mrf.mxu0  ;;  %6099 = vmatpush3.bf16.msra.mxu1 %v6647_v11 }
 0x2e1   : > { %6100 = vmatprep.subr.bf16.mxu1 %v6648_v62 }
 0x2e2   : > { %v8915_v45 = vpop.f32.mrf.mxu0 }
 0x2e4   : > { %v8917_v58 = vpop.f32.mrf.mxu0  ;;  %6101 = vmatpush3.bf16.msra.mxu1 %v6649_v31 }
 0x2e6   : > { %v8919_v61 = vpop.f32.mrf.mxu0  ;;  %4366 = vmatmul.mubr.bf16.gmra.mxu1 %v8621_v1 }
 0x2e7   : > { %9806 = vst [vmem:[#allocation20_spill] sm:$0xff] %v8919_v61  ;;  %4375 = vmatprep.mubr.bf16.mxu1 %v8649_v30 }
 0x2e8   : > { %v8929_v63 = vpop.f32.mrf.mxu0 }
 0x2ea   : > { %v8931_v44 = vpop.f32.mrf.mxu0 }
 0x2eb   : > { %9807 = vst [vmem:[#allocation25_spill] sm:$0xff] %v8931_v44 }
 0x2ec   : > { %v8933_v55 = vpop.f32.mrf.mxu0 }
 0x2ed   : > { %9808 = vst [vmem:[#allocation7_spill] sm:$0xff] %v8933_v55 }
 0x2ee   : > { %v8935_v23 = vpop.f32.mrf.mxu0  ;;  %4376 = vmatmul.mubr.bf16.gmra.mxu1 %v8657_v2  ;;  %v8956_v2 = vrot.slane %v8946_v39, %v9815_v3  ;;  %v3731_v3 = vadd.f32 %v8792_v42, %v8952_v29 }
 0x2ef   : > { %9809 = vst [vmem:[#allocation29_spill] sm:$0xff] %v8935_v23  ;;  %4385 = vmatprep.mubr.bf16.mxu1 %v8682_v9 }
 0x2f0   : > { %v8939_v1 = vpop.f32.mrf.mxu0  ;;  %v3733_v39 = vadd.f32 %v8794_v12, %v8956_v2 }
 0x2f1   : > { %9810 = vst [vmem:[#allocation13_spill] sm:$0xff] %v8939_v1 }
 0x2f2   : > { %v8941_v30 = vpop.f32.mrf.mxu0 }
 0x2f3   : > { %9811 = vst [vmem:[#allocation30_spill] sm:$0xff] %v8941_v30 }
 0x2f4   : > { %v8948_v49 = vpop.f32.mrf.mxu0 }
 0x2f5   : > { %9813 = vst [vmem:[#allocation9_spill] sm:$0xff] %v8948_v49  ;;  %v3735_v49 = vadd.f32 %v8800_v10, %v8952_v29 }
 0x2f6   : > { %v8958_v9 = vpop.f32.mrf.mxu0  ;;  %v3921_v38 = vpop.f32.mrf.mxu1  ;;  %4386 = vmatmul.mubr.bf16.gmra.mxu1 %v8687_v60  ;;  %v3729_v60 = vadd.f32 %v8787_v27, %v8956_v2 }
 0x2f7   : > { %9816 = vst [vmem:[#allocation10_spill] sm:$0xff] %v8958_v9  ;;  %4395 = vmatprep.mubr.bf16.mxu1 %v8706_v15 }
 0x2f8   : > { %v8968_v11 = vpop.f32.mrf.mxu0  ;;  %v3923_v13 = vpop.f32.mrf.mxu1  ;;  %v3922_v30 = vadd.f32 %v3921_v38, %v3729_v60  ;;  %v3739_v38 = vadd.f32 %v8803_v57, %v8956_v2 }
 0x2f9   : > { %9817 = vst [vmem:[#allocation11_spill] sm:$0xff] %v8968_v11  ;;  %v3924_v23 = vadd.f32 %v3923_v13, %v3731_v3 }
 0x2fa   : > { %v8976_v15 = vpop.f32.mrf.mxu0  ;;  %v3925_v9 = vpop.f32.mrf.mxu1  ;;  %v4466_v31 = vmax.f32 %v3922_v30, 0.0 }
 0x2fb   : > { %9818 = vst [vmem:[#allocation12_spill] sm:$0xff] %v8976_v15  ;;  %v3926_v11 = vadd.f32 %v3925_v9, %v3733_v39  ;;  %v4467_v27 = vmax.f32 %v3924_v23, 0.0  ;;  %v3741_v39 = vadd.f32 %v8809_v36, %v8952_v29 }
 0x2fc   : > { %v8980_v1 = vpop.f32.mrf.mxu0  ;;  %v3927_v42 = vpop.f32.mrf.mxu1 }
 0x2fd   : > { %v3928_v55 = vadd.f32 %v3927_v42, %v3735_v49  ;;  %v4470_v61 = vmax.f32 %v3926_v11, 0.0  ;;  %v3743_v49 = vadd.f32 %v8811_v5, %v8956_v2 }
 0x2fe   : > { %v8982_v12 = vpop.f32.mrf.mxu0  ;;  %v3931_v62 = vpop.f32.mrf.mxu1  ;;  %4396 = vmatmul.mubr.bf16.gmra.mxu1 %v8711_v24 }
 0x2ff   : > { %v4471_v15 = vmax.f32 %v3928_v55, 0.0  ;;  %4405 = vmatprep.mubr.bf16.mxu1 %v8730_v48  ;;  %v4594_v11 = vpack.c.bf16 %v4470_v61, %v4466_v31  ;;  %v3745_v48 = vadd.f32 %v8813_v0, %v8952_v29  ;;  %v3932_v13 = vadd.f32 %v3931_v62, %v3739_v38 }
 0x300   : > { %v8986_v44 = vpop.f32.mrf.mxu0  ;;  %v3933_v10 = vpop.f32.mrf.mxu1  ;;  %v3751_v62 = vadd.f32 %v8827_v51, %v8952_v29 }
 0x301   : > { %v4595_v9 = vpack.c.bf16 %v4471_v15, %v4467_v27  ;;  %v3934_v23 = vadd.f32 %v3933_v10, %v3741_v39  ;;  %v4474_v0 = vmax.f32 %v3932_v13, 0.0  ;;  %v3753_v10 = vadd.f32 %v8835_v37, %v8956_v2 }
 0x302   : > { %v8994_v24 = vpop.f32.mrf.mxu0  ;;  %v3935_v55 = vpop.f32.mrf.mxu1 }
 0x303   : > { %v3936_v30 = vadd.f32 %v3935_v55, %v3743_v49  ;;  %4953 = vmatprep.mubr.bf16.mxu0 %v4595_v9  ;;  %v4475_v61 = vmax.f32 %v3934_v23, 0.0  ;;  %v3749_v49 = vadd.f32 %v8821_v35, %v8956_v2 }
 0x304   : > { %v8998_v3 = vpop.f32.mrf.mxu0  ;;  %v3937_v36 = vpop.f32.mrf.mxu1  ;;  %4954 = vmatmul.mubr.bf16.vlgmr.msra.gmra.mxu0 %v4594_v11 }
 0x305   : > { %v3938_v5 = vadd.f32 %v3937_v36, %v3745_v48  ;;  %v4478_v60 = vmax.f32 %v3936_v30, 0.0 }
 0x306   : > { %v9000_v15 = vpop.f32.mrf.mxu0  ;;  %v3941_v57 = vpop.f32.mrf.mxu1  ;;  %4406 = vmatmul.mubr.bf16.gmra.mxu1 %v8732_v25 }
 0x307   : > { %v4479_v42 = vmax.f32 %v3938_v5, 0.0  ;;  %4415 = vmatprep.mubr.bf16.mxu1 %v8745_v8  ;;  %v4598_v9 = vpack.c.bf16 %v4478_v60, %v4474_v0  ;;  %v3755_v8 = vadd.f32 %v8837_v17, %v8952_v29  ;;  %v3942_v48 = vadd.f32 %v3941_v57, %v3749_v49 }
 0x308   : > { %v9004_v27 = vpop.f32.mrf.mxu0  ;;  %v3943_v31 = vpop.f32.mrf.mxu1  ;;  %v3761_v57 = vadd.f32 %v8851_v26, %v8952_v29 }
 0x309   : > { %v4599_v39 = vpack.c.bf16 %v4479_v42, %v4475_v61  ;;  %v3944_v11 = vadd.f32 %v3943_v31, %v3751_v62  ;;  %v4482_v17 = vmax.f32 %v3942_v48, 0.0  ;;  %v3763_v42 = vadd.f32 %v8856_v21, %v8956_v2 }
 0x30a   : > { %v9012_v25 = vpop.f32.mrf.mxu0  ;;  %v3945_v38 = vpop.f32.mrf.mxu1  ;;  %v3759_v31 = vadd.f32 %v8845_v28, %v8956_v2 }
 0x30b   : > { %v3946_v55 = vadd.f32 %v3945_v38, %v3753_v10  ;;  %4961 = vmatprep.mubr.bf16.mxu0 %v4599_v39  ;;  %v4483_v36 = vmax.f32 %v3944_v11, 0.0 }
 0x30c   : > { %v9016_v23 = vpop.f32.mrf.mxu0  ;;  %v3947_v51 = vpop.f32.mrf.mxu1  ;;  %4962 = vmatmul.mubr.bf16.gmra.mxu0 %v4598_v9 }
 0x30d   : > { %v3948_v37 = vadd.f32 %v3947_v51, %v3755_v8  ;;  %v4486_v30 = vmax.f32 %v3946_v55, 0.0 }
 0x30e   : > { %v9018_v13 = vpop.f32.mrf.mxu0  ;;  %v3951_v35 = vpop.f32.mrf.mxu1  ;;  %4416 = vmatmul.mubr.bf16.gmra.mxu1 %v8747_v50 }
 0x30f   : > { %v4487_v5 = vmax.f32 %v3948_v37, 0.0  ;;  %4425 = vmatprep.mubr.bf16.mxu1 %v8757_v22  ;;  %v4602_v62 = vpack.c.bf16 %v4486_v30, %v4482_v17  ;;  %v3765_v22 = vadd.f32 %v8858_v54, %v8952_v29  ;;  %v3952_v9 = vadd.f32 %v3951_v35, %v3759_v31 }
 0x310   : > { %v9022_v60 = vpop.f32.mrf.mxu0  ;;  %v3953_v61 = vpop.f32.mrf.mxu1  ;;  %v3771_v30 = vadd.f32 %v8872_v40, %v8952_v29  ;;  %v3773_v35 = vadd.f32 %v8874_v52, %v8956_v2 }
 0x311   : > { %v4603_v0 = vpack.c.bf16 %v4487_v5, %v4483_v36  ;;  %v3954_v39 = vadd.f32 %v3953_v61, %v3761_v57  ;;  %v4490_v54 = vmax.f32 %v3952_v9, 0.0  ;;  %v3769_v5 = vadd.f32 %v8860_v32, %v8956_v2 }
 0x312   : > { %v9030_v50 = vpop.f32.mrf.mxu0  ;;  %v3955_v10 = vpop.f32.mrf.mxu1 }
 0x313   : > { %v3956_v49 = vadd.f32 %v3955_v10, %v3763_v42  ;;  %4969 = vmatprep.mubr.bf16.mxu0 %v4603_v0  ;;  %v4491_v55 = vmax.f32 %v3954_v39, 0.0 }
 0x314   : > { %v9034_v38 = vpop.f32.mrf.mxu0  ;;  %v3957_v26 = vpop.f32.mrf.mxu1  ;;  %4970 = vmatmul.mubr.bf16.gmra.mxu0 %v4602_v62 }
 0x315   : > { %v3958_v21 = vadd.f32 %v3957_v26, %v3765_v22  ;;  %v4494_v8 = vmax.f32 %v3956_v49, 0.0  ;;  %v9819_v22 = vld [vmem:[#allocation6_spill] sm:$0xff] }
 0x316   : > { %v9036_v11 = vpop.f32.mrf.mxu0  ;;  %v3961_v28 = vpop.f32.mrf.mxu1  ;;  %4426 = vmatmul.mubr.bf16.gmra.mxu1 %v8759_v56 }
 0x317   : > { %v4495_v48 = vmax.f32 %v3958_v21, 0.0  ;;  %4435 = vmatprep.mubr.bf16.mxu1 %v8769_v33  ;;  %v4606_v17 = vpack.c.bf16 %v4494_v8, %v4490_v54  ;;  %v3775_v33 = vadd.f32 %v8876_v41, %v8952_v29  ;;  %v3962_v0 = vadd.f32 %v3961_v28, %v3769_v5 }
 0x318   : > { %v9040_v51 = vpop.f32.mrf.mxu0  ;;  %v3963_v37 = vpop.f32.mrf.mxu1  ;;  %v3781_v21 = vadd.f32 %v8884_v14, %v8952_v29  ;;  %v3783_v8 = vadd.f32 %v8886_v7, %v8956_v2 }
 0x319   : > { %v4607_v36 = vpack.c.bf16 %v4495_v48, %v4491_v55  ;;  %v3964_v57 = vadd.f32 %v3963_v37, %v3771_v30  ;;  %v4498_v41 = vmax.f32 %v3962_v0, 0.0  ;;  %v3779_v55 = vadd.f32 %v8878_v34, %v8956_v2 }
 0x31a   : > { %v9048_v56 = vpop.f32.mrf.mxu0  ;;  %v3965_v61 = vpop.f32.mrf.mxu1 }
 0x31b   : > { %v3966_v42 = vadd.f32 %v3965_v61, %v3773_v35  ;;  %4977 = vmatprep.mubr.bf16.mxu0 %v4607_v36  ;;  %v4499_v39 = vmax.f32 %v3964_v57, 0.0 }
 0x31c   : > { %v9052_v31 = vpop.f32.mrf.mxu0  ;;  %v3967_v40 = vpop.f32.mrf.mxu1  ;;  %4978 = vmatmul.mubr.bf16.gmra.mxu0 %v4606_v17 }
 0x31d   : > { %v3968_v52 = vadd.f32 %v3967_v40, %v3775_v33  ;;  %v4502_v62 = vmax.f32 %v3966_v42, 0.0  ;;  %v3791_v40 = vadd.f32 %v8902_v53, %v8952_v29 }
 0x31e   : > { %v9054_v10 = vpop.f32.mrf.mxu0  ;;  %v3971_v32 = vpop.f32.mrf.mxu1  ;;  %4436 = vmatmul.mubr.bf16.gmra.mxu1 %v9819_v22 }
 0x31f   : > { %v4503_v49 = vmax.f32 %v3968_v52, 0.0  ;;  %4445 = vmatprep.mubr.bf16.mxu1 %v8781_v18  ;;  %v4610_v48 = vpack.c.bf16 %v4502_v62, %v4498_v41  ;;  %v3785_v18 = vadd.f32 %v8888_v59, %v8952_v29  ;;  %v3972_v36 = vadd.f32 %v3971_v32, %v3779_v55 }
 0x320   : > { %v9058_v9 = vpop.f32.mrf.mxu0  ;;  %v3973_v26 = vpop.f32.mrf.mxu1  ;;  %v3793_v52 = vadd.f32 %v8904_v6, %v8956_v2  ;;  %v3789_v32 = vadd.f32 %v8890_v4, %v8956_v2 }
 0x321   : > { %v4611_v28 = vpack.c.bf16 %v4503_v49, %v4499_v39  ;;  %v3974_v30 = vadd.f32 %v3973_v26, %v3781_v21  ;;  %v4506_v59 = vmax.f32 %v3972_v36, 0.0 }
 0x322   : > { %v9066_v54 = vpop.f32.mrf.mxu0  ;;  %v3975_v37 = vpop.f32.mrf.mxu1 }
 0x323   : > { %v3976_v35 = vadd.f32 %v3975_v37, %v3783_v8  ;;  %4985 = vmatprep.mubr.bf16.mxu0 %v4611_v28  ;;  %v4507_v34 = vmax.f32 %v3974_v30, 0.0  ;;  %v3801_v30 = vadd.f32 %v8913_v46, %v8952_v29 }
 0x324   : > { %v9070_v5 = vpop.f32.mrf.mxu0  ;;  %v3977_v14 = vpop.f32.mrf.mxu1  ;;  %4986 = vmatmul.mubr.bf16.gmra.mxu0 %v4610_v48 }
 0x325   : > { %v3978_v7 = vadd.f32 %v3977_v14, %v3785_v18  ;;  %v4510_v17 = vmax.f32 %v3976_v35, 0.0  ;;  %v3803_v35 = vadd.f32 %v8915_v45, %v8956_v2  ;;  %v3799_v14 = vadd.f32 %v8908_v19, %v8956_v2 }
 0x326   : > { %v3981_v61 = vpop.f32.mrf.mxu1  ;;  %v9072_v33 = vpop.f32.mrf.mxu0  ;;  %4446 = vmatmul.mubr.bf16.gmra.mxu1 %v8783_v20 }
 0x327   : > { %v4511_v57 = vmax.f32 %v3978_v7, 0.0  ;;  %4455 = vmatprep.mubr.bf16.mxu1 %v8796_v43  ;;  %v4614_v22 = vpack.c.bf16 %v4510_v17, %v4506_v59  ;;  %v3795_v43 = vadd.f32 %v8906_v16, %v8952_v29  ;;  %v3982_v26 = vadd.f32 %v3981_v61, %v3789_v32 }
 0x328   : > { %v3983_v42 = vpop.f32.mrf.mxu1  ;;  %v9076_v0 = vpop.f32.mrf.mxu0 }
 0x329   : > { %v4615_v62 = vpack.c.bf16 %v4511_v57, %v4507_v34  ;;  %v3984_v49 = vadd.f32 %v3983_v42, %v3791_v40  ;;  %v4514_v37 = vmax.f32 %v3982_v26, 0.0 }
 0x32a   : > { %v3985_v20 = vpop.f32.mrf.mxu1  ;;  %v9084_v39 = vpop.f32.mrf.mxu0 }
 0x32b   : > { %v3986_v41 = vadd.f32 %v3985_v20, %v3793_v52  ;;  %4993 = vmatprep.mubr.bf16.mxu0 %v4615_v62  ;;  %v4515_v4 = vmax.f32 %v3984_v49, 0.0  ;;  %v9820_v49 = vld [vmem:[#allocation25_spill] sm:$0xff] }
 0x32c   : > { %v3987_v21 = vpop.f32.mrf.mxu1  ;;  %v9088_v53 = vpop.f32.mrf.mxu0  ;;  %4994 = vmatmul.mubr.bf16.gmra.mxu0 %v4614_v22 }
 0x32d   : > { %v3988_v6 = vadd.f32 %v3987_v21, %v3795_v43  ;;  %v4518_v8 = vmax.f32 %v3986_v41, 0.0  ;;  %v3813_v41 = vadd.f32 %v9820_v49, %v8956_v2  ;;  %v9821_v21 = vld [vmem:[#allocation20_spill] sm:$0xff] }
 0x32e   : > { %v3991_v28 = vpop.f32.mrf.mxu1  ;;  %v9090_v55 = vpop.f32.mrf.mxu0  ;;  %4456 = vmatmul.mubr.bf16.gmra.mxu1 %v8798_v47  ;;  %v3805_v47 = vadd.f32 %v8917_v58, %v8952_v29  ;;  %v3811_v58 = vadd.f32 %v8929_v63, %v8952_v29 }
 0x32f   : > { %v4519_v48 = vmax.f32 %v3988_v6, 0.0  ;;  %v4618_v7 = vpack.c.bf16 %v4518_v8, %v4514_v37  ;;  %v3992_v59 = vadd.f32 %v3991_v28, %v3799_v14  ;;  %v3809_v6 = vadd.f32 %v9821_v21, %v8956_v2  ;;  %v9826_v21 = vld [vmem:[#allocation9_spill] sm:$0xff] }
 0x330   : > { %v3993_v18 = vpop.f32.mrf.mxu1  ;;  %v9093_v16 = vpop.f32.mrf.mxu0 }
 0x331   : > { %v4619_v36 = vpack.c.bf16 %v4519_v48, %v4515_v4  ;;  %v3994_v34 = vadd.f32 %v3993_v18, %v3801_v30  ;;  %v4522_v22 = vmax.f32 %v3992_v59, 0.0  ;;  %v9822_v48 = vld [vmem:[#allocation7_spill] sm:$0xff] }
 0x332   : > { %v3995_v17 = vpop.f32.mrf.mxu1  ;;  %v9101_v61 = vpop.f32.mrf.mxu0  ;;  %v3815_v37 = vadd.f32 %v9822_v48, %v8952_v29 }
 0x333   : > { %v3996_v57 = vadd.f32 %v3995_v17, %v3803_v35  ;;  %5001 = vmatprep.mubr.bf16.mxu0 %v4619_v36  ;;  %v4523_v19 = vmax.f32 %v3994_v34, 0.0 }
 0x334   : > { %v3997_v42 = vpop.f32.mrf.mxu1  ;;  %v9105_v46 = vpop.f32.mrf.mxu0  ;;  %5002 = vmatmul.mubr.bf16.gmra.mxu0 %v4618_v7 }
 0x335   : > { %v3998_v45 = vadd.f32 %v3997_v42, %v3805_v47  ;;  %v4526_v40 = vmax.f32 %v3996_v57, 0.0 }
 0x336   : > { %v4001_v52 = vpop.f32.mrf.mxu1  ;;  %v9107_v62 = vpop.f32.mrf.mxu0 }
 0x337   : > { %v4527_v32 = vmax.f32 %v3998_v45, 0.0  ;;  %v4622_v8 = vpack.c.bf16 %v4526_v40, %v4522_v22  ;;  %v4002_v35 = vadd.f32 %v4001_v52, %v3809_v6  ;;  %v9823_v40 = vld [vmem:[#allocation13_spill] sm:$0xff]  ;;  %v9824_v52 = vld [vmem:[#allocation30_spill] sm:$0xff]  ;;  %v3825_v6 = vadd.f32 %v9826_v21, %v8952_v29 }
 0x338   : > { %v4003_v20 = vpop.f32.mrf.mxu1  ;;  %v9109_v43 = vpop.f32.mrf.mxu0  ;;  %v3835_v21 = vadd.f32 %v8980_v1, %v8952_v29  ;;  %v3841_v1 = vadd.f32 %v8986_v44, %v8952_v29 }
 0x339   : > { %v4623_v26 = vpack.c.bf16 %v4527_v32, %v4523_v19  ;;  %v4004_v18 = vadd.f32 %v4003_v20, %v3811_v58  ;;  %v4530_v59 = vmax.f32 %v4002_v35, 0.0  ;;  %v3821_v19 = vadd.f32 %v9823_v40, %v8952_v29  ;;  %v9825_v20 = vld [vmem:[#allocation29_spill] sm:$0xff] }
 0x33a   : > { %v4005_v28 = vpop.f32.mrf.mxu1  ;;  %v9117_v4 = vpop.f32.mrf.mxu0  ;;  %v3823_v32 = vadd.f32 %v9824_v52, %v8956_v2  ;;  %v3819_v58 = vadd.f32 %v9825_v20, %v8956_v2 }
 0x33b   : > { %v4006_v30 = vadd.f32 %v4005_v28, %v3813_v41  ;;  %5009 = vmatprep.mubr.bf16.mxu0 %v4623_v26  ;;  %v4531_v34 = vmax.f32 %v4004_v18, 0.0 }
 0x33c   : > { %v4007_v36 = vpop.f32.mrf.mxu1  ;;  %v9121_v63 = vpop.f32.mrf.mxu0  ;;  %5010 = vmatmul.mubr.bf16.gmra.mxu0 %v4622_v8 }
 0x33d   : > { %v4008_v14 = vadd.f32 %v4007_v36, %v3815_v37  ;;  %v4534_v7 = vmax.f32 %v4006_v30, 0.0 }
 0x33e   : > { %v4011_v17 = vpop.f32.mrf.mxu1  ;;  %v9123_v47 = vpop.f32.mrf.mxu0 }
 0x33f   : > { %v4535_v57 = vmax.f32 %v4008_v14, 0.0  ;;  %v4626_v49 = vpack.c.bf16 %v4534_v7, %v4530_v59  ;;  %v4012_v48 = vadd.f32 %v4011_v17, %v3819_v58  ;;  %v9829_v17 = vld [vmem:[#allocation12_spill] sm:$0xff] }
 0x340   : > { %v4013_v42 = vpop.f32.mrf.mxu1  ;;  %v9125_v45 = vpop.f32.mrf.mxu0  ;;  %v3833_v52 = vadd.f32 %v9829_v17, %v8956_v2 }
 0x341   : > { %v4627_v22 = vpack.c.bf16 %v4535_v57, %v4531_v34  ;;  %v4014_v8 = vadd.f32 %v4013_v42, %v3821_v19  ;;  %v4538_v57 = vmax.f32 %v4012_v48, 0.0  ;;  %v9828_v42 = vld [vmem:[#allocation11_spill] sm:$0xff] }
 0x342   : > { %v4015_v41 = vpop.f32.mrf.mxu1  ;;  %v9133_v26 = vpop.f32.mrf.mxu0  ;;  %v3831_v19 = vadd.f32 %v9828_v42, %v8952_v29 }
 0x343   : > { %v4016_v28 = vadd.f32 %v4015_v41, %v3823_v32  ;;  %5017 = vmatprep.mubr.bf16.mxu0 %v4627_v22  ;;  %v4539_v7 = vmax.f32 %v4014_v8, 0.0  ;;  %v9830_v22 = vld [vmem:[#allocation10_spill] sm:$0xff] }
 0x344   : > { %v4017_v37 = vpop.f32.mrf.mxu1  ;;  %v9137_v18 = vpop.f32.mrf.mxu0  ;;  %5018 = vmatmul.mubr.bf16.gmra.mxu0 %v4626_v49  ;;  %v3829_v20 = vadd.f32 %v9830_v22, %v8956_v2 }
 0x345   : > { %v4018_v30 = vadd.f32 %v4017_v37, %v3825_v6  ;;  %v4542_v35 = vmax.f32 %v4016_v28, 0.0 }
 0x346   : > { %v4021_v36 = vpop.f32.mrf.mxu1  ;;  %v9139_v14 = vpop.f32.mrf.mxu0 }
 0x347   : > { %9827 = vst [vmem:[#allocation14_spill] sm:$0xff] %v9139_v14  ;;  %v4543_v34 = vmax.f32 %v4018_v30, 0.0  ;;  %v4630_v58 = vpack.c.bf16 %v4542_v35, %v4538_v57  ;;  %v4022_v28 = vadd.f32 %v4021_v36, %v3829_v20  ;;  %v3843_v36 = vadd.f32 %v8994_v24, %v8956_v2 }
 0x348   : > { %v4023_v59 = vpop.f32.mrf.mxu1  ;;  %v9141_v40 = vpop.f32.mrf.mxu0 }
 0x349   : > { %v4631_v32 = vpack.c.bf16 %v4543_v34, %v4539_v7  ;;  %v4024_v6 = vadd.f32 %v4023_v59, %v3831_v19  ;;  %v4546_v17 = vmax.f32 %v4022_v28, 0.0  ;;  %v3839_v19 = vadd.f32 %v8982_v12, %v8956_v2 }
 0x34a   : > { %v4025_v49 = vpop.f32.mrf.mxu1  ;;  %v9149_v41 = vpop.f32.mrf.mxu0 }
 0x34b   : > { %v4026_v8 = vadd.f32 %v4025_v49, %v3833_v52  ;;  %5025 = vmatprep.mubr.bf16.mxu0 %v4631_v32  ;;  %v4547_v35 = vmax.f32 %v4024_v6, 0.0 }
 0x34c   : > { %v4027_v48 = vpop.f32.mrf.mxu1  ;;  %v9153_v37 = vpop.f32.mrf.mxu0  ;;  %5026 = vmatmul.mubr.bf16.gmra.mxu0 %v4630_v58  ;;  %v3845_v58 = vadd.f32 %v8998_v3, %v8952_v29  ;;  %v3851_v3 = vadd.f32 %v9004_v27, %v8952_v29 }
 0x34d   : > { %v4028_v30 = vadd.f32 %v4027_v48, %v3835_v21  ;;  %v4550_v7 = vmax.f32 %v4026_v8, 0.0 }
 0x34e   : > { %v4031_v34 = vpop.f32.mrf.mxu1  ;;  %v9155_v42 = vpop.f32.mrf.mxu0 }
 0x34f   : > { %v4551_v57 = vmax.f32 %v4028_v30, 0.0  ;;  %v4634_v52 = vpack.c.bf16 %v4550_v7, %v4546_v17  ;;  %v4032_v6 = vadd.f32 %v4031_v34, %v3839_v19  ;;  %v3853_v34 = vadd.f32 %v9012_v25, %v8956_v2 }
 0x350   : > { %v4033_v22 = vpop.f32.mrf.mxu1  ;;  %v9157_v14 = vpop.f32.mrf.mxu0 }
 0x351   : > { %v4635_v59 = vpack.c.bf16 %v4551_v57, %v4547_v35  ;;  %v4034_v49 = vadd.f32 %v4033_v22, %v3841_v1  ;;  %v4554_v35 = vmax.f32 %v4032_v6, 0.0  ;;  %v3849_v1 = vadd.f32 %v9000_v15, %v8956_v2 }
 0x352   : > { %v4035_v32 = vpop.f32.mrf.mxu1  ;;  %v9165_v20 = vpop.f32.mrf.mxu0 }
 0x353   : > { %v4036_v21 = vadd.f32 %v4035_v32, %v3843_v36  ;;  %5033 = vmatprep.mubr.bf16.mxu0 %v4635_v59  ;;  %v4555_v12 = vmax.f32 %v4034_v49, 0.0 }
 0x354   : > { %v4037_v8 = vpop.f32.mrf.mxu1  ;;  %v9169_v44 = vpop.f32.mrf.mxu0  ;;  %5034 = vmatmul.mubr.bf16.gmra.mxu0 %v4634_v52  ;;  %v3855_v52 = vadd.f32 %v9016_v23, %v8952_v29  ;;  %v3861_v23 = vadd.f32 %v9022_v60, %v8952_v29 }
 0x355   : > { %v4038_v24 = vadd.f32 %v4037_v8, %v3845_v58  ;;  %v4558_v28 = vmax.f32 %v4036_v21, 0.0 }
 0x356   : > { %v4041_v48 = vpop.f32.mrf.mxu1  ;;  %v9171_v30 = vpop.f32.mrf.mxu0 }
 0x357   : > { %v4559_v7 = vmax.f32 %v4038_v24, 0.0  ;;  %v4638_v36 = vpack.c.bf16 %v4558_v28, %v4554_v35  ;;  %v4042_v49 = vadd.f32 %v4041_v48, %v3849_v1  ;;  %v3863_v48 = vadd.f32 %v9030_v50, %v8956_v2 }
 0x358   : > { %v4043_v57 = vpop.f32.mrf.mxu1  ;;  %v9173_v17 = vpop.f32.mrf.mxu0 }
 0x359   : > { %v4639_v22 = vpack.c.bf16 %v4559_v7, %v4555_v12  ;;  %v4044_v32 = vadd.f32 %v4043_v57, %v3851_v3  ;;  %v4562_v12 = vmax.f32 %v4042_v49, 0.0  ;;  %v3859_v3 = vadd.f32 %v9018_v13, %v8956_v2 }
 0x35a   : > { %v4045_v59 = vpop.f32.mrf.mxu1  ;;  %v9181_v19 = vpop.f32.mrf.mxu0 }
 0x35b   : > { %v4046_v58 = vadd.f32 %v4045_v59, %v3853_v34  ;;  %5041 = vmatprep.mubr.bf16.mxu0 %v4639_v22  ;;  %v4563_v15 = vmax.f32 %v4044_v32, 0.0 }
 0x35c   : > { %v4047_v21 = vpop.f32.mrf.mxu1  ;;  %v9185_v27 = vpop.f32.mrf.mxu0  ;;  %5042 = vmatmul.mubr.bf16.gmra.mxu0 %v4638_v36  ;;  %v3865_v36 = vadd.f32 %v9034_v38, %v8952_v29  ;;  %v3871_v38 = vadd.f32 %v9040_v51, %v8952_v29 }
 0x35d   : > { %v4048_v25 = vadd.f32 %v4047_v21, %v3855_v52  ;;  %v4566_v6 = vmax.f32 %v4046_v58, 0.0 }
 0x35e   : > { %v4051_v8 = vpop.f32.mrf.mxu1  ;;  %v9187_v24 = vpop.f32.mrf.mxu0 }
 0x35f   : > { %v4567_v28 = vmax.f32 %v4048_v25, 0.0  ;;  %v4642_v34 = vpack.c.bf16 %v4566_v6, %v4562_v12  ;;  %v4052_v32 = vadd.f32 %v4051_v8, %v3859_v3  ;;  %v3873_v8 = vadd.f32 %v9048_v56, %v8956_v2 }
 0x360   : > { %v4053_v7 = vpop.f32.mrf.mxu1  ;;  %v9189_v35 = vpop.f32.mrf.mxu0 }
 0x361   : > { %v4643_v57 = vpack.c.bf16 %v4567_v28, %v4563_v15  ;;  %v4054_v59 = vadd.f32 %v4053_v7, %v3861_v23  ;;  %v4570_v15 = vmax.f32 %v4052_v32, 0.0  ;;  %v3869_v23 = vadd.f32 %v9036_v11, %v8956_v2 }
 0x362   : > { %v4055_v22 = vpop.f32.mrf.mxu1  ;;  %v9197_v1 = vpop.f32.mrf.mxu0 }
 0x363   : > { %v4056_v52 = vadd.f32 %v4055_v22, %v3863_v48  ;;  %5049 = vmatprep.mubr.bf16.mxu0 %v4643_v57  ;;  %v4571_v13 = vmax.f32 %v4054_v59, 0.0 }
 0x364   : > { %v4057_v58 = vpop.f32.mrf.mxu1  ;;  %v9201_v60 = vpop.f32.mrf.mxu0  ;;  %5050 = vmatmul.mubr.bf16.gmra.mxu0 %v4642_v34  ;;  %v3875_v34 = vadd.f32 %v9052_v31, %v8952_v29  ;;  %v3881_v31 = vadd.f32 %v9058_v9, %v8952_v29 }
 0x365   : > { %v4058_v50 = vadd.f32 %v4057_v58, %v3865_v36  ;;  %v4574_v49 = vmax.f32 %v4056_v52, 0.0 }
 0x366   : > { %v4061_v21 = vpop.f32.mrf.mxu1  ;;  %v9203_v25 = vpop.f32.mrf.mxu0 }
 0x367   : > { %v4575_v6 = vmax.f32 %v4058_v50, 0.0  ;;  %v4646_v48 = vpack.c.bf16 %v4574_v49, %v4570_v15  ;;  %v4062_v59 = vadd.f32 %v4061_v21, %v3869_v23  ;;  %v3883_v21 = vadd.f32 %v9066_v54, %v8956_v2  ;;  %v9831_v54 = vld [vmem:[#allocation4_spill] sm:$0xff] }
 0x368   : > { %v4063_v28 = vpop.f32.mrf.mxu1  ;;  %v9205_v12 = vpop.f32.mrf.mxu0 }
 0x369   : > { %v4647_v7 = vpack.c.bf16 %v4575_v6, %v4571_v13  ;;  %v4064_v22 = vadd.f32 %v4063_v28, %v3871_v38  ;;  %v4578_v13 = vmax.f32 %v4062_v59, 0.0  ;;  %v3879_v38 = vadd.f32 %v9054_v10, %v8956_v2  ;;  %v9832_v59 = vld [vmem:[#allocation28_spill] sm:$0xff]  ;;  %v9833_v10 = vld [vmem:[#allocation5_spill] sm:$0xff] }
 0x36a   : > { %v4065_v57 = vpop.f32.mrf.mxu1  ;;  %v9213_v3 = vpop.f32.mrf.mxu0 }
 0x36b   : > { %v4066_v36 = vadd.f32 %v4065_v57, %v3873_v8  ;;  %5057 = vmatprep.mubr.bf16.mxu0 %v4647_v7  ;;  %v4579_v11 = vmax.f32 %v4064_v22, 0.0 }
 0x36c   : > { %v4067_v52 = vpop.f32.mrf.mxu1  ;;  %v9217_v51 = vpop.f32.mrf.mxu0  ;;  %5058 = vmatmul.mubr.bf16.gmra.mxu0 %v4646_v48  ;;  %v3885_v48 = vadd.f32 %v9070_v5, %v8952_v29 }
 0x36d   : > { %v4068_v56 = vadd.f32 %v4067_v52, %v3875_v34  ;;  %v4582_v32 = vmax.f32 %v4066_v36, 0.0  ;;  %v9237_v52 = vrot.slane %v9832_v59, %v9831_v54 }
 0x36e   : > { %v4071_v58 = vpop.f32.mrf.mxu1  ;;  %v9219_v50 = vpop.f32.mrf.mxu0 }
 0x36f   : > { %v4583_v49 = vmax.f32 %v4068_v56, 0.0  ;;  %v4650_v8 = vpack.c.bf16 %v4582_v32, %v4578_v13  ;;  %v4072_v22 = vadd.f32 %v4071_v58, %v3879_v38  ;;  %v9241_v56 = vrot.slane %v9832_v59, %v9833_v10 }
 0x370   : > { %v4073_v6 = vpop.f32.mrf.mxu1  ;;  %v9221_v15 = vpop.f32.mrf.mxu0 }
 0x371   : > { %v4651_v28 = vpack.c.bf16 %v4583_v49, %v4579_v11  ;;  %v4074_v57 = vadd.f32 %v4073_v6, %v3881_v31  ;;  %v4586_v58 = vmax.f32 %v4072_v22, 0.0  ;;  %v4117_v31 = vadd.f32 %v9076_v0, %v9237_v52 }
 0x372   : > { %v4075_v7 = vpop.f32.mrf.mxu1  ;;  %v9229_v23 = vpop.f32.mrf.mxu0  ;;  %v4115_v38 = vadd.f32 %v9072_v33, %v9241_v56 }
 0x373   : > { %v4076_v34 = vadd.f32 %v4075_v7, %v3883_v21  ;;  %5065 = vmatprep.mubr.bf16.mxu0 %v4651_v28  ;;  %v4587_v5 = vmax.f32 %v4074_v57, 0.0  ;;  %v4119_v21 = vadd.f32 %v9084_v39, %v9241_v56  ;;  %v4121_v57 = vadd.f32 %v9088_v53, %v9237_v52 }
 0x374   : > { %v4077_v36 = vpop.f32.mrf.mxu1  ;;  %v9233_v9 = vpop.f32.mrf.mxu0  ;;  %5066 = vmatmul.mubr.bf16.gmra.mxu0 %v4650_v8  ;;  %v4127_v53 = vadd.f32 %v9093_v16, %v9237_v52 }
 0x375   : > { %v4078_v2 = vadd.f32 %v4077_v36, %v3885_v48  ;;  %v4590_v32 = vmax.f32 %v4076_v34, 0.0 }
 0x376   : > { %v9243_v11 = vpop.f32.mrf.mxu0  ;;  %v4307_v29 = vpop.f32.mrf.mxu1 }
 0x377   : > { %v4591_v49 = vmax.f32 %v4078_v2, 0.0  ;;  %v4654_v8 = vpack.c.bf16 %v4590_v32, %v4586_v58  ;;  %v4308_v36 = vadd.f32 %v4307_v29, %v4115_v38  ;;  %v4129_v29 = vadd.f32 %v9101_v61, %v9241_v56 }
 0x378   : > { %v9245_v13 = vpop.f32.mrf.mxu0  ;;  %v4309_v6 = vpop.f32.mrf.mxu1 }
 0x379   : > { %v4655_v28 = vpack.c.bf16 %v4591_v49, %v4587_v5  ;;  %v4310_v34 = vadd.f32 %v4309_v6, %v4117_v31  ;;  %v4468_v5 = vmax.f32 %v4308_v36, 0.0  ;;  %v4125_v31 = vadd.f32 %v9090_v55, %v9241_v56 }
 0x37a   : > { %v9253_v7 = vpop.f32.mrf.mxu0  ;;  %v4311_v48 = vpop.f32.mrf.mxu1 }
 0x37b   : > { %v4312_v22 = vadd.f32 %v4311_v48, %v4119_v21  ;;  %5073 = vmatprep.mubr.bf16.mxu0 %v4655_v28  ;;  %v4469_v10 = vmax.f32 %v4310_v34, 0.0 }
 0x37c   : > { %v9257_v54 = vpop.f32.mrf.mxu0  ;;  %v4313_v0 = vpop.f32.mrf.mxu1  ;;  %5074 = vmatmul.mubr.bf16.gmra.mxu0 %v4654_v8  ;;  %v4131_v8 = vadd.f32 %v9105_v46, %v9237_v52  ;;  %v4137_v46 = vadd.f32 %v9109_v43, %v9237_v52 }
 0x37d   : > { %v4314_v39 = vadd.f32 %v4313_v0, %v4121_v57  ;;  %v4472_v59 = vmax.f32 %v4312_v22, 0.0 }
 0x37e   : > { %v9259_v2 = vpop.f32.mrf.mxu0  ;;  %v4317_v33 = vpop.f32.mrf.mxu1 }
 0x37f   : > { %v4473_v32 = vmax.f32 %v4314_v39, 0.0  ;;  %v4596_v21 = vpack.c.bf16 %v4472_v59, %v4468_v5  ;;  %v4318_v34 = vadd.f32 %v4317_v33, %v4125_v31  ;;  %v4139_v5 = vadd.f32 %v9117_v4, %v9241_v56 }
 0x380   : > { %v9261_v49 = vpop.f32.mrf.mxu0  ;;  %v4319_v58 = vpop.f32.mrf.mxu1  ;;  %v4141_v31 = vadd.f32 %v9121_v63, %v9237_v52  ;;  %v4149_v63 = vadd.f32 %v9133_v26, %v9241_v56 }
 0x381   : > { %v4597_v6 = vpack.c.bf16 %v4473_v32, %v4469_v10  ;;  %v4320_v48 = vadd.f32 %v4319_v58, %v4127_v53  ;;  %v4476_v10 = vmax.f32 %v4318_v34, 0.0  ;;  %v4135_v58 = vadd.f32 %v9107_v62, %v9241_v56 }
 0x382   : > { %v9269_v28 = vpop.f32.mrf.mxu0  ;;  %v4321_v38 = vpop.f32.mrf.mxu1 }
 0x383   : > { %v4322_v57 = vadd.f32 %v4321_v38, %v4129_v29  ;;  %5114 = vmatprep.mubr.bf16.mxu1 %v4597_v6  ;;  %v4477_v39 = vmax.f32 %v4320_v48, 0.0 }
 0x384   : > { %v9273_v22 = vpop.f32.mrf.mxu0  ;;  %v4323_v16 = vpop.f32.mrf.mxu1  ;;  %5115 = vmatmul.mubr.bf16.vlgmr.msra.gmra.mxu1 %v4596_v21 }
 0x385   : > { %v4324_v61 = vadd.f32 %v4323_v16, %v4131_v8  ;;  %v4480_v36 = vmax.f32 %v4322_v57, 0.0 }
 0x386   : > { %v9275_v0 = vpop.f32.mrf.mxu0  ;;  %v4327_v55 = vpop.f32.mrf.mxu1 }
 0x387   : > { %v4481_v59 = vmax.f32 %v4324_v61, 0.0  ;;  %v4600_v53 = vpack.c.bf16 %v4480_v36, %v4476_v10  ;;  %v4328_v8 = vadd.f32 %v4327_v55, %v4135_v58  ;;  %v4145_v55 = vadd.f32 %v9123_v47, %v9241_v56 }
 0x388   : > { %v4329_v32 = vpop.f32.mrf.mxu1  ;;  %v9283_v29 = vpop.f32.mrf.mxu0 }
 0x389   : > { %v4601_v33 = vpack.c.bf16 %v4481_v59, %v4477_v39  ;;  %v4330_v21 = vadd.f32 %v4329_v32, %v4137_v46  ;;  %v4484_v61 = vmax.f32 %v4328_v8, 0.0  ;;  %v4147_v39 = vadd.f32 %v9125_v45, %v9237_v52 }
 0x38a   : > { %v4331_v6 = vpop.f32.mrf.mxu1  ;;  %v9287_v57 = vpop.f32.mrf.mxu0 }
 0x38b   : > { %v4332_v38 = vadd.f32 %v4331_v6, %v4139_v5  ;;  %5122 = vmatprep.mubr.bf16.mxu1 %v4601_v33  ;;  %v4485_v16 = vmax.f32 %v4330_v21, 0.0  ;;  %v4151_v5 = vadd.f32 %v9137_v18, %v9237_v52  ;;  %v4159_v18 = vadd.f32 %v9149_v41, %v9241_v56 }
 0x38c   : > { %v4333_v48 = vpop.f32.mrf.mxu1  ;;  %5123 = vmatmul.mubr.bf16.gmra.mxu1 %v4600_v53  ;;  %v9295_v32 = vpop.f32.mrf.mxu0 }
 0x38d   : > { %v4334_v43 = vadd.f32 %v4333_v48, %v4141_v31  ;;  %v4488_v4 = vmax.f32 %v4332_v38, 0.0 }
 0x38e   : > { %v4337_v34 = vpop.f32.mrf.mxu1  ;;  %v9299_v31 = vpop.f32.mrf.mxu0 }
 0x38f   : > { %v4489_v62 = vmax.f32 %v4334_v43, 0.0  ;;  %v4604_v10 = vpack.c.bf16 %v4488_v4, %v4484_v61  ;;  %v4338_v53 = vadd.f32 %v4337_v34, %v4145_v55  ;;  %v4157_v43 = vadd.f32 %v9141_v40, %v9237_v52  ;;  %v9834_v34 = vld [vmem:[#allocation14_spill] sm:$0xff] }
 0x390   : > { %v4339_v36 = vpop.f32.mrf.mxu1 }
 0x391   : > { %v4605_v59 = vpack.c.bf16 %v4489_v62, %v4485_v16  ;;  %v4340_v33 = vadd.f32 %v4339_v36, %v4147_v39  ;;  %v4492_v8 = vmax.f32 %v4338_v53, 0.0  ;;  %v4155_v16 = vadd.f32 %v9834_v34, %v9241_v56  ;;  %v9307_v62 = vpop.f32.mrf.mxu0 }
 0x392   : > { %v4341_v46 = vpop.f32.mrf.mxu1  ;;  %v4161_v39 = vadd.f32 %v9153_v37, %v9237_v52  ;;  %v4169_v37 = vadd.f32 %v9165_v20, %v9241_v56 }
 0x393   : > { %v4342_v58 = vadd.f32 %v4341_v46, %v4149_v63  ;;  %5130 = vmatprep.mubr.bf16.mxu1 %v4605_v59  ;;  %v4493_v38 = vmax.f32 %v4340_v33, 0.0  ;;  %v9311_v46 = vpop.f32.mrf.mxu0 }
 0x394   : > { %v4343_v6 = vpop.f32.mrf.mxu1  ;;  %5131 = vmatmul.mubr.bf16.gmra.mxu1 %v4604_v10 }
 0x395   : > { %v4344_v45 = vadd.f32 %v4343_v6, %v4151_v5  ;;  %v4496_v26 = vmax.f32 %v4342_v58, 0.0 }
 0x396   : > { %v4347_v21 = vpop.f32.mrf.mxu1 }
 0x397   : > { %v4497_v47 = vmax.f32 %v4344_v45, 0.0  ;;  %v4608_v61 = vpack.c.bf16 %v4496_v26, %v4492_v8  ;;  %v4348_v55 = vadd.f32 %v4347_v21, %v4155_v16  ;;  %v4167_v45 = vadd.f32 %v9157_v14, %v9237_v52 }
 0x398   : > { %v4349_v48 = vpop.f32.mrf.mxu1  ;;  %v4165_v21 = vadd.f32 %v9155_v42, %v9241_v56 }
 0x399   : > { %v4609_v4 = vpack.c.bf16 %v4497_v47, %v4493_v38  ;;  %v4350_v63 = vadd.f32 %v4349_v48, %v4157_v43  ;;  %v4500_v53 = vmax.f32 %v4348_v55, 0.0  ;;  %v9319_v38 = vpop.f32.mrf.mxu0  ;;  %v4171_v48 = vadd.f32 %v9169_v44, %v9237_v52 }
 0x39a   : > { %v4351_v36 = vpop.f32.mrf.mxu1  ;;  %v4179_v44 = vadd.f32 %v9181_v19, %v9241_v56 }
 0x39b   : > { %v4352_v59 = vadd.f32 %v4351_v36, %v4159_v18  ;;  %5138 = vmatprep.mubr.bf16.mxu1 %v4609_v4  ;;  %v4501_v33 = vmax.f32 %v4350_v63, 0.0  ;;  %v9323_v16 = vpop.f32.mrf.mxu0 }
 0x39c   : > { %v4353_v10 = vpop.f32.mrf.mxu1  ;;  %5139 = vmatmul.mubr.bf16.gmra.mxu1 %v4608_v61 }
 0x39d   : > { %v4354_v40 = vadd.f32 %v4353_v10, %v4161_v39  ;;  %v4504_v41 = vmax.f32 %v4352_v59, 0.0  ;;  %v4177_v59 = vadd.f32 %v9173_v17, %v9237_v52  ;;  %v4175_v10 = vadd.f32 %v9171_v30, %v9241_v56 }
 0x39e   : > { %v4357_v5 = vpop.f32.mrf.mxu1 }
 0x39f   : > { %v4505_v58 = vmax.f32 %v4354_v40, 0.0  ;;  %v4612_v47 = vpack.c.bf16 %v4504_v41, %v4500_v53  ;;  %v4358_v4 = vadd.f32 %v4357_v5, %v4165_v21  ;;  %v9331_v40 = vpop.f32.mrf.mxu0 }
 0x3a0   : > { %v4359_v6 = vpop.f32.mrf.mxu1 }
 0x3a1   : > { %v4613_v26 = vpack.c.bf16 %v4505_v58, %v4501_v33  ;;  %v4360_v43 = vadd.f32 %v4359_v6, %v4167_v45  ;;  %v4508_v39 = vmax.f32 %v4358_v4, 0.0  ;;  %v4181_v33 = vadd.f32 %v9185_v27, %v9237_v52 }
 0x3a2   : > { %v4361_v8 = vpop.f32.mrf.mxu1  ;;  %v4189_v27 = vadd.f32 %v9197_v1, %v9241_v56 }
 0x3a3   : > { %v4362_v18 = vadd.f32 %v4361_v8, %v4169_v37  ;;  %5146 = vmatprep.mubr.bf16.mxu1 %v4613_v26  ;;  %v4509_v36 = vmax.f32 %v4360_v43, 0.0  ;;  %v9335_v37 = vpop.f32.mrf.mxu0 }
 0x3a4   : > { %v4363_v34 = vpop.f32.mrf.mxu1  ;;  %5147 = vmatmul.mubr.bf16.gmra.mxu1 %v4612_v47 }
 0x3a5   : > { %v4364_v14 = vadd.f32 %v4363_v34, %v4171_v48  ;;  %v4512_v20 = vmax.f32 %v4362_v18, 0.0  ;;  %v4187_v48 = vadd.f32 %v9189_v35, %v9237_v52  ;;  %v4185_v18 = vadd.f32 %v9187_v24, %v9241_v56  ;;  %v9343_v4 = vpop.f32.mrf.mxu0 }
 0x3a6   : > { %v4367_v61 = vpop.f32.mrf.mxu1 }
 0x3a7   : > { %v4513_v42 = vmax.f32 %v4364_v14, 0.0  ;;  %v4616_v41 = vpack.c.bf16 %v4512_v20, %v4508_v39  ;;  %v4368_v6 = vadd.f32 %v4367_v61, %v4175_v10  ;;  %v4191_v20 = vadd.f32 %v9201_v60, %v9237_v52 }
 0x3a8   : > { %v4369_v63 = vpop.f32.mrf.mxu1  ;;  %v4199_v60 = vadd.f32 %v9213_v3, %v9241_v56 }
 0x3a9   : > { %v4617_v55 = vpack.c.bf16 %v4513_v42, %v4509_v36  ;;  %v4370_v58 = vadd.f32 %v4369_v63, %v4177_v59  ;;  %v4516_v47 = vmax.f32 %v4368_v6, 0.0  ;;  %v9347_v63 = vpop.f32.mrf.mxu0 }
 0x3aa   : > { %v4371_v5 = vpop.f32.mrf.mxu1 }
 0x3ab   : > { %v4372_v53 = vadd.f32 %v4371_v5, %v4179_v44  ;;  %5154 = vmatprep.mubr.bf16.mxu1 %v4617_v55  ;;  %v4517_v21 = vmax.f32 %v4370_v58, 0.0  ;;  %v9355_v58 = vpop.f32.mrf.mxu0 }
 0x3ac   : > { %v4373_v45 = vpop.f32.mrf.mxu1  ;;  %5155 = vmatmul.mubr.bf16.gmra.mxu1 %v4616_v41  ;;  %v4197_v41 = vadd.f32 %v9205_v12, %v9237_v52 }
 0x3ad   : > { %v4374_v17 = vadd.f32 %v4373_v45, %v4181_v33  ;;  %v4520_v19 = vmax.f32 %v4372_v53, 0.0  ;;  %v4195_v33 = vadd.f32 %v9203_v25, %v9241_v56  ;;  %v4201_v45 = vadd.f32 %v9217_v51, %v9237_v52 }
 0x3ae   : > { %v4377_v26 = vpop.f32.mrf.mxu1  ;;  %v4209_v51 = vadd.f32 %v9229_v23, %v9241_v56 }
 0x3af   : > { %v4521_v30 = vmax.f32 %v4374_v17, 0.0  ;;  %v4620_v34 = vpack.c.bf16 %v4520_v19, %v4516_v47  ;;  %v4378_v42 = vadd.f32 %v4377_v26, %v4185_v18 }
 0x3b0   : > { %v4379_v8 = vpop.f32.mrf.mxu1 }
 0x3b1   : > { %v4621_v43 = vpack.c.bf16 %v4521_v30, %v4517_v21  ;;  %v4380_v61 = vadd.f32 %v4379_v8, %v4187_v48  ;;  %v4524_v55 = vmax.f32 %v4378_v42, 0.0  ;;  %v9359_v30 = vpop.f32.mrf.mxu0 }
 0x3b2   : > { %v4381_v14 = vpop.f32.mrf.mxu1 }
 0x3b3   : > { %v4382_v36 = vadd.f32 %v4381_v14, %v4189_v27  ;;  %5162 = vmatprep.mubr.bf16.mxu1 %v4621_v43  ;;  %v4525_v44 = vmax.f32 %v4380_v61, 0.0  ;;  %v4207_v43 = vadd.f32 %v9221_v15, %v9237_v52  ;;  %v9367_v14 = vpop.f32.mrf.mxu0 }
 0x3b4   : > { %v4383_v39 = vpop.f32.mrf.mxu1  ;;  %5163 = vmatmul.mubr.bf16.gmra.mxu1 %v4620_v34  ;;  %v4205_v34 = vadd.f32 %v9219_v50, %v9241_v56 }
 0x3b5   : > { %v4384_v35 = vadd.f32 %v4383_v39, %v4191_v20  ;;  %v4528_v1 = vmax.f32 %v4382_v36, 0.0  ;;  %v4211_v36 = vadd.f32 %v9233_v9, %v9237_v52  ;;  %v4217_v9 = vadd.f32 %v9245_v13, %v9237_v52 }
 0x3b6   : > { %v4387_v59 = vpop.f32.mrf.mxu1 }
 0x3b7   : > { %v4529_v24 = vmax.f32 %v4384_v35, 0.0  ;;  %v4624_v53 = vpack.c.bf16 %v4528_v1, %v4524_v55  ;;  %v4388_v26 = vadd.f32 %v4387_v59, %v4195_v33 }
 0x3b8   : > { %v4389_v10 = vpop.f32.mrf.mxu1 }
 0x3b9   : > { %v4625_v5 = vpack.c.bf16 %v4529_v24, %v4525_v44  ;;  %v4390_v17 = vadd.f32 %v4389_v10, %v4197_v41  ;;  %v4532_v48 = vmax.f32 %v4388_v26, 0.0 }
 0x3ba   : > { %v4391_v6 = vpop.f32.mrf.mxu1 }
 0x3bb   : > { %v4392_v19 = vadd.f32 %v4391_v6, %v4199_v60  ;;  %5170 = vmatprep.mubr.bf16.mxu1 %v4625_v5  ;;  %v4533_v8 = vmax.f32 %v4390_v17, 0.0  ;;  %v4219_v5 = vadd.f32 %v9253_v7, %v9241_v56  ;;  %v4221_v17 = vadd.f32 %v9257_v54, %v9237_v52 }
 0x3bc   : > { %v4393_v21 = vpop.f32.mrf.mxu1  ;;  %5171 = vmatmul.mubr.bf16.gmra.mxu1 %v4624_v53  ;;  %v4215_v53 = vadd.f32 %v9243_v11, %v9241_v56  ;;  %v4227_v54 = vadd.f32 %v9261_v49, %v9237_v52 }
 0x3bd   : > { %v4394_v12 = vadd.f32 %v4393_v21, %v4201_v45  ;;  %v4536_v3 = vmax.f32 %v4392_v19, 0.0 }
 0x3be   : > { %v4397_v47 = vpop.f32.mrf.mxu1 }
 0x3bf   : > { %v4537_v25 = vmax.f32 %v4394_v12, 0.0  ;;  %v4628_v20 = vpack.c.bf16 %v4536_v3, %v4532_v48  ;;  %v4398_v35 = vadd.f32 %v4397_v47, %v4205_v34 }
 0x3c0   : > { %v4399_v27 = vpop.f32.mrf.mxu1 }
 0x3c1   : > { %v4629_v18 = vpack.c.bf16 %v4537_v25, %v4533_v8  ;;  %v4400_v42 = vadd.f32 %v4399_v27, %v4207_v43  ;;  %v4540_v10 = vmax.f32 %v4398_v35, 0.0  ;;  %v4229_v43 = vadd.f32 %v9269_v28, %v9241_v56 }
 0x3c2   : > { %v4401_v61 = vpop.f32.mrf.mxu1 }
 0x3c3   : > { %v4402_v39 = vadd.f32 %v4401_v61, %v4209_v51  ;;  %5178 = vmatprep.mubr.bf16.mxu1 %v4629_v18  ;;  %v4541_v50 = vmax.f32 %v4400_v42, 0.0  ;;  %v4225_v18 = vadd.f32 %v9259_v2, %v9241_v56  ;;  %v4231_v61 = vadd.f32 %v9273_v22, %v9237_v52 }
 0x3c4   : > { %v4403_v1 = vpop.f32.mrf.mxu1  ;;  %v9371_v15 = vpop.f32.mrf.mxu0  ;;  %5179 = vmatmul.mubr.bf16.gmra.mxu1 %v4628_v20  ;;  %v4237_v22 = vadd.f32 %v9283_v29, %v9237_v52 }
 0x3c5   : > { %v4404_v23 = vadd.f32 %v4403_v1, %v4211_v36  ;;  %v4544_v59 = vmax.f32 %v4402_v39, 0.0 }
 0x3c6   : > { %v4407_v44 = vpop.f32.mrf.mxu1  ;;  %v9373_v24 = vpop.f32.mrf.mxu0 }
 0x3c7   : > { %v4545_v55 = vmax.f32 %v4404_v23, 0.0  ;;  %v4632_v6 = vpack.c.bf16 %v4544_v59, %v4540_v10  ;;  %v4408_v21 = vadd.f32 %v4407_v44, %v4215_v53  ;;  %v4239_v10 = vadd.f32 %v9287_v57, %v9241_v56 }
 0x3c8   : > { %v4409_v41 = vpop.f32.mrf.mxu1  ;;  %v9375_v60 = vpop.f32.mrf.mxu0  ;;  %v4241_v53 = vadd.f32 %v9295_v32, %v9237_v52  ;;  %v4247_v32 = vadd.f32 %v9307_v62, %v9237_v52 }
 0x3c9   : > { %v4633_v33 = vpack.c.bf16 %v4545_v55, %v4541_v50  ;;  %v4410_v19 = vadd.f32 %v4409_v41, %v4217_v9  ;;  %v4548_v48 = vmax.f32 %v4408_v21, 0.0  ;;  %v4235_v9 = vadd.f32 %v9275_v0, %v9241_v56 }
 0x3ca   : > { %v4411_v45 = vpop.f32.mrf.mxu1  ;;  %v9385_v12 = vpop.f32.mrf.mxu0 }
 0x3cb   : > { %v4412_v26 = vadd.f32 %v4411_v45, %v4219_v5  ;;  %5186 = vmatprep.mubr.bf16.mxu1 %v4633_v33  ;;  %v4549_v8 = vmax.f32 %v4410_v19, 0.0 }
 0x3cc   : > { %v4413_v3 = vpop.f32.mrf.mxu1  ;;  %5187 = vmatmul.mubr.bf16.gmra.mxu1 %v4632_v6  ;;  %v9387_v11 = vpop.f32.mrf.mxu0 }
 0x3cd   : > { %v4414_v13 = vadd.f32 %v4413_v3, %v4221_v17  ;;  %v4552_v47 = vmax.f32 %v4412_v26, 0.0 }
 0x3ce   : > { %v4417_v7 = vpop.f32.mrf.mxu1  ;;  %v9397_v35 = vpop.f32.mrf.mxu0 }
 0x3cf   : > { %v4553_v25 = vmax.f32 %v4414_v13, 0.0  ;;  %v4636_v34 = vpack.c.bf16 %v4552_v47, %v4548_v48  ;;  %v4418_v39 = vadd.f32 %v4417_v7, %v4225_v18  ;;  %v4245_v48 = vadd.f32 %v9299_v31, %v9241_v56 }
 0x3d0   : > { %v4419_v27 = vpop.f32.mrf.mxu1  ;;  %v9399_v2 = vpop.f32.mrf.mxu0 }
 0x3d1   : > { %v4637_v51 = vpack.c.bf16 %v4553_v25, %v4549_v8  ;;  %v4420_v36 = vadd.f32 %v4419_v27, %v4227_v54  ;;  %v4556_v50 = vmax.f32 %v4418_v39, 0.0  ;;  %v4249_v8 = vadd.f32 %v9311_v46, %v9241_v56 }
 0x3d2   : > { %v4421_v20 = vpop.f32.mrf.mxu1  ;;  %v9409_v17 = vpop.f32.mrf.mxu0 }
 0x3d3   : > { %v4422_v42 = vadd.f32 %v4421_v20, %v4229_v43  ;;  %5194 = vmatprep.mubr.bf16.mxu1 %v4637_v51  ;;  %v4557_v59 = vmax.f32 %v4420_v36, 0.0  ;;  %v4251_v43 = vadd.f32 %v9319_v38, %v9237_v52  ;;  %v4257_v38 = vadd.f32 %v9331_v40, %v9237_v52 }
 0x3d4   : > { %v4423_v1 = vpop.f32.mrf.mxu1  ;;  %5195 = vmatmul.mubr.bf16.gmra.mxu1 %v4636_v34  ;;  %v9411_v47 = vpop.f32.mrf.mxu0 }
 0x3d5   : > { %v4424_v49 = vadd.f32 %v4423_v1, %v4231_v61  ;;  %v4560_v23 = vmax.f32 %v4422_v42, 0.0 }
 0x3d6   : > { %v4427_v28 = vpop.f32.mrf.mxu1  ;;  %v9421_v34 = vpop.f32.mrf.mxu0 }
 0x3d7   : > { %v4561_v44 = vmax.f32 %v4424_v49, 0.0  ;;  %v4640_v5 = vpack.c.bf16 %v4560_v23, %v4556_v50  ;;  %v4428_v19 = vadd.f32 %v4427_v28, %v4235_v9  ;;  %v4259_v23 = vadd.f32 %v9335_v37, %v9241_v56 }
 0x3d8   : > { %v4429_v55 = vpop.f32.mrf.mxu1  ;;  %v9423_v1 = vpop.f32.mrf.mxu0 }
 0x3d9   : > { %v4641_v41 = vpack.c.bf16 %v4561_v44, %v4557_v59  ;;  %v4430_v6 = vadd.f32 %v4429_v55, %v4237_v22  ;;  %v4564_v0 = vmax.f32 %v4428_v19, 0.0  ;;  %v4255_v59 = vadd.f32 %v9323_v16, %v9241_v56 }
 0x3da   : > { %v4431_v33 = vpop.f32.mrf.mxu1  ;;  %v4261_v55 = vadd.f32 %v9343_v4, %v9237_v52  ;;  %v4267_v4 = vadd.f32 %v9355_v58, %v9237_v52 }
 0x3db   : > { %v4432_v45 = vadd.f32 %v4431_v33, %v4239_v10  ;;  %5202 = vmatprep.mubr.bf16.mxu1 %v4641_v41  ;;  %v4565_v3 = vmax.f32 %v4430_v6, 0.0  ;;  %v9433_v41 = vpop.f32.mrf.mxu0 }
 0x3dc   : > { %v4433_v26 = vpop.f32.mrf.mxu1  ;;  %5203 = vmatmul.mubr.bf16.gmra.mxu1 %v4640_v5 }
 0x3dd   : > { %v4434_v29 = vadd.f32 %v4433_v26, %v4241_v53  ;;  %v4568_v21 = vmax.f32 %v4432_v45, 0.0  ;;  %v9435_v45 = vpop.f32.mrf.mxu0  ;;  %v4269_v26 = vadd.f32 %v9359_v30, %v9241_v56 }
 0x3de   : > { %v4437_v57 = vpop.f32.mrf.mxu1 }
 0x3df   : > { %v4569_v13 = vmax.f32 %v4434_v29, 0.0  ;;  %v4644_v27 = vpack.c.bf16 %v4568_v21, %v4564_v0  ;;  %v4438_v20 = vadd.f32 %v4437_v57, %v4245_v48  ;;  %v4265_v21 = vadd.f32 %v9347_v63, %v9241_v56 }
 0x3e0   : > { %v4439_v7 = vpop.f32.mrf.mxu1 }
 0x3e1   : > { %v4645_v25 = vpack.c.bf16 %v4569_v13, %v4565_v3  ;;  %v4440_v51 = vadd.f32 %v4439_v7, %v4247_v32  ;;  %v4572_v31 = vmax.f32 %v4438_v20, 0.0  ;;  %v4271_v13 = vadd.f32 %v9367_v14, %v9237_v52  ;;  %v9445_v32 = vpop.f32.mrf.mxu0 }
 0x3e2   : > { %v4441_v54 = vpop.f32.mrf.mxu1 }
 0x3e3   : > { %v4442_v18 = vadd.f32 %v4441_v54, %v4249_v8  ;;  %5210 = vmatprep.mubr.bf16.mxu1 %v4645_v25  ;;  %v4573_v42 = vmax.f32 %v4440_v51, 0.0  ;;  %v9447_v54 = vpop.f32.mrf.mxu0 }
 0x3e4   : > { %v4443_v61 = vpop.f32.mrf.mxu1  ;;  %5211 = vmatmul.mubr.bf16.gmra.mxu1 %v4644_v27 }
 0x3e5   : > { %v4444_v62 = vadd.f32 %v4443_v61, %v4251_v43  ;;  %v4576_v36 = vmax.f32 %v4442_v18, 0.0  ;;  %v9449_v51 = vpop.f32.mrf.mxu0 }
 0x3e6   : > { %v4447_v46 = vpop.f32.mrf.mxu1 }
 0x3e7   : > { %v4577_v39 = vmax.f32 %v4444_v62, 0.0  ;;  %v4648_v44 = vpack.c.bf16 %v4576_v36, %v4572_v31  ;;  %v4448_v9 = vadd.f32 %v4447_v46, %v4255_v59  ;;  %v9451_v52 = vpop.f32.mrf.mxu0 }
 0x3e8   : > { %v4449_v49 = vpop.f32.mrf.mxu1 }
 0x3e9   : > { %v4649_v28 = vpack.c.bf16 %v4577_v39, %v4573_v42  ;;  %v4450_v22 = vadd.f32 %v4449_v49, %v4257_v38  ;;  %v4580_v16 = vmax.f32 %v4448_v9, 0.0  ;;  %v9453_v14 = vpop.f32.mrf.mxu0  ;;  %v5995_v9 = vadd.f32 %v9385_v12, %v9375_v60 }
 0x3ea   : > { %v4451_v50 = vpop.f32.mrf.mxu1 }
 0x3eb   : > { %v4452_v10 = vadd.f32 %v4451_v50, %v4259_v23  ;;  %5218 = vmatprep.mubr.bf16.mxu1 %v4649_v28  ;;  %v4581_v53 = vmax.f32 %v4450_v22, 0.0  ;;  %v9455_v18 = vpop.f32.mrf.mxu0 }
 0x3ec   : > { %v4453_v5 = vpop.f32.mrf.mxu1  ;;  %5219 = vmatmul.mubr.bf16.gmra.mxu1 %v4648_v44 }
 0x3ed   : > { %v4454_v40 = vadd.f32 %v4453_v5, %v4261_v55  ;;  %v4584_v33 = vmax.f32 %v4452_v10, 0.0  ;;  %v9457_v20 = vpop.f32.mrf.mxu0  ;;  %v5992_v10 = vadd.f32 %v9373_v24, %v9371_v15  ;;  %v9494_v5 = vld [vmem:[%s9640_s8] ss:$0 sm:$0xff] }
 0x3ee   : > { %v4457_v37 = vpop.f32.mrf.mxu1 }
 0x3ef   : > { %v4585_v6 = vmax.f32 %v4454_v40, 0.0  ;;  %v4652_v57 = vpack.c.bf16 %v4584_v33, %v4580_v16  ;;  %v4458_v8 = vadd.f32 %v4457_v37, %v4265_v21  ;;  %v9459_v61 = vpop.f32.mrf.mxu0  ;;  %v4959_v16 = vadd.f32 %v5995_v9, %v9494_v5 }
 0x3f0   : > { %v4459_v19 = vpop.f32.mrf.mxu1 }
 0x3f1   : > { %v4653_v29 = vpack.c.bf16 %v4585_v6, %v4581_v53  ;;  %v4460_v0 = vadd.f32 %v4459_v19, %v4267_v4  ;;  %v4588_v56 = vmax.f32 %v4458_v8, 0.0  ;;  %v9461_v62 = vpop.f32.mrf.mxu0  ;;  %v4956_v6 = vadd.f32 %v5992_v10, %v9494_v5 }
 0x3f2   : > { %v4461_v3 = vpop.f32.mrf.mxu1 }
 0x3f3   : > { %v4462_v7 = vadd.f32 %v4461_v3, %v4269_v26  ;;  %5226 = vmatprep.mubr.bf16.mxu1 %v4653_v29  ;;  %v4589_v30 = vmax.f32 %v4460_v0, 0.0  ;;  %v9463_v36 = vpop.f32.mrf.mxu0  ;;  %v5998_v26 = vadd.f32 %v9397_v35, %v9387_v11  ;;  %v6001_v29 = vadd.f32 %v9409_v17, %v9399_v2 }
 0x3f4   : > { %v4463_v25 = vpop.f32.mrf.mxu1  ;;  %5227 = vmatmul.mubr.bf16.gmra.mxu1 %v4652_v57  ;;  %v6004_v2 = vadd.f32 %v9421_v34, %v9411_v47  ;;  %v6007_v17 = vadd.f32 %v9433_v41, %v9423_v1  ;;  %v6010_v1 = vadd.f32 %v9445_v32, %v9435_v45  ;;  %v6013_v41 = vadd.f32 %v9449_v51, %v9447_v54 }
 0x3f5   : > { %v4464_v58 = vadd.f32 %v4463_v25, %v4271_v13  ;;  %v4592_v48 = vmax.f32 %v4462_v7, 0.0  ;;  %v9465_v46 = vpop.f32.mrf.mxu0  ;;  %v4964_v7 = vadd.f32 %v5998_v26, %v9494_v5  ;;  %v4967_v8 = vadd.f32 %v6001_v29, %v9494_v5 }
 0x3f6   : > { %v4975_v10 = vadd.f32 %v6007_v17, %v9494_v5  ;;  %v6016_v54 = vadd.f32 %v9453_v14, %v9451_v52  ;;  %v6019_v51 = vadd.f32 %v9457_v20, %v9455_v18  ;;  %v6022_v18 = vadd.f32 %v9461_v62, %v9459_v61 }
 0x3f7   : > { %v4593_v27 = vmax.f32 %v4464_v58, 0.0  ;;  %v4656_v43 = vpack.c.bf16 %v4592_v48, %v4588_v56  ;;  %v9467_v42 = vpop.f32.mrf.mxu0  ;;  %v6025_v20 = vadd.f32 %v9465_v46, %v9463_v36 }
 0x3f9   : > { %v4657_v63 = vpack.c.bf16 %v4593_v27, %v4589_v30  ;;  %v9469_v39 = vpop.f32.mrf.mxu0 }
 0x3fa   : > { %v6028_v36 = vadd.f32 %v9469_v39, %v9467_v42 }
 0x3fb   : > { %5234 = vmatprep.mubr.bf16.mxu1 %v4657_v63  ;;  %v9471_v31 = vpop.f32.mrf.mxu0 }
 0x3fc   : > { %5235 = vmatmul.mubr.bf16.gmra.mxu1 %v4656_v43 }
 0x3fd   : > { %v9473_v49 = vpop.f32.mrf.mxu0 }
 0x3fe   : > { %v6031_v46 = vadd.f32 %v9473_v49, %v9471_v31 }
 0x3ff   : > { %v9475_v38 = vpop.f32.mrf.mxu0 }
 0x401   : > { %v9477_v23 = vpop.f32.mrf.mxu0 }
 0x402   : > { %v6034_v31 = vadd.f32 %v9477_v23, %v9475_v38 }
 0x403   : > { %v9479_v28 = vpop.f32.mrf.mxu0 }
 0x405   : > { %v9481_v59 = vpop.f32.mrf.mxu0 }
 0x406   : > { %v6037_v49 = vadd.f32 %v9481_v59, %v9479_v28 }
 0x407   : > { %v9483_v44 = vpop.f32.mrf.mxu0 }
 0x409   : > { %v9485_v50 = vpop.f32.mrf.mxu0 }
 0x40a   : > { %v6040_v28 = vadd.f32 %v9485_v50, %v9483_v44 }
 0x40b   : > { %v9496_v40 = vpop.f32.mrf.mxu0 }
 0x40d   : > { %v9500_v4 = vpop.f32.mrf.mxu0 }
 0x40e   : > { %v6043_v59 = vadd.f32 %v9500_v4, %v9496_v40 }
 0x40f   : > { %v9513_v57 = vpop.f32.mrf.mxu0 }
 0x411   : > { %v9518_v58 = vpop.f32.mrf.mxu0 }
 0x412   : > { %v6046_v50 = vadd.f32 %v9518_v58, %v9513_v57 }
 0x413   : > { %v9524_v56 = vpop.f32.mrf.mxu0 }
 0x444   : > { %v6102_v55 = vpop.f32.mrf.mxu1 }
 0x446   : > { %v6103_v22 = vpop.f32.mrf.mxu1 }
 0x447   : > { %v6104_v37 = vadd.f32 %v6103_v22, %v6102_v55  ;;  %v4972_v22 = vadd.f32 %v6004_v2, %v9494_v5 }
 0x448   : > { %v6105_v33 = vpop.f32.mrf.mxu1 }
 0x449   : > { %v5117_v24 = vadd.f32 %v6104_v37, %v4956_v6 }
 0x44a   : > { %v6106_v53 = vpop.f32.mrf.mxu1 }
 0x44b   : > { %v6107_v19 = vadd.f32 %v6106_v53, %v6105_v33  ;;  %v9529_v33 = vpop.f32.mrf.mxu0 }
 0x44c   : > { %v6108_v15 = vpop.f32.mrf.mxu1  ;;  %v6049_v40 = vadd.f32 %v9529_v33, %v9524_v56 }
 0x44d   : > { %v5120_v60 = vadd.f32 %v6107_v19, %v4959_v16  ;;  %v9535_v16 = vpop.f32.mrf.mxu0 }
 0x44e   : > { %v6109_v12 = vpop.f32.mrf.mxu1 }
 0x44f   : > { %v5882_v21 = vpack.c.bf16 %v5120_v60, %v5117_v24  ;;  %v6110_v13 = vadd.f32 %v6109_v12, %v6108_v15  ;;  %v4980_v60 = vadd.f32 %v6010_v1, %v9494_v5  ;;  %v4983_v12 = vadd.f32 %v6013_v41, %v9494_v5  ;;  %v9540_v29 = vpop.f32.mrf.mxu0 }
 0x450   : > { %v6111_v3 = vpop.f32.mrf.mxu1  ;;  %v6052_v58 = vadd.f32 %v9540_v29, %v9535_v16 }
 0x451   : > { %5883 = vst [vmem:[%s9507_s25] sm:$0xff] %v5882_v21   ;;  %v5125_v11 = vadd.f32 %v6110_v13, %v4964_v7 }
 0x452   : > { %v6112_v0 = vpop.f32.mrf.mxu1 }
 0x453   : > { %v6113_v25 = vadd.f32 %v6112_v0, %v6111_v3  ;;  %v9546_v0 = vpop.f32.mrf.mxu0 }
 0x454   : > { %v6114_v48 = vpop.f32.mrf.mxu1 }
 0x455   : > { %v5128_v35 = vadd.f32 %v6113_v25, %v4967_v8 }
 0x456   : > { %v6115_v30 = vpop.f32.mrf.mxu1 }
 0x457   : > { %v5887_v27 = vpack.c.bf16 %v5128_v35, %v5125_v11  ;;  %v6116_v43 = vadd.f32 %v6115_v30, %v6114_v48  ;;  %v4988_v48 = vadd.f32 %v6016_v54, %v9494_v5  ;;  %v4991_v11 = vadd.f32 %v6019_v51, %v9494_v5  ;;  %v9551_v30 = vpop.f32.mrf.mxu0 }
 0x458   : > { %v6117_v63 = vpop.f32.mrf.mxu1  ;;  %v6055_v56 = vadd.f32 %v9551_v30, %v9546_v0 }
 0x459   : > { %5959 = vst [vmem:[%s9507_s25 + $0x8] sm:$0xff] %v5887_v27   ;;  %v5133_v47 = vadd.f32 %v6116_v43, %v4972_v22 }
 0x45a   : > { %v6118_v55 = vpop.f32.mrf.mxu1 }
 0x45b   : > { %v6119_v9 = vadd.f32 %v6118_v55, %v6117_v63  ;;  %v9557_v63 = vpop.f32.mrf.mxu0 }
 0x45c   : > { %v6120_v37 = vpop.f32.mrf.mxu1 }
 0x45d   : > { %v5136_v34 = vadd.f32 %v6119_v9, %v4975_v10  ;;  %v4996_v10 = vadd.f32 %v6022_v18, %v9494_v5  ;;  %v4999_v9 = vadd.f32 %v6025_v20, %v9494_v5  ;;  %v5020_v20 = vadd.f32 %v6040_v28, %v9494_v5 }
 0x45e   : > { %v6121_v53 = vpop.f32.mrf.mxu1 }
 0x45f   : > { %v5892_v6 = vpack.c.bf16 %v5136_v34, %v5133_v47  ;;  %v6122_v15 = vadd.f32 %v6121_v53, %v6120_v37  ;;  %v9562_v47 = vpop.f32.mrf.mxu0 }
 0x460   : > { %v6123_v19 = vpop.f32.mrf.mxu1  ;;  %v6058_v29 = vadd.f32 %v9562_v47, %v9557_v63 }
 0x461   : > { %5960 = vst [vmem:[%s9507_s25 + $0x10] sm:$0xff] %v5892_v6   ;;  %v5141_v45 = vadd.f32 %v6122_v15, %v4980_v60  ;;  %v9568_v41 = vpop.f32.mrf.mxu0  ;;  %v5007_v60 = vadd.f32 %v6031_v46, %v9494_v5 }
 0x462   : > { %v6124_v24 = vpop.f32.mrf.mxu1 }
 0x463   : > { %v6125_v26 = vadd.f32 %v6124_v24, %v6123_v19  ;;  %v5004_v24 = vadd.f32 %v6028_v36, %v9494_v5  ;;  %v5031_v36 = vadd.f32 %v6049_v40, %v9494_v5 }
 0x464   : > { %v6126_v21 = vpop.f32.mrf.mxu1 }
 0x465   : > { %v5144_v32 = vadd.f32 %v6125_v26, %v4983_v12  ;;  %v9573_v26 = vpop.f32.mrf.mxu0 }
 0x466   : > { %v6127_v3 = vpop.f32.mrf.mxu1  ;;  %v6061_v0 = vadd.f32 %v9573_v26, %v9568_v41 }
 0x467   : > { %v5897_v13 = vpack.c.bf16 %v5144_v32, %v5141_v45  ;;  %v6128_v8 = vadd.f32 %v6127_v3, %v6126_v21  ;;  %v9579_v3 = vpop.f32.mrf.mxu0 }
 0x468   : > { %v6129_v7 = vpop.f32.mrf.mxu1 }
 0x469   : > { %5961 = vst [vmem:[%s9507_s25 + $0x18] sm:$0xff] %v5897_v13   ;;  %v5149_v52 = vadd.f32 %v6128_v8, %v4988_v48  ;;  %v5015_v8 = vadd.f32 %v6037_v49, %v9494_v5  ;;  %v9584_v48 = vpop.f32.mrf.mxu0 }
 0x46a   : > { %v6130_v25 = vpop.f32.mrf.mxu1  ;;  %v6064_v47 = vadd.f32 %v9584_v48, %v9579_v3 }
 0x46b   : > { %v6131_v35 = vadd.f32 %v6130_v25, %v6129_v7  ;;  %v5012_v7 = vadd.f32 %v6034_v31, %v9494_v5 }
 0x46c   : > { %v6132_v2 = vpop.f32.mrf.mxu1 }
 0x46d   : > { %v5152_v14 = vadd.f32 %v6131_v35, %v4991_v11 }
 0x46e   : > { %v6133_v17 = vpop.f32.mrf.mxu1 }
 0x46f   : > { %v5902_v27 = vpack.c.bf16 %v5152_v14, %v5149_v52  ;;  %v6134_v55 = vadd.f32 %v6133_v17, %v6132_v2  ;;  %v6065_v52 = vpop.f32.mrf.mxu0 }
 0x470   : > { %v6135_v43 = vpop.f32.mrf.mxu1 }
 0x471   : > { %5962 = vst [vmem:[%s9507_s25 + $0x20] sm:$0xff] %v5902_v27   ;;  %v5157_v61 = vadd.f32 %v6134_v55, %v4996_v10  ;;  %v5023_v27 = vadd.f32 %v6043_v59, %v9494_v5  ;;  %v6066_v55 = vpop.f32.mrf.mxu0 }
 0x472   : > { %v6136_v22 = vpop.f32.mrf.mxu1  ;;  %v6067_v41 = vadd.f32 %v6066_v55, %v6065_v52 }
 0x473   : > { %v6137_v37 = vadd.f32 %v6136_v22, %v6135_v43 }
 0x474   : > { %v6138_v34 = vpop.f32.mrf.mxu1 }
 0x475   : > { %v5160_v62 = vadd.f32 %v6137_v37, %v4999_v9  ;;  %v6068_v37 = vpop.f32.mrf.mxu0 }
 0x476   : > { %v6139_v53 = vpop.f32.mrf.mxu1 }
 0x477   : > { %v5907_v1 = vpack.c.bf16 %v5160_v62, %v5157_v61  ;;  %v6140_v19 = vadd.f32 %v6139_v53, %v6138_v34  ;;  %v5028_v53 = vadd.f32 %v6046_v50, %v9494_v5 }
 0x478   : > { %v6141_v6 = vpop.f32.mrf.mxu1 }
 0x479   : > { %5963 = vst [vmem:[%s9507_s25 + $0x28] sm:$0xff] %v5907_v1   ;;  %v5165_v42 = vadd.f32 %v6140_v19, %v5004_v24  ;;  %v6069_v1 = vpop.f32.mrf.mxu0 }
 0x47a   : > { %v6142_v15 = vpop.f32.mrf.mxu1  ;;  %v6070_v40 = vadd.f32 %v6069_v1, %v6068_v37 }
 0x47b   : > { %v6143_v12 = vadd.f32 %v6142_v15, %v6141_v6  ;;  %v6071_v24 = vpop.f32.mrf.mxu0 }
 0x47c   : > { %v6144_v21 = vpop.f32.mrf.mxu1 }
 0x47d   : > { %v5168_v39 = vadd.f32 %v6143_v12, %v5007_v60  ;;  %v6072_v31 = vpop.f32.mrf.mxu0 }
 0x47e   : > { %v6145_v45 = vpop.f32.mrf.mxu1  ;;  %v6073_v3 = vadd.f32 %v6072_v31, %v6071_v24 }
 0x47f   : > { %v5912_v32 = vpack.c.bf16 %v5168_v39, %v5165_v42  ;;  %v6146_v51 = vadd.f32 %v6145_v45, %v6144_v21  ;;  %v5036_v42 = vadd.f32 %v6052_v58, %v9494_v5  ;;  %v5039_v39 = vadd.f32 %v6055_v56, %v9494_v5 }
 0x480   : > { %v6147_v54 = vpop.f32.mrf.mxu1 }
 0x481   : > { %5964 = vst [vmem:[%s9507_s25 + $0x30] sm:$0xff] %v5912_v32   ;;  %v5173_v38 = vadd.f32 %v6146_v51, %v5012_v7  ;;  %v6074_v51 = vpop.f32.mrf.mxu0 }
 0x482   : > { %v6148_v13 = vpop.f32.mrf.mxu1 }
 0x483   : > { %v6149_v25 = vadd.f32 %v6148_v13, %v6147_v54 }
 0x484   : > { %v6150_v11 = vpop.f32.mrf.mxu1 }
 0x485   : > { %v5176_v23 = vadd.f32 %v6149_v25, %v5015_v8  ;;  %v5044_v25 = vadd.f32 %v6058_v29, %v9494_v5 }
 0x486   : > { %v6151_v35 = vpop.f32.mrf.mxu1 }
 0x487   : > { %v5917_v2 = vpack.c.bf16 %v5176_v23, %v5173_v38  ;;  %v6152_v17 = vadd.f32 %v6151_v35, %v6150_v11  ;;  %v5047_v11 = vadd.f32 %v6061_v0, %v9494_v5  ;;  %v6075_v23 = vpop.f32.mrf.mxu0 }
 0x488   : > { %v6153_v14 = vpop.f32.mrf.mxu1 }
 0x489   : > { %5965 = vst [vmem:[%s9507_s25 + $0x38] sm:$0xff] %v5917_v2   ;;  %v5181_v10 = vadd.f32 %v6152_v17, %v5020_v20  ;;  %v6077_v2 = vpop.f32.mrf.mxu0  ;;  %v5052_v20 = vadd.f32 %v6064_v47, %v9494_v5 }
 0x48a   : > { %v6154_v18 = vpop.f32.mrf.mxu1 }
 0x48b   : > { %v6155_v43 = vadd.f32 %v6154_v18, %v6153_v14 }
 0x48c   : > { %v6156_v22 = vpop.f32.mrf.mxu1 }
 0x48d   : > { %v5184_v9 = vadd.f32 %v6155_v43, %v5023_v27  ;;  %v5055_v27 = vadd.f32 %v6067_v41, %v9494_v5 }
 0x48e   : > { %v6157_v44 = vpop.f32.mrf.mxu1 }
 0x48f   : > { %v5922_v4 = vpack.c.bf16 %v5184_v9, %v5181_v10  ;;  %v6158_v61 = vadd.f32 %v6157_v44, %v6156_v22  ;;  %v6078_v22 = vpop.f32.mrf.mxu0 }
 0x490   : > { %v6159_v34 = vpop.f32.mrf.mxu1  ;;  %v6079_v37 = vadd.f32 %v6078_v22, %v6077_v2 }
 0x491   : > { %5966 = vst [vmem:[%s9507_s25 + $0x40] sm:$0xff] %v5922_v4   ;;  %v5189_v19 = vadd.f32 %v6158_v61, %v5028_v53  ;;  %v6080_v52 = vpop.f32.mrf.mxu0  ;;  %v5060_v61 = vadd.f32 %v6070_v40, %v9494_v5 }
 0x492   : > { %v6160_v62 = vpop.f32.mrf.mxu1 }
 0x493   : > { %v6161_v46 = vadd.f32 %v6160_v62, %v6159_v34  ;;  %v5063_v62 = vadd.f32 %v6073_v3, %v9494_v5 }
 0x494   : > { %v6162_v6 = vpop.f32.mrf.mxu1 }
 0x495   : > { %v5192_v15 = vadd.f32 %v6161_v46, %v5031_v36  ;;  %v6081_v36 = vpop.f32.mrf.mxu0 }
 0x496   : > { %v6163_v57 = vpop.f32.mrf.mxu1 }
 0x497   : > { %v5927_v33 = vpack.c.bf16 %v5192_v15, %v5189_v19  ;;  %v6164_v12 = vadd.f32 %v6163_v57, %v6162_v6  ;;  %v6076_v57 = vadd.f32 %v6075_v23, %v6074_v51  ;;  %v6083_v58 = vpop.f32.mrf.mxu0 }
 0x498   : > { %v6165_v60 = vpop.f32.mrf.mxu1 }
 0x499   : > { %5967 = vst [vmem:[%s9507_s25 + $0x48] sm:$0xff] %v5927_v33   ;;  %v5197_v32 = vadd.f32 %v6164_v12, %v5036_v42  ;;  %v5071_v12 = vadd.f32 %v6079_v37, %v9494_v5  ;;  %v6084_v42 = vpop.f32.mrf.mxu0 }
 0x49a   : > { %v6166_v21 = vpop.f32.mrf.mxu1 }
 0x49b   : > { %v6167_v45 = vadd.f32 %v6166_v21, %v6165_v60  ;;  %v5068_v60 = vadd.f32 %v6076_v57, %v9494_v5 }
 0x49c   : > { %v6168_v49 = vpop.f32.mrf.mxu1 }
 0x49d   : > { %v5200_v54 = vadd.f32 %v6167_v45, %v5039_v39 }
 0x49e   : > { %v6169_v16 = vpop.f32.mrf.mxu1 }
 0x49f   : > { %v5932_v30 = vpack.c.bf16 %v5200_v54, %v5197_v32  ;;  %v6170_v7 = vadd.f32 %v6169_v16, %v6168_v49  ;;  %v6082_v32 = vadd.f32 %v6081_v36, %v6080_v52  ;;  %v6085_v54 = vadd.f32 %v6084_v42, %v6083_v58 }
 0x4a0   : > { %v6171_v13 = vpop.f32.mrf.mxu1 }
 0x4a1   : > { %5968 = vst [vmem:[%s9507_s25 + $0x50] sm:$0xff] %v5932_v30   ;;  %v5205_v28 = vadd.f32 %v6170_v7, %v5044_v25  ;;  %v5076_v51 = vadd.f32 %v6082_v32, %v9494_v5 }
 0x4a2   : > { %v6172_v8 = vpop.f32.mrf.mxu1 }
 0x4a3   : > { %v6173_v38 = vadd.f32 %v6172_v8, %v6171_v13  ;;  %v5079_v13 = vadd.f32 %v6085_v54, %v9494_v5 }
 0x4a4   : > { %v6174_v35 = vpop.f32.mrf.mxu1 }
 0x4a5   : > { %v5208_v59 = vadd.f32 %v6173_v38, %v5047_v11 }
 0x4a6   : > { %v6175_v63 = vpop.f32.mrf.mxu1 }
 0x4a7   : > { %v5937_v26 = vpack.c.bf16 %v5208_v59, %v5205_v28  ;;  %v6176_v17 = vadd.f32 %v6175_v63, %v6174_v35 }
 0x4a8   : > { %v6177_v14 = vpop.f32.mrf.mxu1 }
 0x4a9   : > { %5969 = vst [vmem:[%s9507_s25 + $0x58] sm:$0xff] %v5937_v26   ;;  %v5213_v9 = vadd.f32 %v6176_v17, %v5052_v20 }
 0x4aa   : > { %v6178_v18 = vpop.f32.mrf.mxu1 }
 0x4ab   : > { %v6179_v43 = vadd.f32 %v6178_v18, %v6177_v14 }
 0x4ac   : > { %v6180_v10 = vpop.f32.mrf.mxu1 }
 0x4ad   : > { %v5216_v44 = vadd.f32 %v6179_v43, %v5055_v27 }
 0x4ae   : > { %v6181_v50 = vpop.f32.mrf.mxu1 }
 0x4af   : > { %v5942_v48 = vpack.c.bf16 %v5216_v44, %v5213_v9  ;;  %v6182_v4 = vadd.f32 %v6181_v50, %v6180_v10 }
 0x4b0   : > { %v6183_v55 = vpop.f32.mrf.mxu1 }
 0x4b1   : > { %5970 = vst [vmem:[%s9507_s25 + $0x60] sm:$0xff] %v5942_v48   ;;  %v5221_v6 = vadd.f32 %v6182_v4, %v5060_v61 }
 0x4b2   : > { %v6184_v34 = vpop.f32.mrf.mxu1 }
 0x4b3   : > { %v6185_v53 = vadd.f32 %v6184_v34, %v6183_v55 }
 0x4b4   : > { %v6186_v46 = vpop.f32.mrf.mxu1 }
 0x4b5   : > { %v5224_v19 = vadd.f32 %v6185_v53, %v5063_v62 }
 0x4b6   : > { %v6187_v15 = vpop.f32.mrf.mxu1 }
 0x4b7   : > { %v5947_v1 = vpack.c.bf16 %v5224_v19, %v5221_v6  ;;  %v6188_v33 = vadd.f32 %v6187_v15, %v6186_v46 }
 0x4b8   : > { %v6189_v56 = vpop.f32.mrf.mxu1 }
 0x4b9   : > { %5971 = vst [vmem:[%s9507_s25 + $0x68] sm:$0xff] %v5947_v1   ;;  %v5229_v45 = vadd.f32 %v6188_v33, %v5068_v60 }
 0x4ba   : > { %v6190_v24 = vpop.f32.mrf.mxu1 }
 0x4bb   : > { %v6191_v21 = vadd.f32 %v6190_v24, %v6189_v56 }
 0x4bc   : > { %v6192_v39 = vpop.f32.mrf.mxu1 }
 0x4bd   : > { %v5232_v31 = vadd.f32 %v6191_v21, %v5071_v12 }
 0x4be   : > { %v6193_v49 = vpop.f32.mrf.mxu1 }
 0x4bf   : > { %v5952_v16 = vpack.c.bf16 %v5232_v31, %v5229_v45  ;;  %v6194_v0 = vadd.f32 %v6193_v49, %v6192_v39 }
 0x4c0   : > { %v6195_v29 = vpop.f32.mrf.mxu1 }
 0x4c1   : > { %5972 = vst [vmem:[%s9507_s25 + $0x70] sm:$0xff] %v5952_v16   ;;  %v5237_v8 = vadd.f32 %v6194_v0, %v5076_v51 }
 0x4c2   : > { %v6196_v30 = vpop.f32.mrf.mxu1 }
 0x4c3   : > { %v6197_v7 = vadd.f32 %v6196_v30, %v6195_v29 }
 0x4c5   : > { %v5240_v25 = vadd.f32 %v6197_v7, %v5079_v13 }
 0x4c7   : > { %v5957_v11 = vpack.c.bf16 %v5240_v25, %v5237_v8 }
 0x4c9   : > { %5973 = vst [vmem:[%s9507_s25 + $0x78] sm:$0xff] %v5957_v11  }
 0x4ca PF: > { %s19_s30 = sadd.s32 1, %s6656_s30  }
 0x4cb   : > { %p16_p4 = scmp.ge.s32.totalorder %s19_s30, 4  }
 0x4cd   :  { %18 = sbr.rel (!%p16_p4) target bundleno = 1 (0x1), region = 86 }

</bundles_post_ra>
